<compile_context>
chip_gen: v6e
topology: v6e:2x2x1
jax: 0.10.0
libtpu: 0.0.40
codegen_flags: <defaults>
</compile_context>

<pallas_src>
import functools

import jax
import jax.numpy as jnp
from jax.experimental import pallas as pl
from jax.experimental.pallas import tpu as pltpu

EPS = 1e-5
NEG_SLOPE = 0.1
VMEM_LIMIT = 48 * 1024 * 1024     # safe scoped-VMEM budget on v5e/v6e/v7x
VMEM_BLOCK_BUDGET = 34 * 1024 * 1024


def _round_up(x, m):
    return (x + m - 1) // m * m


# ----------------------------------------------------------------------------
# Fused-im2col conv accumulation: 16 tap matmuls over parity-plane strips.
#   body_ref: (2, 2, tile_m,  C_in) bf16   (plane rows [t*tile_m, (t+1)*tile_m))
#   halo_ref: (2, 2, S_p_pad, C_in) bf16   (the next S_p_pad plane rows)
#   w_ref:    (16, C_in, Cp)        bf16   (tap-major conv weights, resident)
#   acc_ref:  (tile_m, Cp)          f32    (VMEM scratch accumulator)
# ----------------------------------------------------------------------------
def _conv_accumulate(body_ref, halo_ref, w_ref, acc_ref, *, s_p):
    tile_m = acc_ref.shape[0]
    first = True
    for pr in range(2):            # kernel-row parity
        for pc in range(2):        # kernel-col parity
            # Contiguous strip of this parity plane covering all 4 tap shifts.
            strip = jnp.concatenate(
                [body_ref[pr, pc], halo_ref[pr, pc]], axis=0)
            for di in range(2):    # kernel-row shift (kh // 2)
                for dj in range(2):   # kernel-col shift (kw // 2)
                    off = di * s_p + dj
                    tap = (2 * di + pr) * 4 + (2 * dj + pc)   # = kh*4 + kw
                    lhs = strip[off:off + tile_m, :]
                    contrib = jnp.dot(lhs, w_ref[tap],
                                      preferred_element_type=jnp.float32)
                    if first:
                        acc_ref[...] = contrib
                        first = False
                    else:
                        acc_ref[...] += contrib


# ----------------------------------------------------------------------------
# Pass 1: fused-im2col conv + masked per-channel sum / sum-of-squares.
# (No conv bias: training-mode BN cancels it exactly.)
# ----------------------------------------------------------------------------
def _conv_stats_kernel(mask_ref, body_ref, halo_ref, w_ref,
                       sum_ref, sumsq_ref, acc_ref, *, s_p):
    @pl.when(pl.program_id(1) == 0)
    def _():
        sum_ref[...] = jnp.zeros_like(sum_ref)
        sumsq_ref[...] = jnp.zeros_like(sumsq_ref)

    _conv_accumulate(body_ref, halo_ref, w_ref, acc_ref, s_p=s_p)

    # Mask out the fake "seam" columns / padded rows of the flattened output
    # grid so batch statistics stay exact.
    y = acc_ref[...] * mask_ref[...]                 # (tile_m, Cp) * (tile_m, 1)
    sum_ref[...] += jnp.sum(y, axis=0, keepdims=True)
    sumsq_ref[...] += jnp.sum(y * y, axis=0, keepdims=True)


# ----------------------------------------------------------------------------
# Pass 2: fused-im2col conv (recomputed) + folded BN scale/shift + LeakyReLU.
# ----------------------------------------------------------------------------
def _bn_lrelu_kernel(body_ref, halo_ref, w_ref, scale_ref, shift_ref,
                     out_ref, acc_ref, *, s_p):
    _conv_accumulate(body_ref, halo_ref, w_ref, acc_ref, s_p=s_p)
    z = acc_ref[...] * scale_ref[...] + shift_ref[...]
    out_ref[...] = jnp.where(z >= 0, z, NEG_SLOPE * z).astype(out_ref.dtype)


# ----------------------------------------------------------------------------
# Public forward
# ----------------------------------------------------------------------------
def down_forward(x_nchw, weight, bias, gamma, beta, *, target_rows=2048):
    """PyTorch-equivalent forward. x_nchw: (N, C_in, H, W); weight: (C_out, C_in, 4, 4)."""
    del bias  # Exactly cancelled by training-mode BatchNorm (kept for interface parity).

    c_out, c_in, kh, kw = weight.shape
    assert (kh, kw) == (4, 4)
    n, _, h, w = x_nchw.shape
    assert h % 2 == 0 and w % 2 == 0, "even spatial dims expected (k=4, s=2, p=1)"
    h_out, w_out = h // 2, w // 2

    s_p = w_out + 1                       # flattened fake-row width == plane width
    s_p_pad = _round_up(s_p + 1, 8)       # halo rows per tile (>= s_p + 1, mult of 8)
    m_img = h_out * s_p                   # flat (fake) output positions per image
    cp = _round_up(c_out, 128)            # lane-dense output channels

    # ---- tile_m = k * s_p_pad, as large as the VMEM block budget allows ----
    per_k = (2 * 4 * s_p_pad * c_in * 2   # double-buffered body blocks (4 planes)
             + 2 * s_p_pad * cp * 2       # double-buffered bf16 output block
             + s_p_pad * cp * 4           # f32 accumulator scratch
             + 2 * s_p_pad * 4)           # mask block
    fixed = (2 * 4 * s_p_pad * c_in * 2   # halo blocks
             + 2 * 16 * c_in * cp * 2     # resident tap weights
             + 8 * cp * 4)                # stats / scale / shift rows
    k_budget = max(1, (VMEM_BLOCK_BUDGET - fixed) // per_k)
    k_cap = pl.cdiv(m_img, s_p_pad)
    k = max(1, min(max(1, target_rows // s_p_pad), k_cap, k_budget))
    tile_m = k * s_p_pad
    n_tiles = pl.cdiv(m_img, tile_m)
    m_pad = n_tiles * tile_m
    flat_len = m_pad + s_p_pad            # per-image flat plane length (incl. halo pad)

    # ---- parity-split planes, flattened per image, bf16 ----
    x_nhwc = jnp.transpose(x_nchw, (0, 2, 3, 1)).astype(jnp.float32)
    xp = jnp.pad(x_nhwc, ((0, 0), (1, 1), (1, 1), (0, 0)))
    planes = xp.reshape(n, h_out + 1, 2, w_out + 1, 2, c_in).transpose(0, 2, 4, 1, 3, 5)
    planes = planes.reshape(n, 2, 2, (h_out + 1) * s_p, c_in).astype(jnp.bfloat16)
    planes = jnp.pad(planes, ((0, 0), (0, 0), (0, 0),
                              (0, flat_len - (h_out + 1) * s_p), (0, 0)))

    # ---- tap-major conv weights (16, C_in, Cp), bf16 ----
    w_k = jnp.transpose(weight.astype(jnp.float32), (2, 3, 1, 0)).reshape(16, c_in, c_out)
    w_k = jnp.pad(w_k, ((0, 0), (0, 0), (0, cp - c_out))).astype(jnp.bfloat16)

    # ---- validity mask for batch statistics (seam columns / pad rows -> 0) ----
    midx = jnp.arange(m_pad, dtype=jnp.int32)
    mask = (((midx % s_p) < w_out) & (midx < m_img)).astype(jnp.float32)[:, None]

    grid = (n, n_tiles)
    body_spec = pl.BlockSpec((None, 2, 2, tile_m, c_in), lambda b, t: (b, 0, 0, t, 0))
    halo_spec = pl.BlockSpec((None, 2, 2, s_p_pad, c_in),
                             lambda b, t, _k=k: (b, 0, 0, (t + 1) * _k, 0))
    w_spec = pl.BlockSpec((16, c_in, cp), lambda b, t: (0, 0, 0))          # resident
    mask_spec = pl.BlockSpec((tile_m, 1), lambda b, t: (t, 0))
    row_spec = pl.BlockSpec((1, cp), lambda b, t: (0, 0))                  # resident
    stats_spec = pl.BlockSpec((None, 1, cp), lambda b, t: (b, 0, 0))       # per-image acc
    out_spec = pl.BlockSpec((None, tile_m, cp), lambda b, t: (b, t, 0))
    acc_scratch = pltpu.VMEM((tile_m, cp), jnp.float32)

    matmul_flops = 2 * n * m_pad * (16 * c_in) * cp
    plane_bytes = n * 4 * flat_len * c_in * 2
    w_bytes = 16 * c_in * cp * 2

    # ---- Pass 1: conv + batch statistics (accumulated across M tiles) ----
    ch_sum, ch_sumsq = pl.pallas_call(
        functools.partial(_conv_stats_kernel, s_p=s_p),
        out_shape=(jax.ShapeDtypeStruct((n, 1, cp), jnp.float32),
                   jax.ShapeDtypeStruct((n, 1, cp), jnp.float32)),
        grid=grid,
        in_specs=[mask_spec, body_spec, halo_spec, w_spec],
        out_specs=(stats_spec, stats_spec),
        scratch_shapes=[acc_scratch],
        compiler_params=pltpu.CompilerParams(
            dimension_semantics=("parallel", "arbitrary"),
            vmem_limit_bytes=VMEM_LIMIT),
        cost_estimate=pl.CostEstimate(
            flops=int(matmul_flops + 4 * n * m_pad * cp),
            transcendentals=0,
            bytes_accessed=int(plane_bytes + w_bytes + m_pad * 4 + 2 * n * cp * 4)),
    )(mask, planes, planes, w_k)

    # ---- Fold BN into a per-channel scale/shift (runs once, plain JAX) ----
    cnt = float(n * h_out * w_out)
    mean = jnp.sum(ch_sum, axis=0) / cnt                                   # (1, cp)
    var = jnp.maximum(jnp.sum(ch_sumsq, axis=0) / cnt - mean * mean, 0.0)  # biased var
    g_row = jnp.pad(gamma.astype(jnp.float32).reshape(1, c_out), ((0, 0), (0, cp - c_out)))
    b_row = jnp.pad(beta.astype(jnp.float32).reshape(1, c_out), ((0, 0), (0, cp - c_out)))
    scale = g_row * jax.lax.rsqrt(var + EPS)
    shift = b_row - mean * scale

    # ---- Pass 2: conv recompute + fused BN + LeakyReLU, bf16 writeback ----
    out = pl.pallas_call(
        functools.partial(_bn_lrelu_kernel, s_p=s_p),
        out_shape=jax.ShapeDtypeStruct((n, m_pad, cp), jnp.bfloat16),
        grid=grid,
        in_specs=[body_spec, halo_spec, w_spec, row_spec, row_spec],
        out_specs=out_spec,
        scratch_shapes=[acc_scratch],
        compiler_params=pltpu.CompilerParams(
            dimension_semantics=("parallel", "parallel"),
            vmem_limit_bytes=VMEM_LIMIT),
        cost_estimate=pl.CostEstimate(
            flops=int(matmul_flops + 4 * n * m_pad * cp),
            transcendentals=0,
            bytes_accessed=int(plane_bytes + w_bytes + n * m_pad * cp * 2)),
    )(planes, planes, w_k, scale, shift)

    # (N, M_pad, Cp) -> strip fake columns / padded rows / padded channels -> NCHW f32
    out = out[:, :m_img, :].reshape(n, h_out, s_p, cp)[:, :, :w_out, :c_out]
    return jnp.transpose(out, (0, 3, 1, 2)).astype(jnp.float32)


def init_params(key, in_channels, out_channels, kh=4, kw=4):
    """Deterministic init mimicking PyTorch Conv2d defaults; BN gamma=1, beta=0."""
    k_w, k_b = jax.random.split(key)
    fan_in = in_channels * kh * kw
    bound = 1.0 / jnp.sqrt(fan_in)
    weight = jax.random.uniform(
        k_w, (out_channels, in_channels, kh, kw), jnp.float32, -bound, bound)
    bias = jax.random.uniform(k_b, (out_channels,), jnp.float32, -bound, bound)
    gamma = jnp.ones((out_channels,), jnp.float32)
    beta = jnp.zeros((out_channels,), jnp.float32)
    return weight, bias, gamma, beta


def _reference(x, weight, bias, gamma, beta):
    """Pure-JAX f32 reference of the PyTorch module (training-mode BN)."""
    y = jax.lax.conv_general_dilated(
        x, weight, window_strides=(2, 2), padding=((1, 1), (1, 1)),
        dimension_numbers=("NCHW", "OIHW", "NCHW"))
    y = y + bias[None, :, None, None]
    mean = jnp.mean(y, axis=(0, 2, 3), keepdims=True)
    var = jnp.var(y, axis=(0, 2, 3), keepdims=True)
    y = (y - mean) * jax.lax.rsqrt(var + EPS)
    y = y * gamma[None, :, None, None] + beta[None, :, None, None]
    return jnp.where(y >= 0, y, NEG_SLOPE * y)


if __name__ == "__main__":
    key = jax.random.PRNGKey(0)
    k_x, k_p = jax.random.split(key)

    N, C_IN, H, W = 2, 4, 16, 16
    C_OUT = 8

    x = jax.random.normal(k_x, (N, C_IN, H, W), jnp.float32)
    weight, bias, gamma, beta = init_params(k_p, C_IN, C_OUT)

    fwd = jax.jit(down_forward)
    y = jax.block_until_ready(fwd(x, weight, bias, gamma, beta))

    assert y.shape == (N, C_OUT, H // 2, W // 2), y.shape
    assert bool(jnp.all(jnp.isfinite(y)))
    err = float(jnp.max(jnp.abs(y - _reference(x, weight, bias, gamma, beta))))
    assert err < 0.1, f"max abs error vs f32 reference: {err}"
    print("KERNEL_OK")
</pallas_src>

<mosaic_0001>
module attributes {stable_mosaic.version = 11 : i64} {
  func.func @_conv_stats_kernel(%arg0: i32, %arg1: i32, %arg2: memref<80x1xf32, #tpu.memory_space<vmem>>, %arg3: memref<1x2x2x80x4xbf16, #tpu.memory_space<vmem>>, %arg4: memref<1x2x2x16x4xbf16, #tpu.memory_space<vmem>>, %arg5: memref<16x4x128xbf16, #tpu.memory_space<vmem>>, %arg6: memref<1x1x128xf32, #tpu.memory_space<vmem>>, %arg7: memref<1x1x128xf32, #tpu.memory_space<vmem>>, %arg8: memref<80x128xf32, #tpu.memory_space<vmem>>) attributes {dimension_semantics = [#tpu.dimension_semantics<parallel>, #tpu.dimension_semantics<arbitrary>], iteration_bounds = array<i64: 2, 1>, scalar_prefetch = 0 : i64, scratch_operands = 1 : i64, tpu.core_type = #tpu.core_type<tc>, window_params = [{transform_indices = @transform_0, window_bounds = array<i64: 80, 1>}, {transform_indices = @transform_1, window_bounds = array<i64: 1, 2, 2, 80, 4>}, {transform_indices = @transform_2, window_bounds = array<i64: 1, 2, 2, 16, 4>}, {pipeline_mode = #tpu.pipeline_mode<synchronous>, transform_indices = @transform_3, window_bounds = array<i64: 16, 4, 128>}, {transform_indices = @transform_4, window_bounds = array<i64: 1, 1, 128>}, {transform_indices = @transform_5, window_bounds = array<i64: 1, 1, 128>}]} {
    %c0_i32 = arith.constant 0 : i32
    %0 = arith.cmpi eq, %arg1, %c0_i32 : i32
    %1 = arith.extui %0 : i1 to i32
    %c0_i32_0 = arith.constant 0 : i32
    %2 = arith.cmpi ne, %1, %c0_i32_0 : i32
    scf.if %2 {
      %cst_168 = arith.constant 0.000000e+00 : f32
      %154 = vector.broadcast %cst_168 : f32 to vector<1x128xf32>
      %c0_169 = arith.constant 0 : index
      %c0_170 = arith.constant 0 : index
      %c0_171 = arith.constant 0 : index
      %155 = vector.load %arg6[%c0_169, %c0_170, %c0_171] : memref<1x1x128xf32, #tpu.memory_space<vmem>>, vector<1x1x128xf32>
      %156 = vector.shape_cast %155 : vector<1x1x128xf32> to vector<1x128xf32>
      %157 = vector.shape_cast %154 : vector<1x128xf32> to vector<1x1x128xf32>
      tpu.vector_store %arg6[%c0_169, %c0_170, %c0_171], %157 {strides = array<i32>} : memref<1x1x128xf32, #tpu.memory_space<vmem>>, vector<1x1x128xf32>,
      %cst_172 = arith.constant 0.000000e+00 : f32
      %158 = vector.broadcast %cst_172 : f32 to vector<1x128xf32>
      %c0_173 = arith.constant 0 : index
      %c0_174 = arith.constant 0 : index
      %c0_175 = arith.constant 0 : index
      %159 = vector.load %arg7[%c0_173, %c0_174, %c0_175] : memref<1x1x128xf32, #tpu.memory_space<vmem>>, vector<1x1x128xf32>
      %160 = vector.shape_cast %159 : vector<1x1x128xf32> to vector<1x128xf32>
      %161 = vector.shape_cast %158 : vector<1x128xf32> to vector<1x1x128xf32>
      tpu.vector_store %arg7[%c0_173, %c0_174, %c0_175], %161 {strides = array<i32>} : memref<1x1x128xf32, #tpu.memory_space<vmem>>, vector<1x1x128xf32>,
    } else {
    }
    %c0 = arith.constant 0 : index
    %c0_1 = arith.constant 0 : index
    %c0_2 = arith.constant 0 : index
    %c0_3 = arith.constant 0 : index
    %c0_4 = arith.constant 0 : index
    %3 = vector.load %arg3[%c0, %c0_1, %c0_2, %c0_3, %c0_4] : memref<1x2x2x80x4xbf16, #tpu.memory_space<vmem>>, vector<1x1x1x80x4xbf16>
    %4 = vector.shape_cast %3 : vector<1x1x1x80x4xbf16> to vector<80x4xbf16>
    %c0_5 = arith.constant 0 : index
    %c0_6 = arith.constant 0 : index
    %c0_7 = arith.constant 0 : index
    %c0_8 = arith.constant 0 : index
    %c0_9 = arith.constant 0 : index
    %5 = vector.load %arg4[%c0_5, %c0_6, %c0_7, %c0_8, %c0_9] : memref<1x2x2x16x4xbf16, #tpu.memory_space<vmem>>, vector<1x1x1x16x4xbf16>
    %6 = vector.shape_cast %5 : vector<1x1x1x16x4xbf16> to vector<16x4xbf16>
    %7 = tpu.concatenate %4, %6 in 0 : vector<80x4xbf16>, vector<16x4xbf16> -> vector<96x4xbf16>
    %8 = vector.extract_strided_slice %7 {offsets = [0, 0], sizes = [80, 4], strides = [1, 1]} : vector<96x4xbf16> to vector<80x4xbf16>
    %c0_10 = arith.constant 0 : index
    %c0_11 = arith.constant 0 : index
    %c0_12 = arith.constant 0 : index
    %9 = vector.load %arg5[%c0_10, %c0_11, %c0_12] : memref<16x4x128xbf16, #tpu.memory_space<vmem>>, vector<1x4x128xbf16>
    %10 = vector.shape_cast %9 : vector<1x4x128xbf16> to vector<4x128xbf16>
    %cst = arith.constant dense<0.000000e+00> : vector<80x128xf32>
    %11 = tpu.matmul %8, %10, %cst {dimension_numbers = #tpu.dot_dimension_numbers<[1], [0], [0], [1], [0, 0, 1, 1], [], []>} : vector<80x4xbf16>, vector<4x128xbf16>, vector<80x128xf32> -> vector<80x128xf32>
    %c0_13 = arith.constant 0 : index
    %c0_14 = arith.constant 0 : index
    %12 = vector.load %arg8[%c0_13, %c0_14] : memref<80x128xf32, #tpu.memory_space<vmem>>, vector<80x128xf32>
    tpu.vector_store %arg8[%c0_13, %c0_14], %11 {strides = array<i32>} : memref<80x128xf32, #tpu.memory_space<vmem>>, vector<80x128xf32>,
    %13 = vector.extract_strided_slice %7 {offsets = [1, 0], sizes = [80, 4], strides = [1, 1]} : vector<96x4xbf16> to vector<80x4xbf16>
    %c2 = arith.constant 2 : index
    %c0_15 = arith.constant 0 : index
    %c0_16 = arith.constant 0 : index
    %14 = vector.load %arg5[%c2, %c0_15, %c0_16] : memref<16x4x128xbf16, #tpu.memory_space<vmem>>, vector<1x4x128xbf16>
    %15 = vector.shape_cast %14 : vector<1x4x128xbf16> to vector<4x128xbf16>
    %cst_17 = arith.constant dense<0.000000e+00> : vector<80x128xf32>
    %16 = tpu.matmul %13, %15, %cst_17 {dimension_numbers = #tpu.dot_dimension_numbers<[1], [0], [0], [1], [0, 0, 1, 1], [], []>} : vector<80x4xbf16>, vector<4x128xbf16>, vector<80x128xf32> -> vector<80x128xf32>
    %c0_18 = arith.constant 0 : index
    %c0_19 = arith.constant 0 : index
    %17 = vector.load %arg8[%c0_18, %c0_19] : memref<80x128xf32, #tpu.memory_space<vmem>>, vector<80x128xf32>
    %18 = arith.addf %17, %16 : vector<80x128xf32>
    %c0_20 = arith.constant 0 : index
    %c0_21 = arith.constant 0 : index
    %19 = vector.load %arg8[%c0_20, %c0_21] : memref<80x128xf32, #tpu.memory_space<vmem>>, vector<80x128xf32>
    tpu.vector_store %arg8[%c0_20, %c0_21], %18 {strides = array<i32>} : memref<80x128xf32, #tpu.memory_space<vmem>>, vector<80x128xf32>,
    %20 = vector.extract_strided_slice %7 {offsets = [9, 0], sizes = [80, 4], strides = [1, 1]} : vector<96x4xbf16> to vector<80x4xbf16>
    %c8 = arith.constant 8 : index
    %c0_22 = arith.constant 0 : index
    %c0_23 = arith.constant 0 : index
    %21 = vector.load %arg5[%c8, %c0_22, %c0_23] : memref<16x4x128xbf16, #tpu.memory_space<vmem>>, vector<1x4x128xbf16>
    %22 = vector.shape_cast %21 : vector<1x4x128xbf16> to vector<4x128xbf16>
    %cst_24 = arith.constant dense<0.000000e+00> : vector<80x128xf32>
    %23 = tpu.matmul %20, %22, %cst_24 {dimension_numbers = #tpu.dot_dimension_numbers<[1], [0], [0], [1], [0, 0, 1, 1], [], []>} : vector<80x4xbf16>, vector<4x128xbf16>, vector<80x128xf32> -> vector<80x128xf32>
    %c0_25 = arith.constant 0 : index
    %c0_26 = arith.constant 0 : index
    %24 = vector.load %arg8[%c0_25, %c0_26] : memref<80x128xf32, #tpu.memory_space<vmem>>, vector<80x128xf32>
    %25 = arith.addf %24, %23 : vector<80x128xf32>
    %c0_27 = arith.constant 0 : index
    %c0_28 = arith.constant 0 : index
    %26 = vector.load %arg8[%c0_27, %c0_28] : memref<80x128xf32, #tpu.memory_space<vmem>>, vector<80x128xf32>
    tpu.vector_store %arg8[%c0_27, %c0_28], %25 {strides = array<i32>} : memref<80x128xf32, #tpu.memory_space<vmem>>, vector<80x128xf32>,
    %27 = vector.extract_strided_slice %7 {offsets = [10, 0], sizes = [80, 4], strides = [1, 1]} : vector<96x4xbf16> to vector<80x4xbf16>
    %c10 = arith.constant 10 : index
    %c0_29 = arith.constant 0 : index
    %c0_30 = arith.constant 0 : index
    %28 = vector.load %arg5[%c10, %c0_29, %c0_30] : memref<16x4x128xbf16, #tpu.memory_space<vmem>>, vector<1x4x128xbf16>
    %29 = vector.shape_cast %28 : vector<1x4x128xbf16> to vector<4x128xbf16>
    %cst_31 = arith.constant dense<0.000000e+00> : vector<80x128xf32>
    %30 = tpu.matmul %27, %29, %cst_31 {dimension_numbers = #tpu.dot_dimension_numbers<[1], [0], [0], [1], [0, 0, 1, 1], [], []>} : vector<80x4xbf16>, vector<4x128xbf16>, vector<80x128xf32> -> vector<80x128xf32>
    %c0_32 = arith.constant 0 : index
    %c0_33 = arith.constant 0 : index
    %31 = vector.load %arg8[%c0_32, %c0_33] : memref<80x128xf32, #tpu.memory_space<vmem>>, vector<80x128xf32>
    %32 = arith.addf %31, %30 : vector<80x128xf32>
    %c0_34 = arith.constant 0 : index
    %c0_35 = arith.constant 0 : index
    %33 = vector.load %arg8[%c0_34, %c0_35] : memref<80x128xf32, #tpu.memory_space<vmem>>, vector<80x128xf32>
    tpu.vector_store %arg8[%c0_34, %c0_35], %32 {strides = array<i32>} : memref<80x128xf32, #tpu.memory_space<vmem>>, vector<80x128xf32>,
    %c0_36 = arith.constant 0 : index
    %c0_37 = arith.constant 0 : index
    %c1 = arith.constant 1 : index
    %c0_38 = arith.constant 0 : index
    %c0_39 = arith.constant 0 : index
    %34 = vector.load %arg3[%c0_36, %c0_37, %c1, %c0_38, %c0_39] : memref<1x2x2x80x4xbf16, #tpu.memory_space<vmem>>, vector<1x1x1x80x4xbf16>
    %35 = vector.shape_cast %34 : vector<1x1x1x80x4xbf16> to vector<80x4xbf16>
    %c0_40 = arith.constant 0 : index
    %c0_41 = arith.constant 0 : index
    %c1_42 = arith.constant 1 : index
    %c0_43 = arith.constant 0 : index
    %c0_44 = arith.constant 0 : index
    %36 = vector.load %arg4[%c0_40, %c0_41, %c1_42, %c0_43, %c0_44] : memref<1x2x2x16x4xbf16, #tpu.memory_space<vmem>>, vector<1x1x1x16x4xbf16>
    %37 = vector.shape_cast %36 : vector<1x1x1x16x4xbf16> to vector<16x4xbf16>
    %38 = tpu.concatenate %35, %37 in 0 : vector<80x4xbf16>, vector<16x4xbf16> -> vector<96x4xbf16>
    %39 = vector.extract_strided_slice %38 {offsets = [0, 0], sizes = [80, 4], strides = [1, 1]} : vector<96x4xbf16> to vector<80x4xbf16>
    %c1_45 = arith.constant 1 : index
    %c0_46 = arith.constant 0 : index
    %c0_47 = arith.constant 0 : index
    %40 = vector.load %arg5[%c1_45, %c0_46, %c0_47] : memref<16x4x128xbf16, #tpu.memory_space<vmem>>, vector<1x4x128xbf16>
    %41 = vector.shape_cast %40 : vector<1x4x128xbf16> to vector<4x128xbf16>
    %cst_48 = arith.constant dense<0.000000e+00> : vector<80x128xf32>
    %42 = tpu.matmul %39, %41, %cst_48 {dimension_numbers = #tpu.dot_dimension_numbers<[1], [0], [0], [1], [0, 0, 1, 1], [], []>} : vector<80x4xbf16>, vector<4x128xbf16>, vector<80x128xf32> -> vector<80x128xf32>
    %c0_49 = arith.constant 0 : index
    %c0_50 = arith.constant 0 : index
    %43 = vector.load %arg8[%c0_49, %c0_50] : memref<80x128xf32, #tpu.memory_space<vmem>>, vector<80x128xf32>
    %44 = arith.addf %43, %42 : vector<80x128xf32>
    %c0_51 = arith.constant 0 : index
    %c0_52 = arith.constant 0 : index
    %45 = vector.load %arg8[%c0_51, %c0_52] : memref<80x128xf32, #tpu.memory_space<vmem>>, vector<80x128xf32>
    tpu.vector_store %arg8[%c0_51, %c0_52], %44 {strides = array<i32>} : memref<80x128xf32, #tpu.memory_space<vmem>>, vector<80x128xf32>,
    %46 = vector.extract_strided_slice %38 {offsets = [1, 0], sizes = [80, 4], strides = [1, 1]} : vector<96x4xbf16> to vector<80x4xbf16>
    %c3 = arith.constant 3 : index
    %c0_53 = arith.constant 0 : index
    %c0_54 = arith.constant 0 : index
    %47 = vector.load %arg5[%c3, %c0_53, %c0_54] : memref<16x4x128xbf16, #tpu.memory_space<vmem>>, vector<1x4x128xbf16>
    %48 = vector.shape_cast %47 : vector<1x4x128xbf16> to vector<4x128xbf16>
    %cst_55 = arith.constant dense<0.000000e+00> : vector<80x128xf32>
    %49 = tpu.matmul %46, %48, %cst_55 {dimension_numbers = #tpu.dot_dimension_numbers<[1], [0], [0], [1], [0, 0, 1, 1], [], []>} : vector<80x4xbf16>, vector<4x128xbf16>, vector<80x128xf32> -> vector<80x128xf32>
    %c0_56 = arith.constant 0 : index
    %c0_57 = arith.constant 0 : index
    %50 = vector.load %arg8[%c0_56, %c0_57] : memref<80x128xf32, #tpu.memory_space<vmem>>, vector<80x128xf32>
    %51 = arith.addf %50, %49 : vector<80x128xf32>
    %c0_58 = arith.constant 0 : index
    %c0_59 = arith.constant 0 : index
    %52 = vector.load %arg8[%c0_58, %c0_59] : memref<80x128xf32, #tpu.memory_space<vmem>>, vector<80x128xf32>
    tpu.vector_store %arg8[%c0_58, %c0_59], %51 {strides = array<i32>} : memref<80x128xf32, #tpu.memory_space<vmem>>, vector<80x128xf32>,
    %53 = vector.extract_strided_slice %38 {offsets = [9, 0], sizes = [80, 4], strides = [1, 1]} : vector<96x4xbf16> to vector<80x4xbf16>
    %c9 = arith.constant 9 : index
    %c0_60 = arith.constant 0 : index
    %c0_61 = arith.constant 0 : index
    %54 = vector.load %arg5[%c9, %c0_60, %c0_61] : memref<16x4x128xbf16, #tpu.memory_space<vmem>>, vector<1x4x128xbf16>
    %55 = vector.shape_cast %54 : vector<1x4x128xbf16> to vector<4x128xbf16>
    %cst_62 = arith.constant dense<0.000000e+00> : vector<80x128xf32>
    %56 = tpu.matmul %53, %55, %cst_62 {dimension_numbers = #tpu.dot_dimension_numbers<[1], [0], [0], [1], [0, 0, 1, 1], [], []>} : vector<80x4xbf16>, vector<4x128xbf16>, vector<80x128xf32> -> vector<80x128xf32>
    %c0_63 = arith.constant 0 : index
    %c0_64 = arith.constant 0 : index
    %57 = vector.load %arg8[%c0_63, %c0_64] : memref<80x128xf32, #tpu.memory_space<vmem>>, vector<80x128xf32>
    %58 = arith.addf %57, %56 : vector<80x128xf32>
    %c0_65 = arith.constant 0 : index
    %c0_66 = arith.constant 0 : index
    %59 = vector.load %arg8[%c0_65, %c0_66] : memref<80x128xf32, #tpu.memory_space<vmem>>, vector<80x128xf32>
    tpu.vector_store %arg8[%c0_65, %c0_66], %58 {strides = array<i32>} : memref<80x128xf32, #tpu.memory_space<vmem>>, vector<80x128xf32>,
    %60 = vector.extract_strided_slice %38 {offsets = [10, 0], sizes = [80, 4], strides = [1, 1]} : vector<96x4xbf16> to vector<80x4xbf16>
    %c11 = arith.constant 11 : index
    %c0_67 = arith.constant 0 : index
    %c0_68 = arith.constant 0 : index
    %61 = vector.load %arg5[%c11, %c0_67, %c0_68] : memref<16x4x128xbf16, #tpu.memory_space<vmem>>, vector<1x4x128xbf16>
    %62 = vector.shape_cast %61 : vector<1x4x128xbf16> to vector<4x128xbf16>
    %cst_69 = arith.constant dense<0.000000e+00> : vector<80x128xf32>
    %63 = tpu.matmul %60, %62, %cst_69 {dimension_numbers = #tpu.dot_dimension_numbers<[1], [0], [0], [1], [0, 0, 1, 1], [], []>} : vector<80x4xbf16>, vector<4x128xbf16>, vector<80x128xf32> -> vector<80x128xf32>
    %c0_70 = arith.constant 0 : index
    %c0_71 = arith.constant 0 : index
    %64 = vector.load %arg8[%c0_70, %c0_71] : memref<80x128xf32, #tpu.memory_space<vmem>>, vector<80x128xf32>
    %65 = arith.addf %64, %63 : vector<80x128xf32>
    %c0_72 = arith.constant 0 : index
    %c0_73 = arith.constant 0 : index
    %66 = vector.load %arg8[%c0_72, %c0_73] : memref<80x128xf32, #tpu.memory_space<vmem>>, vector<80x128xf32>
    tpu.vector_store %arg8[%c0_72, %c0_73], %65 {strides = array<i32>} : memref<80x128xf32, #tpu.memory_space<vmem>>, vector<80x128xf32>,
    %c0_74 = arith.constant 0 : index
    %c1_75 = arith.constant 1 : index
    %c0_76 = arith.constant 0 : index
    %c0_77 = arith.constant 0 : index
    %c0_78 = arith.constant 0 : index
    %67 = vector.load %arg3[%c0_74, %c1_75, %c0_76, %c0_77, %c0_78] : memref<1x2x2x80x4xbf16, #tpu.memory_space<vmem>>, vector<1x1x1x80x4xbf16>
    %68 = vector.shape_cast %67 : vector<1x1x1x80x4xbf16> to vector<80x4xbf16>
    %c0_79 = arith.constant 0 : index
    %c1_80 = arith.constant 1 : index
    %c0_81 = arith.constant 0 : index
    %c0_82 = arith.constant 0 : index
    %c0_83 = arith.constant 0 : index
    %69 = vector.load %arg4[%c0_79, %c1_80, %c0_81, %c0_82, %c0_83] : memref<1x2x2x16x4xbf16, #tpu.memory_space<vmem>>, vector<1x1x1x16x4xbf16>
    %70 = vector.shape_cast %69 : vector<1x1x1x16x4xbf16> to vector<16x4xbf16>
    %71 = tpu.concatenate %68, %70 in 0 : vector<80x4xbf16>, vector<16x4xbf16> -> vector<96x4xbf16>
    %72 = vector.extract_strided_slice %71 {offsets = [0, 0], sizes = [80, 4], strides = [1, 1]} : vector<96x4xbf16> to vector<80x4xbf16>
    %c4 = arith.constant 4 : index
    %c0_84 = arith.constant 0 : index
    %c0_85 = arith.constant 0 : index
    %73 = vector.load %arg5[%c4, %c0_84, %c0_85] : memref<16x4x128xbf16, #tpu.memory_space<vmem>>, vector<1x4x128xbf16>
    %74 = vector.shape_cast %73 : vector<1x4x128xbf16> to vector<4x128xbf16>
    %cst_86 = arith.constant dense<0.000000e+00> : vector<80x128xf32>
    %75 = tpu.matmul %72, %74, %cst_86 {dimension_numbers = #tpu.dot_dimension_numbers<[1], [0], [0], [1], [0, 0, 1, 1], [], []>} : vector<80x4xbf16>, vector<4x128xbf16>, vector<80x128xf32> -> vector<80x128xf32>
    %c0_87 = arith.constant 0 : index
    %c0_88 = arith.constant 0 : index
    %76 = vector.load %arg8[%c0_87, %c0_88] : memref<80x128xf32, #tpu.memory_space<vmem>>, vector<80x128xf32>
    %77 = arith.addf %76, %75 : vector<80x128xf32>
    %c0_89 = arith.constant 0 : index
    %c0_90 = arith.constant 0 : index
    %78 = vector.load %arg8[%c0_89, %c0_90] : memref<80x128xf32, #tpu.memory_space<vmem>>, vector<80x128xf32>
    tpu.vector_store %arg8[%c0_89, %c0_90], %77 {strides = array<i32>} : memref<80x128xf32, #tpu.memory_space<vmem>>, vector<80x128xf32>,
    %79 = vector.extract_strided_slice %71 {offsets = [1, 0], sizes = [80, 4], strides = [1, 1]} : vector<96x4xbf16> to vector<80x4xbf16>
    %c6 = arith.constant 6 : index
    %c0_91 = arith.constant 0 : index
    %c0_92 = arith.constant 0 : index
    %80 = vector.load %arg5[%c6, %c0_91, %c0_92] : memref<16x4x128xbf16, #tpu.memory_space<vmem>>, vector<1x4x128xbf16>
    %81 = vector.shape_cast %80 : vector<1x4x128xbf16> to vector<4x128xbf16>
    %cst_93 = arith.constant dense<0.000000e+00> : vector<80x128xf32>
    %82 = tpu.matmul %79, %81, %cst_93 {dimension_numbers = #tpu.dot_dimension_numbers<[1], [0], [0], [1], [0, 0, 1, 1], [], []>} : vector<80x4xbf16>, vector<4x128xbf16>, vector<80x128xf32> -> vector<80x128xf32>
    %c0_94 = arith.constant 0 : index
    %c0_95 = arith.constant 0 : index
    %83 = vector.load %arg8[%c0_94, %c0_95] : memref<80x128xf32, #tpu.memory_space<vmem>>, vector<80x128xf32>
    %84 = arith.addf %83, %82 : vector<80x128xf32>
    %c0_96 = arith.constant 0 : index
    %c0_97 = arith.constant 0 : index
    %85 = vector.load %arg8[%c0_96, %c0_97] : memref<80x128xf32, #tpu.memory_space<vmem>>, vector<80x128xf32>
    tpu.vector_store %arg8[%c0_96, %c0_97], %84 {strides = array<i32>} : memref<80x128xf32, #tpu.memory_space<vmem>>, vector<80x128xf32>,
    %86 = vector.extract_strided_slice %71 {offsets = [9, 0], sizes = [80, 4], strides = [1, 1]} : vector<96x4xbf16> to vector<80x4xbf16>
    %c12 = arith.constant 12 : index
    %c0_98 = arith.constant 0 : index
    %c0_99 = arith.constant 0 : index
    %87 = vector.load %arg5[%c12, %c0_98, %c0_99] : memref<16x4x128xbf16, #tpu.memory_space<vmem>>, vector<1x4x128xbf16>
    %88 = vector.shape_cast %87 : vector<1x4x128xbf16> to vector<4x128xbf16>
    %cst_100 = arith.constant dense<0.000000e+00> : vector<80x128xf32>
    %89 = tpu.matmul %86, %88, %cst_100 {dimension_numbers = #tpu.dot_dimension_numbers<[1], [0], [0], [1], [0, 0, 1, 1], [], []>} : vector<80x4xbf16>, vector<4x128xbf16>, vector<80x128xf32> -> vector<80x128xf32>
    %c0_101 = arith.constant 0 : index
    %c0_102 = arith.constant 0 : index
    %90 = vector.load %arg8[%c0_101, %c0_102] : memref<80x128xf32, #tpu.memory_space<vmem>>, vector<80x128xf32>
    %91 = arith.addf %90, %89 : vector<80x128xf32>
    %c0_103 = arith.constant 0 : index
    %c0_104 = arith.constant 0 : index
    %92 = vector.load %arg8[%c0_103, %c0_104] : memref<80x128xf32, #tpu.memory_space<vmem>>, vector<80x128xf32>
    tpu.vector_store %arg8[%c0_103, %c0_104], %91 {strides = array<i32>} : memref<80x128xf32, #tpu.memory_space<vmem>>, vector<80x128xf32>,
    %93 = vector.extract_strided_slice %71 {offsets = [10, 0], sizes = [80, 4], strides = [1, 1]} : vector<96x4xbf16> to vector<80x4xbf16>
    %c14 = arith.constant 14 : index
    %c0_105 = arith.constant 0 : index
    %c0_106 = arith.constant 0 : index
    %94 = vector.load %arg5[%c14, %c0_105, %c0_106] : memref<16x4x128xbf16, #tpu.memory_space<vmem>>, vector<1x4x128xbf16>
    %95 = vector.shape_cast %94 : vector<1x4x128xbf16> to vector<4x128xbf16>
    %cst_107 = arith.constant dense<0.000000e+00> : vector<80x128xf32>
    %96 = tpu.matmul %93, %95, %cst_107 {dimension_numbers = #tpu.dot_dimension_numbers<[1], [0], [0], [1], [0, 0, 1, 1], [], []>} : vector<80x4xbf16>, vector<4x128xbf16>, vector<80x128xf32> -> vector<80x128xf32>
    %c0_108 = arith.constant 0 : index
    %c0_109 = arith.constant 0 : index
    %97 = vector.load %arg8[%c0_108, %c0_109] : memref<80x128xf32, #tpu.memory_space<vmem>>, vector<80x128xf32>
    %98 = arith.addf %97, %96 : vector<80x128xf32>
    %c0_110 = arith.constant 0 : index
    %c0_111 = arith.constant 0 : index
    %99 = vector.load %arg8[%c0_110, %c0_111] : memref<80x128xf32, #tpu.memory_space<vmem>>, vector<80x128xf32>
    tpu.vector_store %arg8[%c0_110, %c0_111], %98 {strides = array<i32>} : memref<80x128xf32, #tpu.memory_space<vmem>>, vector<80x128xf32>,
    %c0_112 = arith.constant 0 : index
    %c1_113 = arith.constant 1 : index
    %c1_114 = arith.constant 1 : index
    %c0_115 = arith.constant 0 : index
    %c0_116 = arith.constant 0 : index
    %100 = vector.load %arg3[%c0_112, %c1_113, %c1_114, %c0_115, %c0_116] : memref<1x2x2x80x4xbf16, #tpu.memory_space<vmem>>, vector<1x1x1x80x4xbf16>
    %101 = vector.shape_cast %100 : vector<1x1x1x80x4xbf16> to vector<80x4xbf16>
    %c0_117 = arith.constant 0 : index
    %c1_118 = arith.constant 1 : index
    %c1_119 = arith.constant 1 : index
    %c0_120 = arith.constant 0 : index
    %c0_121 = arith.constant 0 : index
    %102 = vector.load %arg4[%c0_117, %c1_118, %c1_119, %c0_120, %c0_121] : memref<1x2x2x16x4xbf16, #tpu.memory_space<vmem>>, vector<1x1x1x16x4xbf16>
    %103 = vector.shape_cast %102 : vector<1x1x1x16x4xbf16> to vector<16x4xbf16>
    %104 = tpu.concatenate %101, %103 in 0 : vector<80x4xbf16>, vector<16x4xbf16> -> vector<96x4xbf16>
    %105 = vector.extract_strided_slice %104 {offsets = [0, 0], sizes = [80, 4], strides = [1, 1]} : vector<96x4xbf16> to vector<80x4xbf16>
    %c5 = arith.constant 5 : index
    %c0_122 = arith.constant 0 : index
    %c0_123 = arith.constant 0 : index
    %106 = vector.load %arg5[%c5, %c0_122, %c0_123] : memref<16x4x128xbf16, #tpu.memory_space<vmem>>, vector<1x4x128xbf16>
    %107 = vector.shape_cast %106 : vector<1x4x128xbf16> to vector<4x128xbf16>
    %cst_124 = arith.constant dense<0.000000e+00> : vector<80x128xf32>
    %108 = tpu.matmul %105, %107, %cst_124 {dimension_numbers = #tpu.dot_dimension_numbers<[1], [0], [0], [1], [0, 0, 1, 1], [], []>} : vector<80x4xbf16>, vector<4x128xbf16>, vector<80x128xf32> -> vector<80x128xf32>
    %c0_125 = arith.constant 0 : index
    %c0_126 = arith.constant 0 : index
    %109 = vector.load %arg8[%c0_125, %c0_126] : memref<80x128xf32, #tpu.memory_space<vmem>>, vector<80x128xf32>
    %110 = arith.addf %109, %108 : vector<80x128xf32>
    %c0_127 = arith.constant 0 : index
    %c0_128 = arith.constant 0 : index
    %111 = vector.load %arg8[%c0_127, %c0_128] : memref<80x128xf32, #tpu.memory_space<vmem>>, vector<80x128xf32>
    tpu.vector_store %arg8[%c0_127, %c0_128], %110 {strides = array<i32>} : memref<80x128xf32, #tpu.memory_space<vmem>>, vector<80x128xf32>,
    %112 = vector.extract_strided_slice %104 {offsets = [1, 0], sizes = [80, 4], strides = [1, 1]} : vector<96x4xbf16> to vector<80x4xbf16>
    %c7 = arith.constant 7 : index
    %c0_129 = arith.constant 0 : index
    %c0_130 = arith.constant 0 : index
    %113 = vector.load %arg5[%c7, %c0_129, %c0_130] : memref<16x4x128xbf16, #tpu.memory_space<vmem>>, vector<1x4x128xbf16>
    %114 = vector.shape_cast %113 : vector<1x4x128xbf16> to vector<4x128xbf16>
    %cst_131 = arith.constant dense<0.000000e+00> : vector<80x128xf32>
    %115 = tpu.matmul %112, %114, %cst_131 {dimension_numbers = #tpu.dot_dimension_numbers<[1], [0], [0], [1], [0, 0, 1, 1], [], []>} : vector<80x4xbf16>, vector<4x128xbf16>, vector<80x128xf32> -> vector<80x128xf32>
    %c0_132 = arith.constant 0 : index
    %c0_133 = arith.constant 0 : index
    %116 = vector.load %arg8[%c0_132, %c0_133] : memref<80x128xf32, #tpu.memory_space<vmem>>, vector<80x128xf32>
    %117 = arith.addf %116, %115 : vector<80x128xf32>
    %c0_134 = arith.constant 0 : index
    %c0_135 = arith.constant 0 : index
    %118 = vector.load %arg8[%c0_134, %c0_135] : memref<80x128xf32, #tpu.memory_space<vmem>>, vector<80x128xf32>
    tpu.vector_store %arg8[%c0_134, %c0_135], %117 {strides = array<i32>} : memref<80x128xf32, #tpu.memory_space<vmem>>, vector<80x128xf32>,
    %119 = vector.extract_strided_slice %104 {offsets = [9, 0], sizes = [80, 4], strides = [1, 1]} : vector<96x4xbf16> to vector<80x4xbf16>
    %c13 = arith.constant 13 : index
    %c0_136 = arith.constant 0 : index
    %c0_137 = arith.constant 0 : index
    %120 = vector.load %arg5[%c13, %c0_136, %c0_137] : memref<16x4x128xbf16, #tpu.memory_space<vmem>>, vector<1x4x128xbf16>
    %121 = vector.shape_cast %120 : vector<1x4x128xbf16> to vector<4x128xbf16>
    %cst_138 = arith.constant dense<0.000000e+00> : vector<80x128xf32>
    %122 = tpu.matmul %119, %121, %cst_138 {dimension_numbers = #tpu.dot_dimension_numbers<[1], [0], [0], [1], [0, 0, 1, 1], [], []>} : vector<80x4xbf16>, vector<4x128xbf16>, vector<80x128xf32> -> vector<80x128xf32>
    %c0_139 = arith.constant 0 : index
    %c0_140 = arith.constant 0 : index
    %123 = vector.load %arg8[%c0_139, %c0_140] : memref<80x128xf32, #tpu.memory_space<vmem>>, vector<80x128xf32>
    %124 = arith.addf %123, %122 : vector<80x128xf32>
    %c0_141 = arith.constant 0 : index
    %c0_142 = arith.constant 0 : index
    %125 = vector.load %arg8[%c0_141, %c0_142] : memref<80x128xf32, #tpu.memory_space<vmem>>, vector<80x128xf32>
    tpu.vector_store %arg8[%c0_141, %c0_142], %124 {strides = array<i32>} : memref<80x128xf32, #tpu.memory_space<vmem>>, vector<80x128xf32>,
    %126 = vector.extract_strided_slice %104 {offsets = [10, 0], sizes = [80, 4], strides = [1, 1]} : vector<96x4xbf16> to vector<80x4xbf16>
    %c15 = arith.constant 15 : index
    %c0_143 = arith.constant 0 : index
    %c0_144 = arith.constant 0 : index
    %127 = vector.load %arg5[%c15, %c0_143, %c0_144] : memref<16x4x128xbf16, #tpu.memory_space<vmem>>, vector<1x4x128xbf16>
    %128 = vector.shape_cast %127 : vector<1x4x128xbf16> to vector<4x128xbf16>
    %cst_145 = arith.constant dense<0.000000e+00> : vector<80x128xf32>
    %129 = tpu.matmul %126, %128, %cst_145 {dimension_numbers = #tpu.dot_dimension_numbers<[1], [0], [0], [1], [0, 0, 1, 1], [], []>} : vector<80x4xbf16>, vector<4x128xbf16>, vector<80x128xf32> -> vector<80x128xf32>
    %c0_146 = arith.constant 0 : index
    %c0_147 = arith.constant 0 : index
    %130 = vector.load %arg8[%c0_146, %c0_147] : memref<80x128xf32, #tpu.memory_space<vmem>>, vector<80x128xf32>
    %131 = arith.addf %130, %129 : vector<80x128xf32>
    %c0_148 = arith.constant 0 : index
    %c0_149 = arith.constant 0 : index
    %132 = vector.load %arg8[%c0_148, %c0_149] : memref<80x128xf32, #tpu.memory_space<vmem>>, vector<80x128xf32>
    tpu.vector_store %arg8[%c0_148, %c0_149], %131 {strides = array<i32>} : memref<80x128xf32, #tpu.memory_space<vmem>>, vector<80x128xf32>,
    %c0_150 = arith.constant 0 : index
    %c0_151 = arith.constant 0 : index
    %133 = vector.load %arg8[%c0_150, %c0_151] : memref<80x128xf32, #tpu.memory_space<vmem>>, vector<80x128xf32>
    %c0_152 = arith.constant 0 : index
    %c0_153 = arith.constant 0 : index
    %134 = vector.load %arg2[%c0_152, %c0_153] : memref<80x1xf32, #tpu.memory_space<vmem>>, vector<80x1xf32>
    %135 = vector.broadcast %134 : vector<80x1xf32> to vector<80x128xf32>
    %136 = arith.mulf %133, %135 : vector<80x128xf32>
    %c0_154 = arith.constant 0 : index
    %c0_155 = arith.constant 0 : index
    %c0_156 = arith.constant 0 : index
    %137 = vector.load %arg6[%c0_154, %c0_155, %c0_156] : memref<1x1x128xf32, #tpu.memory_space<vmem>>, vector<1x1x128xf32>
    %138 = vector.shape_cast %137 : vector<1x1x128xf32> to vector<1x128xf32>
    %cst_157 = arith.constant dense<0.000000e+00> : vector<128xf32>
    %139 = vector.multi_reduction <add>, %136, %cst_157 [0] : vector<80x128xf32> to vector<128xf32>
    %140 = vector.shape_cast %139 : vector<128xf32> to vector<1x128xf32>
    %141 = arith.addf %138, %140 : vector<1x128xf32>
    %c0_158 = arith.constant 0 : index
    %c0_159 = arith.constant 0 : index
    %c0_160 = arith.constant 0 : index
    %142 = vector.load %arg6[%c0_158, %c0_159, %c0_160] : memref<1x1x128xf32, #tpu.memory_space<vmem>>, vector<1x1x128xf32>
    %143 = vector.shape_cast %142 : vector<1x1x128xf32> to vector<1x128xf32>
    %144 = vector.shape_cast %141 : vector<1x128xf32> to vector<1x1x128xf32>
    tpu.vector_store %arg6[%c0_158, %c0_159, %c0_160], %144 {strides = array<i32>} : memref<1x1x128xf32, #tpu.memory_space<vmem>>, vector<1x1x128xf32>,
    %c0_161 = arith.constant 0 : index
    %c0_162 = arith.constant 0 : index
    %c0_163 = arith.constant 0 : index
    %145 = vector.load %arg7[%c0_161, %c0_162, %c0_163] : memref<1x1x128xf32, #tpu.memory_space<vmem>>, vector<1x1x128xf32>
    %146 = vector.shape_cast %145 : vector<1x1x128xf32> to vector<1x128xf32>
    %147 = arith.mulf %136, %136 : vector<80x128xf32>
    %cst_164 = arith.constant dense<0.000000e+00> : vector<128xf32>
    %148 = vector.multi_reduction <add>, %147, %cst_164 [0] : vector<80x128xf32> to vector<128xf32>
    %149 = vector.shape_cast %148 : vector<128xf32> to vector<1x128xf32>
    %150 = arith.addf %146, %149 : vector<1x128xf32>
    %c0_165 = arith.constant 0 : index
    %c0_166 = arith.constant 0 : index
    %c0_167 = arith.constant 0 : index
    %151 = vector.load %arg7[%c0_165, %c0_166, %c0_167] : memref<1x1x128xf32, #tpu.memory_space<vmem>>, vector<1x1x128xf32>
    %152 = vector.shape_cast %151 : vector<1x1x128xf32> to vector<1x128xf32>
    %153 = vector.shape_cast %150 : vector<1x128xf32> to vector<1x1x128xf32>
    tpu.vector_store %arg7[%c0_165, %c0_166, %c0_167], %153 {strides = array<i32>} : memref<1x1x128xf32, #tpu.memory_space<vmem>>, vector<1x1x128xf32>,
    return
  }
  func.func @transform_0(%arg0: i32, %arg1: i32) -> (i32, i32) {
    %c0_i32 = arith.constant 0 : i32
    %c0_i32_0 = arith.constant 0 : i32
    return %arg1, %c0_i32 : i32, i32
  }
  func.func @transform_1(%arg0: i32, %arg1: i32) -> (i32, i32, i32, i32, i32) {
    %c0_i32 = arith.constant 0 : i32
    %c0_i32_0 = arith.constant 0 : i32
    %c0_i32_1 = arith.constant 0 : i32
    %c0_i32_2 = arith.constant 0 : i32
    return %arg0, %c0_i32, %c0_i32_0, %arg1, %c0_i32_1 : i32, i32, i32, i32, i32
  }
  func.func @transform_2(%arg0: i32, %arg1: i32) -> (i32, i32, i32, i32, i32) {
    %c1_i32 = arith.constant 1 : i32
    %0 = arith.addi %arg1, %c1_i32 : i32
    %c5_i32 = arith.constant 5 : i32
    %1 = arith.muli %0, %c5_i32 : i32
    %c0_i32 = arith.constant 0 : i32
    %c0_i32_0 = arith.constant 0 : i32
    %c0_i32_1 = arith.constant 0 : i32
    %c0_i32_2 = arith.constant 0 : i32
    return %arg0, %c0_i32, %c0_i32_0, %1, %c0_i32_1 : i32, i32, i32, i32, i32
  }
  func.func @transform_3(%arg0: i32, %arg1: i32) -> (i32, i32, i32) {
    %c0_i32 = arith.constant 0 : i32
    %c0_i32_0 = arith.constant 0 : i32
    %c0_i32_1 = arith.constant 0 : i32
    %c0_i32_2 = arith.constant 0 : i32
    return %c0_i32, %c0_i32_0, %c0_i32_1 : i32, i32, i32
  }
  func.func @transform_4(%arg0: i32, %arg1: i32) -> (i32, i32, i32) {
    %c0_i32 = arith.constant 0 : i32
    %c0_i32_0 = arith.constant 0 : i32
    %c0_i32_1 = arith.constant 0 : i32
    return %arg0, %c0_i32, %c0_i32_0 : i32, i32, i32
  }
  func.func @transform_5(%arg0: i32, %arg1: i32) -> (i32, i32, i32) {
    %c0_i32 = arith.constant 0 : i32
    %c0_i32_0 = arith.constant 0 : i32
    %c0_i32_1 = arith.constant 0 : i32
    return %arg0, %c0_i32, %c0_i32_0 : i32, i32, i32
  }
}

module attributes {stable_mosaic.version = 11 : i64} {
  func.func @_bn_lrelu_kernel(%arg0: i32, %arg1: i32, %arg2: memref<1x2x2x80x4xbf16, #tpu.memory_space<vmem>>, %arg3: memref<1x2x2x16x4xbf16, #tpu.memory_space<vmem>>, %arg4: memref<16x4x128xbf16, #tpu.memory_space<vmem>>, %arg5: memref<1x128xf32, #tpu.memory_space<vmem>>, %arg6: memref<1x128xf32, #tpu.memory_space<vmem>>, %arg7: memref<1x80x128xbf16, #tpu.memory_space<vmem>>, %arg8: memref<80x128xf32, #tpu.memory_space<vmem>>) attributes {dimension_semantics = [#tpu.dimension_semantics<parallel>, #tpu.dimension_semantics<parallel>], iteration_bounds = array<i64: 2, 1>, scalar_prefetch = 0 : i64, scratch_operands = 1 : i64, tpu.core_type = #tpu.core_type<tc>, window_params = [{transform_indices = @transform_0, window_bounds = array<i64: 1, 2, 2, 80, 4>}, {transform_indices = @transform_1, window_bounds = array<i64: 1, 2, 2, 16, 4>}, {pipeline_mode = #tpu.pipeline_mode<synchronous>, transform_indices = @transform_2, window_bounds = array<i64: 16, 4, 128>}, {pipeline_mode = #tpu.pipeline_mode<synchronous>, transform_indices = @transform_3, window_bounds = array<i64: 1, 128>}, {pipeline_mode = #tpu.pipeline_mode<synchronous>, transform_indices = @transform_4, window_bounds = array<i64: 1, 128>}, {transform_indices = @transform_5, window_bounds = array<i64: 1, 80, 128>}]} {
    %c0 = arith.constant 0 : index
    %c0_0 = arith.constant 0 : index
    %c0_1 = arith.constant 0 : index
    %c0_2 = arith.constant 0 : index
    %c0_3 = arith.constant 0 : index
    %0 = vector.load %arg2[%c0, %c0_0, %c0_1, %c0_2, %c0_3] : memref<1x2x2x80x4xbf16, #tpu.memory_space<vmem>>, vector<1x1x1x80x4xbf16>
    %1 = vector.shape_cast %0 : vector<1x1x1x80x4xbf16> to vector<80x4xbf16>
    %c0_4 = arith.constant 0 : index
    %c0_5 = arith.constant 0 : index
    %c0_6 = arith.constant 0 : index
    %c0_7 = arith.constant 0 : index
    %c0_8 = arith.constant 0 : index
    %2 = vector.load %arg3[%c0_4, %c0_5, %c0_6, %c0_7, %c0_8] : memref<1x2x2x16x4xbf16, #tpu.memory_space<vmem>>, vector<1x1x1x16x4xbf16>
    %3 = vector.shape_cast %2 : vector<1x1x1x16x4xbf16> to vector<16x4xbf16>
    %4 = tpu.concatenate %1, %3 in 0 : vector<80x4xbf16>, vector<16x4xbf16> -> vector<96x4xbf16>
    %5 = vector.extract_strided_slice %4 {offsets = [0, 0], sizes = [80, 4], strides = [1, 1]} : vector<96x4xbf16> to vector<80x4xbf16>
    %c0_9 = arith.constant 0 : index
    %c0_10 = arith.constant 0 : index
    %c0_11 = arith.constant 0 : index
    %6 = vector.load %arg4[%c0_9, %c0_10, %c0_11] : memref<16x4x128xbf16, #tpu.memory_space<vmem>>, vector<1x4x128xbf16>
    %7 = vector.shape_cast %6 : vector<1x4x128xbf16> to vector<4x128xbf16>
    %cst = arith.constant dense<0.000000e+00> : vector<80x128xf32>
    %8 = tpu.matmul %5, %7, %cst {dimension_numbers = #tpu.dot_dimension_numbers<[1], [0], [0], [1], [0, 0, 1, 1], [], []>} : vector<80x4xbf16>, vector<4x128xbf16>, vector<80x128xf32> -> vector<80x128xf32>
    %c0_12 = arith.constant 0 : index
    %c0_13 = arith.constant 0 : index
    %9 = vector.load %arg8[%c0_12, %c0_13] : memref<80x128xf32, #tpu.memory_space<vmem>>, vector<80x128xf32>
    tpu.vector_store %arg8[%c0_12, %c0_13], %8 {strides = array<i32>} : memref<80x128xf32, #tpu.memory_space<vmem>>, vector<80x128xf32>,
    %10 = vector.extract_strided_slice %4 {offsets = [1, 0], sizes = [80, 4], strides = [1, 1]} : vector<96x4xbf16> to vector<80x4xbf16>
    %c2 = arith.constant 2 : index
    %c0_14 = arith.constant 0 : index
    %c0_15 = arith.constant 0 : index
    %11 = vector.load %arg4[%c2, %c0_14, %c0_15] : memref<16x4x128xbf16, #tpu.memory_space<vmem>>, vector<1x4x128xbf16>
    %12 = vector.shape_cast %11 : vector<1x4x128xbf16> to vector<4x128xbf16>
    %cst_16 = arith.constant dense<0.000000e+00> : vector<80x128xf32>
    %13 = tpu.matmul %10, %12, %cst_16 {dimension_numbers = #tpu.dot_dimension_numbers<[1], [0], [0], [1], [0, 0, 1, 1], [], []>} : vector<80x4xbf16>, vector<4x128xbf16>, vector<80x128xf32> -> vector<80x128xf32>
    %c0_17 = arith.constant 0 : index
    %c0_18 = arith.constant 0 : index
    %14 = vector.load %arg8[%c0_17, %c0_18] : memref<80x128xf32, #tpu.memory_space<vmem>>, vector<80x128xf32>
    %15 = arith.addf %14, %13 : vector<80x128xf32>
    %c0_19 = arith.constant 0 : index
    %c0_20 = arith.constant 0 : index
    %16 = vector.load %arg8[%c0_19, %c0_20] : memref<80x128xf32, #tpu.memory_space<vmem>>, vector<80x128xf32>
    tpu.vector_store %arg8[%c0_19, %c0_20], %15 {strides = array<i32>} : memref<80x128xf32, #tpu.memory_space<vmem>>, vector<80x128xf32>,
    %17 = vector.extract_strided_slice %4 {offsets = [9, 0], sizes = [80, 4], strides = [1, 1]} : vector<96x4xbf16> to vector<80x4xbf16>
    %c8 = arith.constant 8 : index
    %c0_21 = arith.constant 0 : index
    %c0_22 = arith.constant 0 : index
    %18 = vector.load %arg4[%c8, %c0_21, %c0_22] : memref<16x4x128xbf16, #tpu.memory_space<vmem>>, vector<1x4x128xbf16>
    %19 = vector.shape_cast %18 : vector<1x4x128xbf16> to vector<4x128xbf16>
    %cst_23 = arith.constant dense<0.000000e+00> : vector<80x128xf32>
    %20 = tpu.matmul %17, %19, %cst_23 {dimension_numbers = #tpu.dot_dimension_numbers<[1], [0], [0], [1], [0, 0, 1, 1], [], []>} : vector<80x4xbf16>, vector<4x128xbf16>, vector<80x128xf32> -> vector<80x128xf32>
    %c0_24 = arith.constant 0 : index
    %c0_25 = arith.constant 0 : index
    %21 = vector.load %arg8[%c0_24, %c0_25] : memref<80x128xf32, #tpu.memory_space<vmem>>, vector<80x128xf32>
    %22 = arith.addf %21, %20 : vector<80x128xf32>
    %c0_26 = arith.constant 0 : index
    %c0_27 = arith.constant 0 : index
    %23 = vector.load %arg8[%c0_26, %c0_27] : memref<80x128xf32, #tpu.memory_space<vmem>>, vector<80x128xf32>
    tpu.vector_store %arg8[%c0_26, %c0_27], %22 {strides = array<i32>} : memref<80x128xf32, #tpu.memory_space<vmem>>, vector<80x128xf32>,
    %24 = vector.extract_strided_slice %4 {offsets = [10, 0], sizes = [80, 4], strides = [1, 1]} : vector<96x4xbf16> to vector<80x4xbf16>
    %c10 = arith.constant 10 : index
    %c0_28 = arith.constant 0 : index
    %c0_29 = arith.constant 0 : index
    %25 = vector.load %arg4[%c10, %c0_28, %c0_29] : memref<16x4x128xbf16, #tpu.memory_space<vmem>>, vector<1x4x128xbf16>
    %26 = vector.shape_cast %25 : vector<1x4x128xbf16> to vector<4x128xbf16>
    %cst_30 = arith.constant dense<0.000000e+00> : vector<80x128xf32>
    %27 = tpu.matmul %24, %26, %cst_30 {dimension_numbers = #tpu.dot_dimension_numbers<[1], [0], [0], [1], [0, 0, 1, 1], [], []>} : vector<80x4xbf16>, vector<4x128xbf16>, vector<80x128xf32> -> vector<80x128xf32>
    %c0_31 = arith.constant 0 : index
    %c0_32 = arith.constant 0 : index
    %28 = vector.load %arg8[%c0_31, %c0_32] : memref<80x128xf32, #tpu.memory_space<vmem>>, vector<80x128xf32>
    %29 = arith.addf %28, %27 : vector<80x128xf32>
    %c0_33 = arith.constant 0 : index
    %c0_34 = arith.constant 0 : index
    %30 = vector.load %arg8[%c0_33, %c0_34] : memref<80x128xf32, #tpu.memory_space<vmem>>, vector<80x128xf32>
    tpu.vector_store %arg8[%c0_33, %c0_34], %29 {strides = array<i32>} : memref<80x128xf32, #tpu.memory_space<vmem>>, vector<80x128xf32>,
    %c0_35 = arith.constant 0 : index
    %c0_36 = arith.constant 0 : index
    %c1 = arith.constant 1 : index
    %c0_37 = arith.constant 0 : index
    %c0_38 = arith.constant 0 : index
    %31 = vector.load %arg2[%c0_35, %c0_36, %c1, %c0_37, %c0_38] : memref<1x2x2x80x4xbf16, #tpu.memory_space<vmem>>, vector<1x1x1x80x4xbf16>
    %32 = vector.shape_cast %31 : vector<1x1x1x80x4xbf16> to vector<80x4xbf16>
    %c0_39 = arith.constant 0 : index
    %c0_40 = arith.constant 0 : index
    %c1_41 = arith.constant 1 : index
    %c0_42 = arith.constant 0 : index
    %c0_43 = arith.constant 0 : index
    %33 = vector.load %arg3[%c0_39, %c0_40, %c1_41, %c0_42, %c0_43] : memref<1x2x2x16x4xbf16, #tpu.memory_space<vmem>>, vector<1x1x1x16x4xbf16>
    %34 = vector.shape_cast %33 : vector<1x1x1x16x4xbf16> to vector<16x4xbf16>
    %35 = tpu.concatenate %32, %34 in 0 : vector<80x4xbf16>, vector<16x4xbf16> -> vector<96x4xbf16>
    %36 = vector.extract_strided_slice %35 {offsets = [0, 0], sizes = [80, 4], strides = [1, 1]} : vector<96x4xbf16> to vector<80x4xbf16>
    %c1_44 = arith.constant 1 : index
    %c0_45 = arith.constant 0 : index
    %c0_46 = arith.constant 0 : index
    %37 = vector.load %arg4[%c1_44, %c0_45, %c0_46] : memref<16x4x128xbf16, #tpu.memory_space<vmem>>, vector<1x4x128xbf16>
    %38 = vector.shape_cast %37 : vector<1x4x128xbf16> to vector<4x128xbf16>
    %cst_47 = arith.constant dense<0.000000e+00> : vector<80x128xf32>
    %39 = tpu.matmul %36, %38, %cst_47 {dimension_numbers = #tpu.dot_dimension_numbers<[1], [0], [0], [1], [0, 0, 1, 1], [], []>} : vector<80x4xbf16>, vector<4x128xbf16>, vector<80x128xf32> -> vector<80x128xf32>
    %c0_48 = arith.constant 0 : index
    %c0_49 = arith.constant 0 : index
    %40 = vector.load %arg8[%c0_48, %c0_49] : memref<80x128xf32, #tpu.memory_space<vmem>>, vector<80x128xf32>
    %41 = arith.addf %40, %39 : vector<80x128xf32>
    %c0_50 = arith.constant 0 : index
    %c0_51 = arith.constant 0 : index
    %42 = vector.load %arg8[%c0_50, %c0_51] : memref<80x128xf32, #tpu.memory_space<vmem>>, vector<80x128xf32>
    tpu.vector_store %arg8[%c0_50, %c0_51], %41 {strides = array<i32>} : memref<80x128xf32, #tpu.memory_space<vmem>>, vector<80x128xf32>,
    %43 = vector.extract_strided_slice %35 {offsets = [1, 0], sizes = [80, 4], strides = [1, 1]} : vector<96x4xbf16> to vector<80x4xbf16>
    %c3 = arith.constant 3 : index
    %c0_52 = arith.constant 0 : index
    %c0_53 = arith.constant 0 : index
    %44 = vector.load %arg4[%c3, %c0_52, %c0_53] : memref<16x4x128xbf16, #tpu.memory_space<vmem>>, vector<1x4x128xbf16>
    %45 = vector.shape_cast %44 : vector<1x4x128xbf16> to vector<4x128xbf16>
    %cst_54 = arith.constant dense<0.000000e+00> : vector<80x128xf32>
    %46 = tpu.matmul %43, %45, %cst_54 {dimension_numbers = #tpu.dot_dimension_numbers<[1], [0], [0], [1], [0, 0, 1, 1], [], []>} : vector<80x4xbf16>, vector<4x128xbf16>, vector<80x128xf32> -> vector<80x128xf32>
    %c0_55 = arith.constant 0 : index
    %c0_56 = arith.constant 0 : index
    %47 = vector.load %arg8[%c0_55, %c0_56] : memref<80x128xf32, #tpu.memory_space<vmem>>, vector<80x128xf32>
    %48 = arith.addf %47, %46 : vector<80x128xf32>
    %c0_57 = arith.constant 0 : index
    %c0_58 = arith.constant 0 : index
    %49 = vector.load %arg8[%c0_57, %c0_58] : memref<80x128xf32, #tpu.memory_space<vmem>>, vector<80x128xf32>
    tpu.vector_store %arg8[%c0_57, %c0_58], %48 {strides = array<i32>} : memref<80x128xf32, #tpu.memory_space<vmem>>, vector<80x128xf32>,
    %50 = vector.extract_strided_slice %35 {offsets = [9, 0], sizes = [80, 4], strides = [1, 1]} : vector<96x4xbf16> to vector<80x4xbf16>
    %c9 = arith.constant 9 : index
    %c0_59 = arith.constant 0 : index
    %c0_60 = arith.constant 0 : index
    %51 = vector.load %arg4[%c9, %c0_59, %c0_60] : memref<16x4x128xbf16, #tpu.memory_space<vmem>>, vector<1x4x128xbf16>
    %52 = vector.shape_cast %51 : vector<1x4x128xbf16> to vector<4x128xbf16>
    %cst_61 = arith.constant dense<0.000000e+00> : vector<80x128xf32>
    %53 = tpu.matmul %50, %52, %cst_61 {dimension_numbers = #tpu.dot_dimension_numbers<[1], [0], [0], [1], [0, 0, 1, 1], [], []>} : vector<80x4xbf16>, vector<4x128xbf16>, vector<80x128xf32> -> vector<80x128xf32>
    %c0_62 = arith.constant 0 : index
    %c0_63 = arith.constant 0 : index
    %54 = vector.load %arg8[%c0_62, %c0_63] : memref<80x128xf32, #tpu.memory_space<vmem>>, vector<80x128xf32>
    %55 = arith.addf %54, %53 : vector<80x128xf32>
    %c0_64 = arith.constant 0 : index
    %c0_65 = arith.constant 0 : index
    %56 = vector.load %arg8[%c0_64, %c0_65] : memref<80x128xf32, #tpu.memory_space<vmem>>, vector<80x128xf32>
    tpu.vector_store %arg8[%c0_64, %c0_65], %55 {strides = array<i32>} : memref<80x128xf32, #tpu.memory_space<vmem>>, vector<80x128xf32>,
    %57 = vector.extract_strided_slice %35 {offsets = [10, 0], sizes = [80, 4], strides = [1, 1]} : vector<96x4xbf16> to vector<80x4xbf16>
    %c11 = arith.constant 11 : index
    %c0_66 = arith.constant 0 : index
    %c0_67 = arith.constant 0 : index
    %58 = vector.load %arg4[%c11, %c0_66, %c0_67] : memref<16x4x128xbf16, #tpu.memory_space<vmem>>, vector<1x4x128xbf16>
    %59 = vector.shape_cast %58 : vector<1x4x128xbf16> to vector<4x128xbf16>
    %cst_68 = arith.constant dense<0.000000e+00> : vector<80x128xf32>
    %60 = tpu.matmul %57, %59, %cst_68 {dimension_numbers = #tpu.dot_dimension_numbers<[1], [0], [0], [1], [0, 0, 1, 1], [], []>} : vector<80x4xbf16>, vector<4x128xbf16>, vector<80x128xf32> -> vector<80x128xf32>
    %c0_69 = arith.constant 0 : index
    %c0_70 = arith.constant 0 : index
    %61 = vector.load %arg8[%c0_69, %c0_70] : memref<80x128xf32, #tpu.memory_space<vmem>>, vector<80x128xf32>
    %62 = arith.addf %61, %60 : vector<80x128xf32>
    %c0_71 = arith.constant 0 : index
    %c0_72 = arith.constant 0 : index
    %63 = vector.load %arg8[%c0_71, %c0_72] : memref<80x128xf32, #tpu.memory_space<vmem>>, vector<80x128xf32>
    tpu.vector_store %arg8[%c0_71, %c0_72], %62 {strides = array<i32>} : memref<80x128xf32, #tpu.memory_space<vmem>>, vector<80x128xf32>,
    %c0_73 = arith.constant 0 : index
    %c1_74 = arith.constant 1 : index
    %c0_75 = arith.constant 0 : index
    %c0_76 = arith.constant 0 : index
    %c0_77 = arith.constant 0 : index
    %64 = vector.load %arg2[%c0_73, %c1_74, %c0_75, %c0_76, %c0_77] : memref<1x2x2x80x4xbf16, #tpu.memory_space<vmem>>, vector<1x1x1x80x4xbf16>
    %65 = vector.shape_cast %64 : vector<1x1x1x80x4xbf16> to vector<80x4xbf16>
    %c0_78 = arith.constant 0 : index
    %c1_79 = arith.constant 1 : index
    %c0_80 = arith.constant 0 : index
    %c0_81 = arith.constant 0 : index
    %c0_82 = arith.constant 0 : index
    %66 = vector.load %arg3[%c0_78, %c1_79, %c0_80, %c0_81, %c0_82] : memref<1x2x2x16x4xbf16, #tpu.memory_space<vmem>>, vector<1x1x1x16x4xbf16>
    %67 = vector.shape_cast %66 : vector<1x1x1x16x4xbf16> to vector<16x4xbf16>
    %68 = tpu.concatenate %65, %67 in 0 : vector<80x4xbf16>, vector<16x4xbf16> -> vector<96x4xbf16>
    %69 = vector.extract_strided_slice %68 {offsets = [0, 0], sizes = [80, 4], strides = [1, 1]} : vector<96x4xbf16> to vector<80x4xbf16>
    %c4 = arith.constant 4 : index
    %c0_83 = arith.constant 0 : index
    %c0_84 = arith.constant 0 : index
    %70 = vector.load %arg4[%c4, %c0_83, %c0_84] : memref<16x4x128xbf16, #tpu.memory_space<vmem>>, vector<1x4x128xbf16>
    %71 = vector.shape_cast %70 : vector<1x4x128xbf16> to vector<4x128xbf16>
    %cst_85 = arith.constant dense<0.000000e+00> : vector<80x128xf32>
    %72 = tpu.matmul %69, %71, %cst_85 {dimension_numbers = #tpu.dot_dimension_numbers<[1], [0], [0], [1], [0, 0, 1, 1], [], []>} : vector<80x4xbf16>, vector<4x128xbf16>, vector<80x128xf32> -> vector<80x128xf32>
    %c0_86 = arith.constant 0 : index
    %c0_87 = arith.constant 0 : index
    %73 = vector.load %arg8[%c0_86, %c0_87] : memref<80x128xf32, #tpu.memory_space<vmem>>, vector<80x128xf32>
    %74 = arith.addf %73, %72 : vector<80x128xf32>
    %c0_88 = arith.constant 0 : index
    %c0_89 = arith.constant 0 : index
    %75 = vector.load %arg8[%c0_88, %c0_89] : memref<80x128xf32, #tpu.memory_space<vmem>>, vector<80x128xf32>
    tpu.vector_store %arg8[%c0_88, %c0_89], %74 {strides = array<i32>} : memref<80x128xf32, #tpu.memory_space<vmem>>, vector<80x128xf32>,
    %76 = vector.extract_strided_slice %68 {offsets = [1, 0], sizes = [80, 4], strides = [1, 1]} : vector<96x4xbf16> to vector<80x4xbf16>
    %c6 = arith.constant 6 : index
    %c0_90 = arith.constant 0 : index
    %c0_91 = arith.constant 0 : index
    %77 = vector.load %arg4[%c6, %c0_90, %c0_91] : memref<16x4x128xbf16, #tpu.memory_space<vmem>>, vector<1x4x128xbf16>
    %78 = vector.shape_cast %77 : vector<1x4x128xbf16> to vector<4x128xbf16>
    %cst_92 = arith.constant dense<0.000000e+00> : vector<80x128xf32>
    %79 = tpu.matmul %76, %78, %cst_92 {dimension_numbers = #tpu.dot_dimension_numbers<[1], [0], [0], [1], [0, 0, 1, 1], [], []>} : vector<80x4xbf16>, vector<4x128xbf16>, vector<80x128xf32> -> vector<80x128xf32>
    %c0_93 = arith.constant 0 : index
    %c0_94 = arith.constant 0 : index
    %80 = vector.load %arg8[%c0_93, %c0_94] : memref<80x128xf32, #tpu.memory_space<vmem>>, vector<80x128xf32>
    %81 = arith.addf %80, %79 : vector<80x128xf32>
    %c0_95 = arith.constant 0 : index
    %c0_96 = arith.constant 0 : index
    %82 = vector.load %arg8[%c0_95, %c0_96] : memref<80x128xf32, #tpu.memory_space<vmem>>, vector<80x128xf32>
    tpu.vector_store %arg8[%c0_95, %c0_96], %81 {strides = array<i32>} : memref<80x128xf32, #tpu.memory_space<vmem>>, vector<80x128xf32>,
    %83 = vector.extract_strided_slice %68 {offsets = [9, 0], sizes = [80, 4], strides = [1, 1]} : vector<96x4xbf16> to vector<80x4xbf16>
    %c12 = arith.constant 12 : index
    %c0_97 = arith.constant 0 : index
    %c0_98 = arith.constant 0 : index
    %84 = vector.load %arg4[%c12, %c0_97, %c0_98] : memref<16x4x128xbf16, #tpu.memory_space<vmem>>, vector<1x4x128xbf16>
    %85 = vector.shape_cast %84 : vector<1x4x128xbf16> to vector<4x128xbf16>
    %cst_99 = arith.constant dense<0.000000e+00> : vector<80x128xf32>
    %86 = tpu.matmul %83, %85, %cst_99 {dimension_numbers = #tpu.dot_dimension_numbers<[1], [0], [0], [1], [0, 0, 1, 1], [], []>} : vector<80x4xbf16>, vector<4x128xbf16>, vector<80x128xf32> -> vector<80x128xf32>
    %c0_100 = arith.constant 0 : index
    %c0_101 = arith.constant 0 : index
    %87 = vector.load %arg8[%c0_100, %c0_101] : memref<80x128xf32, #tpu.memory_space<vmem>>, vector<80x128xf32>
    %88 = arith.addf %87, %86 : vector<80x128xf32>
    %c0_102 = arith.constant 0 : index
    %c0_103 = arith.constant 0 : index
    %89 = vector.load %arg8[%c0_102, %c0_103] : memref<80x128xf32, #tpu.memory_space<vmem>>, vector<80x128xf32>
    tpu.vector_store %arg8[%c0_102, %c0_103], %88 {strides = array<i32>} : memref<80x128xf32, #tpu.memory_space<vmem>>, vector<80x128xf32>,
    %90 = vector.extract_strided_slice %68 {offsets = [10, 0], sizes = [80, 4], strides = [1, 1]} : vector<96x4xbf16> to vector<80x4xbf16>
    %c14 = arith.constant 14 : index
    %c0_104 = arith.constant 0 : index
    %c0_105 = arith.constant 0 : index
    %91 = vector.load %arg4[%c14, %c0_104, %c0_105] : memref<16x4x128xbf16, #tpu.memory_space<vmem>>, vector<1x4x128xbf16>
    %92 = vector.shape_cast %91 : vector<1x4x128xbf16> to vector<4x128xbf16>
    %cst_106 = arith.constant dense<0.000000e+00> : vector<80x128xf32>
    %93 = tpu.matmul %90, %92, %cst_106 {dimension_numbers = #tpu.dot_dimension_numbers<[1], [0], [0], [1], [0, 0, 1, 1], [], []>} : vector<80x4xbf16>, vector<4x128xbf16>, vector<80x128xf32> -> vector<80x128xf32>
    %c0_107 = arith.constant 0 : index
    %c0_108 = arith.constant 0 : index
    %94 = vector.load %arg8[%c0_107, %c0_108] : memref<80x128xf32, #tpu.memory_space<vmem>>, vector<80x128xf32>
    %95 = arith.addf %94, %93 : vector<80x128xf32>
    %c0_109 = arith.constant 0 : index
    %c0_110 = arith.constant 0 : index
    %96 = vector.load %arg8[%c0_109, %c0_110] : memref<80x128xf32, #tpu.memory_space<vmem>>, vector<80x128xf32>
    tpu.vector_store %arg8[%c0_109, %c0_110], %95 {strides = array<i32>} : memref<80x128xf32, #tpu.memory_space<vmem>>, vector<80x128xf32>,
    %c0_111 = arith.constant 0 : index
    %c1_112 = arith.constant 1 : index
    %c1_113 = arith.constant 1 : index
    %c0_114 = arith.constant 0 : index
    %c0_115 = arith.constant 0 : index
    %97 = vector.load %arg2[%c0_111, %c1_112, %c1_113, %c0_114, %c0_115] : memref<1x2x2x80x4xbf16, #tpu.memory_space<vmem>>, vector<1x1x1x80x4xbf16>
    %98 = vector.shape_cast %97 : vector<1x1x1x80x4xbf16> to vector<80x4xbf16>
    %c0_116 = arith.constant 0 : index
    %c1_117 = arith.constant 1 : index
    %c1_118 = arith.constant 1 : index
    %c0_119 = arith.constant 0 : index
    %c0_120 = arith.constant 0 : index
    %99 = vector.load %arg3[%c0_116, %c1_117, %c1_118, %c0_119, %c0_120] : memref<1x2x2x16x4xbf16, #tpu.memory_space<vmem>>, vector<1x1x1x16x4xbf16>
    %100 = vector.shape_cast %99 : vector<1x1x1x16x4xbf16> to vector<16x4xbf16>
    %101 = tpu.concatenate %98, %100 in 0 : vector<80x4xbf16>, vector<16x4xbf16> -> vector<96x4xbf16>
    %102 = vector.extract_strided_slice %101 {offsets = [0, 0], sizes = [80, 4], strides = [1, 1]} : vector<96x4xbf16> to vector<80x4xbf16>
    %c5 = arith.constant 5 : index
    %c0_121 = arith.constant 0 : index
    %c0_122 = arith.constant 0 : index
    %103 = vector.load %arg4[%c5, %c0_121, %c0_122] : memref<16x4x128xbf16, #tpu.memory_space<vmem>>, vector<1x4x128xbf16>
    %104 = vector.shape_cast %103 : vector<1x4x128xbf16> to vector<4x128xbf16>
    %cst_123 = arith.constant dense<0.000000e+00> : vector<80x128xf32>
    %105 = tpu.matmul %102, %104, %cst_123 {dimension_numbers = #tpu.dot_dimension_numbers<[1], [0], [0], [1], [0, 0, 1, 1], [], []>} : vector<80x4xbf16>, vector<4x128xbf16>, vector<80x128xf32> -> vector<80x128xf32>
    %c0_124 = arith.constant 0 : index
    %c0_125 = arith.constant 0 : index
    %106 = vector.load %arg8[%c0_124, %c0_125] : memref<80x128xf32, #tpu.memory_space<vmem>>, vector<80x128xf32>
    %107 = arith.addf %106, %105 : vector<80x128xf32>
    %c0_126 = arith.constant 0 : index
    %c0_127 = arith.constant 0 : index
    %108 = vector.load %arg8[%c0_126, %c0_127] : memref<80x128xf32, #tpu.memory_space<vmem>>, vector<80x128xf32>
    tpu.vector_store %arg8[%c0_126, %c0_127], %107 {strides = array<i32>} : memref<80x128xf32, #tpu.memory_space<vmem>>, vector<80x128xf32>,
    %109 = vector.extract_strided_slice %101 {offsets = [1, 0], sizes = [80, 4], strides = [1, 1]} : vector<96x4xbf16> to vector<80x4xbf16>
    %c7 = arith.constant 7 : index
    %c0_128 = arith.constant 0 : index
    %c0_129 = arith.constant 0 : index
    %110 = vector.load %arg4[%c7, %c0_128, %c0_129] : memref<16x4x128xbf16, #tpu.memory_space<vmem>>, vector<1x4x128xbf16>
    %111 = vector.shape_cast %110 : vector<1x4x128xbf16> to vector<4x128xbf16>
    %cst_130 = arith.constant dense<0.000000e+00> : vector<80x128xf32>
    %112 = tpu.matmul %109, %111, %cst_130 {dimension_numbers = #tpu.dot_dimension_numbers<[1], [0], [0], [1], [0, 0, 1, 1], [], []>} : vector<80x4xbf16>, vector<4x128xbf16>, vector<80x128xf32> -> vector<80x128xf32>
    %c0_131 = arith.constant 0 : index
    %c0_132 = arith.constant 0 : index
    %113 = vector.load %arg8[%c0_131, %c0_132] : memref<80x128xf32, #tpu.memory_space<vmem>>, vector<80x128xf32>
    %114 = arith.addf %113, %112 : vector<80x128xf32>
    %c0_133 = arith.constant 0 : index
    %c0_134 = arith.constant 0 : index
    %115 = vector.load %arg8[%c0_133, %c0_134] : memref<80x128xf32, #tpu.memory_space<vmem>>, vector<80x128xf32>
    tpu.vector_store %arg8[%c0_133, %c0_134], %114 {strides = array<i32>} : memref<80x128xf32, #tpu.memory_space<vmem>>, vector<80x128xf32>,
    %116 = vector.extract_strided_slice %101 {offsets = [9, 0], sizes = [80, 4], strides = [1, 1]} : vector<96x4xbf16> to vector<80x4xbf16>
    %c13 = arith.constant 13 : index
    %c0_135 = arith.constant 0 : index
    %c0_136 = arith.constant 0 : index
    %117 = vector.load %arg4[%c13, %c0_135, %c0_136] : memref<16x4x128xbf16, #tpu.memory_space<vmem>>, vector<1x4x128xbf16>
    %118 = vector.shape_cast %117 : vector<1x4x128xbf16> to vector<4x128xbf16>
    %cst_137 = arith.constant dense<0.000000e+00> : vector<80x128xf32>
    %119 = tpu.matmul %116, %118, %cst_137 {dimension_numbers = #tpu.dot_dimension_numbers<[1], [0], [0], [1], [0, 0, 1, 1], [], []>} : vector<80x4xbf16>, vector<4x128xbf16>, vector<80x128xf32> -> vector<80x128xf32>
    %c0_138 = arith.constant 0 : index
    %c0_139 = arith.constant 0 : index
    %120 = vector.load %arg8[%c0_138, %c0_139] : memref<80x128xf32, #tpu.memory_space<vmem>>, vector<80x128xf32>
    %121 = arith.addf %120, %119 : vector<80x128xf32>
    %c0_140 = arith.constant 0 : index
    %c0_141 = arith.constant 0 : index
    %122 = vector.load %arg8[%c0_140, %c0_141] : memref<80x128xf32, #tpu.memory_space<vmem>>, vector<80x128xf32>
    tpu.vector_store %arg8[%c0_140, %c0_141], %121 {strides = array<i32>} : memref<80x128xf32, #tpu.memory_space<vmem>>, vector<80x128xf32>,
    %123 = vector.extract_strided_slice %101 {offsets = [10, 0], sizes = [80, 4], strides = [1, 1]} : vector<96x4xbf16> to vector<80x4xbf16>
    %c15 = arith.constant 15 : index
    %c0_142 = arith.constant 0 : index
    %c0_143 = arith.constant 0 : index
    %124 = vector.load %arg4[%c15, %c0_142, %c0_143] : memref<16x4x128xbf16, #tpu.memory_space<vmem>>, vector<1x4x128xbf16>
    %125 = vector.shape_cast %124 : vector<1x4x128xbf16> to vector<4x128xbf16>
    %cst_144 = arith.constant dense<0.000000e+00> : vector<80x128xf32>
    %126 = tpu.matmul %123, %125, %cst_144 {dimension_numbers = #tpu.dot_dimension_numbers<[1], [0], [0], [1], [0, 0, 1, 1], [], []>} : vector<80x4xbf16>, vector<4x128xbf16>, vector<80x128xf32> -> vector<80x128xf32>
    %c0_145 = arith.constant 0 : index
    %c0_146 = arith.constant 0 : index
    %127 = vector.load %arg8[%c0_145, %c0_146] : memref<80x128xf32, #tpu.memory_space<vmem>>, vector<80x128xf32>
    %128 = arith.addf %127, %126 : vector<80x128xf32>
    %c0_147 = arith.constant 0 : index
    %c0_148 = arith.constant 0 : index
    %129 = vector.load %arg8[%c0_147, %c0_148] : memref<80x128xf32, #tpu.memory_space<vmem>>, vector<80x128xf32>
    tpu.vector_store %arg8[%c0_147, %c0_148], %128 {strides = array<i32>} : memref<80x128xf32, #tpu.memory_space<vmem>>, vector<80x128xf32>,
    %c0_149 = arith.constant 0 : index
    %c0_150 = arith.constant 0 : index
    %130 = vector.load %arg8[%c0_149, %c0_150] : memref<80x128xf32, #tpu.memory_space<vmem>>, vector<80x128xf32>
    %c0_151 = arith.constant 0 : index
    %c0_152 = arith.constant 0 : index
    %131 = vector.load %arg5[%c0_151, %c0_152] : memref<1x128xf32, #tpu.memory_space<vmem>>, vector<1x128xf32>
    %132 = vector.broadcast %131 : vector<1x128xf32> to vector<80x128xf32>
    %133 = arith.mulf %130, %132 : vector<80x128xf32>
    %c0_153 = arith.constant 0 : index
    %c0_154 = arith.constant 0 : index
    %134 = vector.load %arg6[%c0_153, %c0_154] : memref<1x128xf32, #tpu.memory_space<vmem>>, vector<1x128xf32>
    %135 = vector.broadcast %134 : vector<1x128xf32> to vector<80x128xf32>
    %136 = arith.addf %133, %135 : vector<80x128xf32>
    %cst_155 = arith.constant 0.000000e+00 : f32
    %137 = vector.broadcast %cst_155 : f32 to vector<80x128xf32>
    %138 = arith.cmpf oge, %136, %137 : vector<80x128xf32>
    %cst_156 = arith.constant 1.000000e-01 : f32
    %139 = vector.broadcast %cst_156 : f32 to vector<80x128xf32>
    %140 = arith.mulf %139, %136 : vector<80x128xf32>
    %141 = arith.select %138, %136, %140 : vector<80x128xi1>, vector<80x128xf32>
    %142 = arith.truncf %141 : vector<80x128xf32> to vector<80x128xbf16>
    %c0_157 = arith.constant 0 : index
    %c0_158 = arith.constant 0 : index
    %c0_159 = arith.constant 0 : index
    %143 = vector.load %arg7[%c0_157, %c0_158, %c0_159] : memref<1x80x128xbf16, #tpu.memory_space<vmem>>, vector<1x80x128xbf16>
    %144 = vector.shape_cast %143 : vector<1x80x128xbf16> to vector<80x128xbf16>
    %145 = vector.shape_cast %142 : vector<80x128xbf16> to vector<1x80x128xbf16>
    tpu.vector_store %arg7[%c0_157, %c0_158, %c0_159], %145 {strides = array<i32>} : memref<1x80x128xbf16, #tpu.memory_space<vmem>>, vector<1x80x128xbf16>,
    return
  }
  func.func @transform_0(%arg0: i32, %arg1: i32) -> (i32, i32, i32, i32, i32) {
    %c0_i32 = arith.constant 0 : i32
    %c0_i32_0 = arith.constant 0 : i32
    %c0_i32_1 = arith.constant 0 : i32
    %c0_i32_2 = arith.constant 0 : i32
    return %arg0, %c0_i32, %c0_i32_0, %arg1, %c0_i32_1 : i32, i32, i32, i32, i32
  }
  func.func @transform_1(%arg0: i32, %arg1: i32) -> (i32, i32, i32, i32, i32) {
    %c1_i32 = arith.constant 1 : i32
    %0 = arith.addi %arg1, %c1_i32 : i32
    %c5_i32 = arith.constant 5 : i32
    %1 = arith.muli %0, %c5_i32 : i32
    %c0_i32 = arith.constant 0 : i32
    %c0_i32_0 = arith.constant 0 : i32
    %c0_i32_1 = arith.constant 0 : i32
    %c0_i32_2 = arith.constant 0 : i32
    return %arg0, %c0_i32, %c0_i32_0, %1, %c0_i32_1 : i32, i32, i32, i32, i32
  }
  func.func @transform_2(%arg0: i32, %arg1: i32) -> (i32, i32, i32) {
    %c0_i32 = arith.constant 0 : i32
    %c0_i32_0 = arith.constant 0 : i32
    %c0_i32_1 = arith.constant 0 : i32
    %c0_i32_2 = arith.constant 0 : i32
    return %c0_i32, %c0_i32_0, %c0_i32_1 : i32, i32, i32
  }
  func.func @transform_3(%arg0: i32, %arg1: i32) -> (i32, i32) {
    %c0_i32 = arith.constant 0 : i32
    %c0_i32_0 = arith.constant 0 : i32
    %c0_i32_1 = arith.constant 0 : i32
    return %c0_i32, %c0_i32_0 : i32, i32
  }
  func.func @transform_4(%arg0: i32, %arg1: i32) -> (i32, i32) {
    %c0_i32 = arith.constant 0 : i32
    %c0_i32_0 = arith.constant 0 : i32
    %c0_i32_1 = arith.constant 0 : i32
    return %c0_i32, %c0_i32_0 : i32, i32
  }
  func.func @transform_5(%arg0: i32, %arg1: i32) -> (i32, i32, i32) {
    %c0_i32 = arith.constant 0 : i32
    %c0_i32_0 = arith.constant 0 : i32
    return %arg0, %arg1, %c0_i32 : i32, i32, i32
  }
}

</mosaic_0001>

<bundles_post_ra>
// kernel: down_forward.2
= control target key start
LH: loop header
LB: loop body
LE: loop exit
PB: predicated region body
PF: predicated region fallthrough
CT: control target
= control target key end

     0   :  { %s4271_s18 = smov 0   ;;  %s4273_s19 = smov 0   ;;  %s5242_s0 = inlined_call_operand.vmem [shape: f32[80,1], index: 0, kind: input, shape index: {}]   ;;  %s5243_s1 = inlined_call_operand.vmem [shape: bf16[2,2,2,96,4], index: 1, kind: input, shape index: {}, may-alias: {1,2}]   ;;  %s5244_s2 = inlined_call_operand.vmem [shape: bf16[2,2,2,96,4], index: 2, kind: input, shape index: {}, may-alias: {1,2}]   ;;  %s5245_s3 = inlined_call_operand.vmem [shape: bf16[16,4,128], index: 3, kind: input, shape index: {}]   ;;  %s5246_s4 = inlined_call_operand.vmem [shape: f32[2,1,128], index: 4, kind: output, shape index: {0}]   ;;  %s5247_s5 = inlined_call_operand.vmem [shape: f32[2,1,128], index: 5, kind: output, shape index: {1}]  }
   0x1   :  { %s4275_s20 = smov 0   ;;  %s4277_s21 = smov 0  }
   0x2   :  { %s4279_s22 = smov 0  }
   0x3 LB: > { %s28_s23 = sadd.s32 1, %s4228_s21  ;;  %p70_p1 = scmp.ne.s32.totalorder %s4220_s19, %s4216_s18  ;;  %s4232_s22 = sphi %s4279_s22, %s16_s22   ;;  %s4228_s21 = sphi %s4277_s21, %s5252_s21   ;;  %s4224_s20 = sphi %s4275_s20, %s5251_s20   ;;  %s4220_s19 = sphi %s4273_s19, %s5250_s19   ;;  %s4216_s18 = sphi %s4271_s18, %s5249_s18  }
   0x4   : > { %p30_p0 = scmp.ge.s32.totalorder %s28_s23, 2  ;;  %p71_p2 = scmp.eq.s32.totalorder %s4232_s22, 0 }
   0x5   : > { %s63_s26 = sadd.s32 1, %s4220_s19  ;;  %p3449_p5 = scmp.ge.s32.totalorder %s4232_s22, 2 }
   0x6   : > { %s5254_s23 = smov (%p30_p0, %s28_s23), 0  ;;  %p4302_p3 = por %p71_p2, %p70_p1 }
   0x7   : > { %s58_s25 = ssub.s32 %s4228_s21, %s5254_s23  ;;  %213 = sbr.rel (%p3449_p5) target bundleno = 57 (0x39), region = 24 }
   0x8   : > { %p61_p4 = scmp.eq.s32.totalorder %s58_s25, 0 }
   0xa   : > { %s4310_s27 = scalar_select %p61_p4, %s4220_s19, %s63_s26  }
   0xc   : > { %216 = sbr.rel (!%p4302_p3) target bundleno = 50 (0x32), region = 28  ;;  %s218_s28 = sand.u32 (%p4302_p3), 1, %s4220_s19  }
   0xd   : > { %s4075_s29 = smul.u32 (%p4302_p3), 192, %s4228_s21  ;;  %s4324_s10 = smov (%p4302_p3), 0  }
   0xe   : > { %s4074_s30 = smul.u32 (%p4302_p3), 160, %s218_s28 }
   0xf   : > { %s4320_s8 = scalar_lea.vmem (%p4302_p3), %s5243_s1, %s4075_s29  }
  0x10   : > { %s4322_s9 = scalar_lea.vmem (%p4302_p3), [#allocation3], %s4074_s30  }
  0x11 LB: >> { %v251_v0 = vld [vmem:[%s4320_s8] sm:$0xf]  ;;  %v253_v1 = vld [vmem:[%s4320_s8 + $0x4] sm:$0xf]  ;;  %v255_v2 = vld [vmem:[%s4320_s8 + $0x8] sm:$0xf]  ;;  %s4236_s10 = sphi %s4324_s10, %s245_s10  }
  0x12   : >> { %252 = vst [vmem:[%s4322_s9] sm:$0xf] %v251_v0  ;;  %254 = vst [vmem:[%s4322_s9 + $0x4] sm:$0xf] %v253_v1  ;;  %v257_v3 = vld [vmem:[%s4320_s8 + $0xc] sm:$0xf]  ;;  %s245_s10 = sadd.s32 1, %s4236_s10  }
  0x13   : >> { %256 = vst [vmem:[%s4322_s9 + $0x8] sm:$0xf] %v255_v2  ;;  %v259_v4 = vld [vmem:[%s4320_s8 + $0x10] sm:$0xf]  ;;  %v261_v5 = vld [vmem:[%s4320_s8 + $0x14] sm:$0xf] }
  0x14   : >> { %258 = vst [vmem:[%s4322_s9 + $0xc] sm:$0xf] %v257_v3  ;;  %260 = vst [vmem:[%s4322_s9 + $0x10] sm:$0xf] %v259_v4  ;;  %v263_v6 = vld [vmem:[%s4320_s8 + $0x18] sm:$0xf] }
  0x15   : >> { %262 = vst [vmem:[%s4322_s9 + $0x14] sm:$0xf] %v261_v5  ;;  %v265_v7 = vld [vmem:[%s4320_s8 + $0x1c] sm:$0xf]  ;;  %v267_v8 = vld [vmem:[%s4320_s8 + $0x20] sm:$0xf] }
  0x16   : >> { %264 = vst [vmem:[%s4322_s9 + $0x18] sm:$0xf] %v263_v6  ;;  %266 = vst [vmem:[%s4322_s9 + $0x1c] sm:$0xf] %v265_v7  ;;  %v269_v9 = vld [vmem:[%s4320_s8 + $0x24] sm:$0xf] }
  0x17   : >> { %268 = vst [vmem:[%s4322_s9 + $0x20] sm:$0xf] %v267_v8  ;;  %v271_v10 = vld [vmem:[%s4320_s8 + $0x30] sm:$0xf]  ;;  %v273_v11 = vld [vmem:[%s4320_s8 + $0x34] sm:$0xf] }
  0x18   : >> { %270 = vst [vmem:[%s4322_s9 + $0x24] sm:$0xf] %v269_v9  ;;  %272 = vst [vmem:[%s4322_s9 + $0x28] sm:$0xf] %v271_v10  ;;  %v275_v12 = vld [vmem:[%s4320_s8 + $0x38] sm:$0xf] }
  0x19   : >> { %274 = vst [vmem:[%s4322_s9 + $0x2c] sm:$0xf] %v273_v11  ;;  %v277_v13 = vld [vmem:[%s4320_s8 + $0x3c] sm:$0xf]  ;;  %v279_v14 = vld [vmem:[%s4320_s8 + $0x40] sm:$0xf] }
  0x1a   : >> { %276 = vst [vmem:[%s4322_s9 + $0x30] sm:$0xf] %v275_v12  ;;  %278 = vst [vmem:[%s4322_s9 + $0x34] sm:$0xf] %v277_v13  ;;  %v281_v15 = vld [vmem:[%s4320_s8 + $0x44] sm:$0xf] }
  0x1b   : >> { %280 = vst [vmem:[%s4322_s9 + $0x38] sm:$0xf] %v279_v14  ;;  %v283_v16 = vld [vmem:[%s4320_s8 + $0x48] sm:$0xf]  ;;  %v285_v17 = vld [vmem:[%s4320_s8 + $0x4c] sm:$0xf] }
  0x1c   : >> { %282 = vst [vmem:[%s4322_s9 + $0x3c] sm:$0xf] %v281_v15  ;;  %284 = vst [vmem:[%s4322_s9 + $0x40] sm:$0xf] %v283_v16  ;;  %v287_v18 = vld [vmem:[%s4320_s8 + $0x50] sm:$0xf] }
  0x1d   : >> { %286 = vst [vmem:[%s4322_s9 + $0x44] sm:$0xf] %v285_v17  ;;  %v289_v19 = vld [vmem:[%s4320_s8 + $0x54] sm:$0xf]  ;;  %v291_v20 = vld [vmem:[%s4320_s8 + $0x60] sm:$0xf] }
  0x1e   : >> { %288 = vst [vmem:[%s4322_s9 + $0x48] sm:$0xf] %v287_v18  ;;  %290 = vst [vmem:[%s4322_s9 + $0x4c] sm:$0xf] %v289_v19  ;;  %v293_v21 = vld [vmem:[%s4320_s8 + $0x64] sm:$0xf] }
  0x1f   : >> { %292 = vst [vmem:[%s4322_s9 + $0x50] sm:$0xf] %v291_v20  ;;  %v295_v22 = vld [vmem:[%s4320_s8 + $0x68] sm:$0xf]  ;;  %v297_v23 = vld [vmem:[%s4320_s8 + $0x6c] sm:$0xf] }
  0x20   : >> { %294 = vst [vmem:[%s4322_s9 + $0x54] sm:$0xf] %v293_v21  ;;  %296 = vst [vmem:[%s4322_s9 + $0x58] sm:$0xf] %v295_v22  ;;  %v299_v24 = vld [vmem:[%s4320_s8 + $0x70] sm:$0xf] }
  0x21   : >> { %298 = vst [vmem:[%s4322_s9 + $0x5c] sm:$0xf] %v297_v23  ;;  %v301_v25 = vld [vmem:[%s4320_s8 + $0x74] sm:$0xf]  ;;  %v303_v26 = vld [vmem:[%s4320_s8 + $0x78] sm:$0xf] }
  0x22   : >> { %300 = vst [vmem:[%s4322_s9 + $0x60] sm:$0xf] %v299_v24  ;;  %302 = vst [vmem:[%s4322_s9 + $0x64] sm:$0xf] %v301_v25  ;;  %v305_v27 = vld [vmem:[%s4320_s8 + $0x7c] sm:$0xf] }
  0x23   : >> { %304 = vst [vmem:[%s4322_s9 + $0x68] sm:$0xf] %v303_v26  ;;  %v307_v28 = vld [vmem:[%s4320_s8 + $0x80] sm:$0xf]  ;;  %v309_v29 = vld [vmem:[%s4320_s8 + $0x84] sm:$0xf] }
  0x24   : >> { %306 = vst [vmem:[%s4322_s9 + $0x6c] sm:$0xf] %v305_v27  ;;  %308 = vst [vmem:[%s4322_s9 + $0x70] sm:$0xf] %v307_v28  ;;  %v311_v30 = vld [vmem:[%s4320_s8 + $0x90] sm:$0xf] }
  0x25   : >> { %310 = vst [vmem:[%s4322_s9 + $0x74] sm:$0xf] %v309_v29  ;;  %v313_v31 = vld [vmem:[%s4320_s8 + $0x94] sm:$0xf]  ;;  %v315_v32 = vld [vmem:[%s4320_s8 + $0x98] sm:$0xf] }
  0x26   : >> { %312 = vst [vmem:[%s4322_s9 + $0x78] sm:$0xf] %v311_v30  ;;  %314 = vst [vmem:[%s4322_s9 + $0x7c] sm:$0xf] %v313_v31  ;;  %v317_v33 = vld [vmem:[%s4320_s8 + $0x9c] sm:$0xf] }
  0x27   : >> { %316 = vst [vmem:[%s4322_s9 + $0x80] sm:$0xf] %v315_v32  ;;  %v319_v34 = vld [vmem:[%s4320_s8 + $0xa0] sm:$0xf]  ;;  %v321_v35 = vld [vmem:[%s4320_s8 + $0xa4] sm:$0xf] }
  0x28   : >> { %318 = vst [vmem:[%s4322_s9 + $0x84] sm:$0xf] %v317_v33  ;;  %320 = vst [vmem:[%s4322_s9 + $0x88] sm:$0xf] %v319_v34  ;;  %v323_v36 = vld [vmem:[%s4320_s8 + $0xa8] sm:$0xf] }
  0x29   : >> { %322 = vst [vmem:[%s4322_s9 + $0x8c] sm:$0xf] %v321_v35  ;;  %v325_v37 = vld [vmem:[%s4320_s8 + $0xac] sm:$0xf]  ;;  %v327_v38 = vld [vmem:[%s4320_s8 + $0xb0] sm:$0xf] }
  0x2a   : >> { %324 = vst [vmem:[%s4322_s9 + $0x90] sm:$0xf] %v323_v36  ;;  %326 = vst [vmem:[%s4322_s9 + $0x94] sm:$0xf] %v325_v37  ;;  %v329_v39 = vld [vmem:[%s4320_s8 + $0xb4] sm:$0xf] }
  0x2b   : >> { %328 = vst [vmem:[%s4322_s9 + $0x98] sm:$0xf] %v327_v38  ;;  %330 = vst [vmem:[%s4322_s9 + $0x9c] sm:$0xf] %v329_v39  ;;  %p244_p6 = scmp.ge.s32.totalorder %s245_s10, 1 }
  0x2d   : > { %247 = sbr.rel (!%p244_p6) target bundleno = 17 (0x11), region = 236 }
  0x32 PF: > { %546 = sbr.rel (!%p4302_p3) target bundleno = 57 (0x39), region = 90  ;;  %s548_s11 = sand.u32 (%p4302_p3), 1, %s4220_s19  }
  0x33   : > { %s3458_s12 = smul.u32 (%p4302_p3), 192, %s4228_s21  ;;  %s3457_s13 = sshll.u32 (%p4302_p3), %s548_s11, 5 }
  0x34   : > { %s550_s17 = scalar_lea.vmem (%p4302_p3), [#allocation4], %s3457_s13 }
  0x35   : > { %s3338_s16 = scalar_lea.vmem (%p4302_p3), %s5244_s2, %s3458_s12 }
  0x36   : > { %v3459_v40 = vld [vmem:[%s3338_s16 + $0x28] sm:$0xff] (%p4302_p3)   ;;  %v3461_v41 = vld [vmem:[%s3338_s16 + $0x58] sm:$0xff] (%p4302_p3)  }
  0x37   : > { %v3463_v42 = vld [vmem:[%s3338_s16 + $0x88] sm:$0xff]   ;;  %575 = vst [vmem:[%s550_s17] sm:$0xff] %v3459_v40   ;;  %579 = vst [vmem:[%s550_s17 + $0x8] sm:$0xff] %v3461_v41   ;;  %v3465_v43 = vld [vmem:[%s3338_s16 + $0xb8] sm:$0xff]  }
  0x38   : > { %583 = vst [vmem:[%s550_s17 + $0x10] sm:$0xff] %v3463_v42   ;;  %587 = vst [vmem:[%s550_s17 + $0x18] sm:$0xff] %v3465_v43  }
  0x39 PF: > { %p3467_p7 = scmp.ge.s32.totalorder %s4232_s22, 1  ;;  %p628_p8 = scmp.lt.s32.totalorder %s4232_s22, 3 }
  0x3b   : > { %p629_p9 = pnand %p3467_p7, %p628_p8 }
  0x3c   : > { %s635_s26 = sand.u32 (!%p629_p9), 1, %s4216_s18   ;;  %p693_p10 = scmp.lt.s32.totalorder (!%p629_p9), %s4224_s20, 1 }
  0x3d   : > { %632 = sbr.rel (%p629_p9) target bundleno = 608 (0x260), region = 131  ;;  %s3468_s6 = sshll.u32 (!%p629_p9), %s635_s26, 5 }
  0x3e   : > { %s4076_s28 = smul.u32 (!%p629_p9), 160, %s635_s26  ;;  %s4438_s8 = scalar_lea.vmem (!%p629_p9), [#allocation4], %s3468_s6 }
  0x40   : > { %s4440_s9 = scalar_lea.vmem (!%p629_p9), [#allocation3], %s4076_s28 }
  0x42   : > { %v748_v44 = vld [vmem:[%s5245_s3] sm:$0x3]  ;;  %vm765_vm0 = vcmask 1041408   ;;  %v4238_v45 = vmov 0.0   ;;  %vm4239_vm1 = vmmov 0   ;;  %vm749_vm2 = vcmask 31744  }
  0x43   : > { %3722 = vmatprep.subr.bf16.mxu0 %v4238_v45  ;;  %v767_v46 = vsel %vm765_vm0, %v748_v44, 0  ;;  %3724 = vmatprep.mubr.msk.bf16.mxu0 %vm4239_vm1, %v4238_v45  ;;  %v3480_v47 = vld [vmem:[%s5245_s3 + $0x4] sm:$0x3]  ;;  %v3486_v49 = vld [vmem:[%s5245_s3 + $0x10] sm:$0x3]  ;;  %v4450_v52 = vld [vmem:[%s4440_s9 + $0x8] sm:$0xff]  }
  0x44   : > { %3723 = vmatpush3.bf16.msra.mxu0 %v767_v46  ;;  %3744 = vmatprep.subr.bf16.mxu1 %v4238_v45  ;;  %v910_v48 = vsel %vm765_vm0, %v3480_v47, 0  ;;  %v4443_v50 = vld [vmem:[%s4440_s9] sm:$0xff]   ;;  %v1059_v51 = vsel %vm765_vm0, %v3486_v49, 0  ;;  %v861_v55 = vshll.u32 %v4450_v52, 16  ;;  %v4460_v56 = vld [vmem:[%s4440_s9 + $0x10] sm:$0xff]   ;;  %v865_v61 = vshrl.u32 %v4450_v52, 16 }
  0x45   : > { %3745 = vmatpush3.bf16.msra.mxu1 %v910_v48  ;;  %3766 = vmatprep.subr.bf16.mxu0 %v4238_v45  ;;  %v855_v53 = vshrl.u32 %v4443_v50, 16  ;;  %v857_v54 = vshll.u32 %v4443_v50, 16  ;;  %v3492_v58 = vld [vmem:[%s5245_s3 + $0x14] sm:$0x3]  ;;  %vm854_vm3 = vsmask.f32 7424 }
  0x46   : > { %3746 = vmatprep.mubr.msk.bf16.mxu1 %vm4239_vm1, %v4238_v45  ;;  %3788 = vmatprep.subr.bf16.mxu1 %v4238_v45  ;;  %v863_v59 = vrot.slane %v861_v55, 1  ;;  %v868_v62 = vshll.u32 %v4460_v56, 16  ;;  %v1194_v63 = vsel %vm765_vm0, %v3492_v58, 0  ;;  %v4474_v3 = vld [vmem:[%s4440_s9 + $0x18] sm:$0xff]   ;;  %v872_v5 = vshrl.u32 %v4460_v56, 16  ;;  %v4490_v9 = vld [vmem:[%s4440_s9 + $0x20] sm:$0xff]  }
  0x47   : > { %3725 = vmatmul.mubr.msk.bf16.vlgmr.msra.gmra.mxu0 %vm749_vm2, %v4443_v50  ;;  %v859_v57 = vrot.slane %v857_v54, 1  ;;  %v875_v6 = vshll.u32 %v4474_v3, 16  ;;  %v879_v11 = vshrl.u32 %v4474_v3, 16  ;;  %v882_v12 = vshll.u32 %v4490_v9, 16  ;;  %v4503_v15 = vld [vmem:[%s4438_s8] sm:$0xff]   ;;  %s5256_s20 = smov (!%p693_p10, %s4224_s20), 1 }
  0x48   : > { %3767 = vmatpush3.bf16.msra.mxu0 %v1059_v51  ;;  %3728 = vmatprep.mubr.msk.bf16.mxu0 %vm4239_vm1, %v4238_v45  ;;  %v867_v1 = vor.u32 %v865_v61, %v863_v59  ;;  %v870_v2 = vrot.slane %v868_v62, 1  ;;  %v1018_v16 = vrot.slane %v855_v53, 4  ;;  %v1019_v17 = vrot.slane %v857_v54, 5  ;;  %v3516_v27 = vld [vmem:[%s5245_s3 + $0x2] sm:$0x3]  ;;  %s5146_s29 = scalar_lea.vmem %s5246_s4, %s5256_s20  ;;  %s5151_s18 = scalar_lea.vmem %s5247_s5, %s5256_s20 }
  0x49   : > { %3810 = vmatprep.subr.bf16.mxu0 %v4238_v45  ;;  %v860_v60 = vor.u32 %v859_v57, %v855_v53  ;;  %v877_v8 = vrot.slane %v875_v6, 1  ;;  %v884_v14 = vrot.slane %v882_v12, 1  ;;  %v886_v19 = vshrl.u32 %v4490_v9, 16  ;;  %v3522_v36 = vld [vmem:[%s5245_s3 + $0x6] sm:$0x3]  ;;  %704 = vst [vmem:[%s5146_s29] sm:$0x1] %v4238_v45 }
  0x4a   : > { %v871_v4 = vsel %vm854_vm3, %v867_v1, %v870_v2  ;;  %v874_v7 = vor.u32 %v872_v5, %v870_v2  ;;  %v890_v20 = vshll.u32 %v4503_v15, 16  ;;  %v1022_v21 = vrot.slane %v861_v55, 5  ;;  %705 = vst [vmem:[%s5151_s18] sm:$0x1] %v4238_v45 }
  0x4b   : > { %v864_v0 = vsel %vm854_vm3, %v860_v60, %v863_v59  ;;  %v881_v13 = vor.u32 %v879_v11, %v877_v8  ;;  %v1021_v22 = vrot.slane %v865_v61, 4  ;;  %v888_v23 = vor.u32 %v886_v19, %v884_v14  ;;  %v4567_v59 = vld [vmem:[%s4440_s9 + $0x28] sm:$0xff]  }
  0x4c   : > { %3747 = vmatmul.mubr.msk.bf16.vlgmr.msra.gmra.mxu1 %vm749_vm2, %v864_v0  ;;  %v878_v10 = vsel %vm854_vm3, %v874_v7, %v877_v8  ;;  %v892_v24 = vrot.slane %v890_v20, 1  ;;  %v1020_v25 = vor.u32 %v1019_v17, %v1018_v16  ;;  %vm1017_vm4 = vsmask.f32 3328  ;;  %v3528_v0 = vld [vmem:[%s5245_s3 + $0x12] sm:$0x3]  ;;  %v4594_v8 = vld [vmem:[%s4440_s9 + $0x38] sm:$0xff]  }
  0x4d   : > { %3789 = vmatpush3.bf16.msra.mxu1 %v1194_v63  ;;  %3750 = vmatprep.mubr.msk.bf16.mxu1 %vm4239_vm1, %v4238_v45  ;;  %v885_v18 = vsel %vm854_vm3, %v881_v13, %v884_v14  ;;  %v1023_v26 = vor.u32 %v1022_v21, %v1021_v22  ;;  %v1025_v30 = vrot.slane %v872_v5, 4  ;;  %v1026_v31 = vrot.slane %v868_v62, 5  ;;  %v4576_v62 = vld [vmem:[%s4440_s9 + $0x30] sm:$0xff]   ;;  %v4610_v16 = vld [vmem:[%s4440_s9 + $0x40] sm:$0xff]   ;;  %v4626_v22 = vld [vmem:[%s4440_s9 + $0x48] sm:$0xff]  }
  0x4e   : > { %3832 = vmatprep.subr.bf16.mxu1 %v4238_v45  ;;  %v893_v28 = vsel %vm854_vm3, %v888_v23, %v892_v24  ;;  %v1361_v32 = vsel %vm765_vm0, %v3516_v27, 0  ;;  %v1167_v33 = vrot.slane %v4443_v50, 5  ;;  %v1168_v34 = vrot.slane %v4450_v52, 5 }
  0x4f   : > { %3729 = vmatmul.mubr.msk.bf16.gmra.mxu0 %vm749_vm2, %v4450_v52  ;;  %v1024_v29 = vsel %vm1017_vm4, %v1020_v25, %v1023_v26  ;;  %vm1166_vm5 = vcmask 1042432   ;;  %v1027_v35 = vor.u32 %v1026_v31, %v1025_v30  ;;  %v1523_v38 = vsel %vm765_vm0, %v3522_v36, 0 }
  0x50   : > { %3732 = vmatprep.mubr.msk.bf16.mxu0 %vm4239_vm1, %v4238_v45  ;;  %v1169_v37 = vsel %vm1166_vm5, %v1167_v33, %v1168_v34  ;;  %v1029_v40 = vrot.slane %v879_v11, 4  ;;  %v1030_v41 = vrot.slane %v875_v6, 5  ;;  %v1170_v42 = vrot.slane %v4460_v56, 5 }
  0x51   : > { %v1028_v39 = vsel %vm1017_vm4, %v1023_v26, %v1027_v35  ;;  %v1033_v47 = vrot.slane %v886_v19, 4  ;;  %v1034_v48 = vrot.slane %v882_v12, 5  ;;  %v1172_v49 = vrot.slane %v4474_v3, 5 }
  0x52   : > { %v1031_v43 = vor.u32 %v1030_v41, %v1029_v40  ;;  %v1171_v44 = vsel %vm1166_vm5, %v1168_v34, %v1170_v42  ;;  %v1037_v51 = vshrl.u32 %v4503_v15, 16  ;;  %v1040_v55 = vrot.slane %v890_v20, 5  ;;  %v3558_v40 = vld [vmem:[%s5245_s3 + $0x8] sm:$0x3] }
  0x53   : > { %v1035_v50 = vor.u32 %v1034_v48, %v1033_v47  ;;  %v1173_v52 = vsel %vm1166_vm5, %v1170_v42, %v1172_v49  ;;  %v1176_v61 = vrot.slane %v4503_v15, 5  ;;  %v1470_v63 = vshll.u32 %v4567_v59, 16 }
  0x54   : > { %3751 = vmatmul.mubr.msk.bf16.gmra.mxu1 %vm749_vm2, %v871_v4  ;;  %v1032_v46 = vsel %vm1017_vm4, %v1027_v35, %v1031_v43  ;;  %v1039_v54 = vrot.slane %v1037_v51, 4  ;;  %v1468_v2 = vshrl.u32 %v4567_v59, 16  ;;  %v1474_v4 = vshll.u32 %v4576_v62, 16 }
  0x55   : > { %3754 = vmatprep.mubr.msk.bf16.mxu1 %vm4239_vm1, %v4238_v45  ;;  %v1036_v53 = vsel %vm1017_vm4, %v1031_v43, %v1035_v50  ;;  %v1671_v5 = vsel %vm765_vm0, %v3528_v0, 0  ;;  %v1478_v11 = vshrl.u32 %v4576_v62, 16  ;;  %v1481_v12 = vshll.u32 %v4594_v8, 16 }
  0x56   : > { %v1041_v57 = vor.u32 %v1040_v55, %v1039_v54  ;;  %v1476_v7 = vrot.slane %v1474_v4, 1  ;;  %v1488_v19 = vshll.u32 %v4610_v16, 16  ;;  %v1492_v24 = vshrl.u32 %v4610_v16, 16 }
  0x57   : > { %3733 = vmatmul.mubr.msk.bf16.gmra.mxu0 %vm749_vm2, %v4460_v56  ;;  %v1174_v56 = vrot.slane %v4490_v9, 5  ;;  %v1483_v15 = vrot.slane %v1481_v12, 1  ;;  %v1495_v25 = vshll.u32 %v4626_v22, 16  ;;  %v1499_v30 = vshrl.u32 %v4626_v22, 16 }
  0x58   : > { %3736 = vmatprep.mubr.msk.bf16.mxu0 %vm4239_vm1, %v4238_v45  ;;  %v1042_v60 = vsel %vm1017_vm4, %v1035_v50, %v1041_v57  ;;  %v1480_v14 = vor.u32 %v1478_v11, %v1476_v7  ;;  %v1490_v21 = vrot.slane %v1488_v19, 1  ;;  %v1630_v33 = vrot.slane %v1468_v2, 4  ;;  %v3564_v50 = vld [vmem:[%s5245_s3 + $0xc] sm:$0x3] }
  0x59   : > { %v1175_v58 = vsel %vm1166_vm5, %v1172_v49, %v1174_v56  ;;  %v1177_v1 = vsel %vm1166_vm5, %v1174_v56, %v1176_v61  ;;  %v1497_v27 = vrot.slane %v1495_v25, 1  ;;  %v1631_v34 = vrot.slane %v1470_v63, 5 }
  0x5a   : > { %v1484_v17 = vsel %vm854_vm3, %v1480_v14, %v1483_v15  ;;  %v1494_v26 = vor.u32 %v1492_v24, %v1490_v21  ;;  %v1634_v35 = vrot.slane %v1474_v4, 5  ;;  %v1778_v47 = vrot.slane %v4567_v59, 5 }
  0x5b   : > { %v1501_v36 = vor.u32 %v1499_v30, %v1497_v27  ;;  %v1779_v48 = vrot.slane %v4576_v62, 5  ;;  %v1641_v54 = vrot.slane %v1492_v24, 4  ;;  %v1642_v55 = vrot.slane %v1488_v19, 5 }
  0x5c   : > { %3755 = vmatmul.mubr.msk.bf16.gmra.mxu1 %vm749_vm2, %v878_v10  ;;  %v1781_v56 = vrot.slane %v4594_v8, 5  ;;  %v1646_v61 = vrot.slane %v1495_v25, 5 }
  0x5d   : > { %3758 = vmatprep.mubr.msk.bf16.mxu1 %vm4239_vm1, %v4238_v45  ;;  %v1780_v51 = vsel %vm1166_vm5, %v1778_v47, %v1779_v48  ;;  %v1643_v57 = vor.u32 %v1642_v55, %v1641_v54 }
  0x5f   : > { %3737 = vmatmul.mubr.msk.bf16.gmra.mxu0 %vm749_vm2, %v4474_v3  ;;  %v1472_v3 = vrot.slane %v1470_v63, 1 }
  0x60   : > { %3740 = vmatprep.mubr.msk.bf16.mxu0 %vm4239_vm1, %v4238_v45 }
  0x61   : > { %v1473_v6 = vor.u32 %v1472_v3, %v1468_v2 }
  0x63   : > { %v1477_v10 = vsel %vm854_vm3, %v1473_v6, %v1476_v7 }
  0x64   : > { %3759 = vmatmul.mubr.msk.bf16.gmra.mxu1 %vm749_vm2, %v885_v18  ;;  %v1485_v18 = vshrl.u32 %v4594_v8, 16 }
  0x65   : > { %3762 = vmatprep.mubr.msk.bf16.mxu1 %vm4239_vm1, %v4238_v45 }
  0x66   : > { %v1487_v20 = vor.u32 %v1485_v18, %v1483_v15  ;;  %v1637_v43 = vrot.slane %v1485_v18, 4 }
  0x67   : > { %3741 = vmatmul.mubr.msk.bf16.gmra.mxu0 %vm749_vm2, %v4490_v9  ;;  %v3534_v9 = vld [vmem:[%s5245_s3 + $0x16] sm:$0x3] }
  0x68   : > { %3768 = vmatprep.mubr.msk.bf16.mxu0 %vm4239_vm1, %v4238_v45  ;;  %v1805_v13 = vsel %vm765_vm0, %v3534_v9, 0  ;;  %v1491_v23 = vsel %vm854_vm3, %v1487_v20, %v1490_v21  ;;  %v4730_v21 = vld [vmem:[%s4440_s9 + $0x60] sm:$0xff]  }
  0x69   : > { %v2092_v25 = vshll.u32 %v4730_v21, 16 }
  0x6c   : > { %3763 = vmatmul.mubr.msk.bf16.gmra.mxu1 %vm749_vm2, %v893_v28  ;;  %v4639_v28 = vld [vmem:[%s4438_s8 + $0x8] sm:$0xff]  }
  0x6d   : > { %3790 = vmatprep.mubr.msk.bf16.mxu1 %vm4239_vm1, %v4238_v45  ;;  %v1503_v31 = vshll.u32 %v4639_v28, 16  ;;  %v1649_v0 = vshrl.u32 %v4639_v28, 16 }
  0x6f   : > { %3769 = vmatmul.mubr.msk.bf16.vlgmr.msra.gmra.mxu0 %vm749_vm2, %v1024_v29  ;;  %v1498_v29 = vsel %vm854_vm3, %v1494_v26, %v1497_v27  ;;  %v1651_v3 = vrot.slane %v1649_v0, 4  ;;  %v1652_v4 = vrot.slane %v1503_v31, 5 }
  0x70   : > { %3811 = vmatpush3.bf16.msra.mxu0 %v1361_v32  ;;  %3772 = vmatprep.mubr.msk.bf16.mxu0 %vm4239_vm1, %v4238_v45  ;;  %v1633_v32 = vrot.slane %v1478_v11, 4  ;;  %v4712_v11 = vld [vmem:[%s4440_s9 + $0x58] sm:$0xff]  }
  0x71   : > { %3854 = vmatprep.subr.bf16.mxu0 %v4238_v45  ;;  %v1653_v6 = vor.u32 %v1652_v4, %v1651_v3  ;;  %v2089_v24 = vshrl.u32 %v4712_v11, 16  ;;  %v2390_v4 = vrot.slane %v4712_v11, 5 }
  0x74   : > { %3791 = vmatmul.mubr.msk.bf16.vlgmr.msra.gmra.mxu1 %vm749_vm2, %v1169_v37  ;;  %v1505_v37 = vrot.slane %v1503_v31, 1  ;;  %v2096_v31 = vshrl.u32 %v4730_v21, 16 }
  0x75   : > { %3833 = vmatpush3.bf16.msra.mxu1 %v1523_v38  ;;  %3794 = vmatprep.mubr.msk.bf16.mxu1 %vm4239_vm1, %v4238_v45  ;;  %v1632_v38 = vor.u32 %v1631_v34, %v1630_v33 }
  0x76   : > { %3876 = vmatprep.subr.bf16.mxu1 %v4238_v45  ;;  %v1506_v41 = vsel %vm854_vm3, %v1501_v36, %v1505_v37 }
  0x77   : > { %3773 = vmatmul.mubr.msk.bf16.gmra.mxu0 %vm749_vm2, %v1028_v39  ;;  %v1635_v39 = vor.u32 %v1634_v35, %v1633_v32  ;;  %v4764_v35 = vld [vmem:[%s4440_s9 + $0x70] sm:$0xff]  }
  0x78   : > { %3776 = vmatprep.mubr.msk.bf16.mxu0 %vm4239_vm1, %v4238_v45 }
  0x79   : > { %v1636_v42 = vsel %vm1017_vm4, %v1632_v38, %v1635_v39  ;;  %v2106_v38 = vshll.u32 %v4764_v35, 16 }
  0x7c   : > { %3795 = vmatmul.mubr.msk.bf16.gmra.mxu1 %vm749_vm2, %v1171_v44  ;;  %v1638_v44 = vrot.slane %v1481_v12, 5 }
  0x7d   : > { %3798 = vmatprep.mubr.msk.bf16.mxu1 %vm4239_vm1, %v4238_v45 }
  0x7e   : > { %v1639_v49 = vor.u32 %v1638_v44, %v1637_v43  ;;  %v2110_v43 = vshrl.u32 %v4764_v35, 16 }
  0x7f   : > { %3777 = vmatmul.mubr.msk.bf16.gmra.mxu0 %vm749_vm2, %v1032_v46  ;;  %v1972_v46 = vsel %vm765_vm0, %v3558_v40, 0  ;;  %v2108_v40 = vrot.slane %v2106_v38, 1 }
  0x80   : > { %3780 = vmatprep.mubr.msk.bf16.mxu0 %vm4239_vm1, %v4238_v45 }
  0x84   : > { %3799 = vmatmul.mubr.msk.bf16.gmra.mxu1 %vm749_vm2, %v1173_v52  ;;  %v2134_v52 = vsel %vm765_vm0, %v3564_v50, 0 }
  0x85   : > { %3802 = vmatprep.mubr.msk.bf16.mxu1 %vm4239_vm1, %v4238_v45 }
  0x87   : > { %3781 = vmatmul.mubr.msk.bf16.gmra.mxu0 %vm749_vm2, %v1036_v53  ;;  %v1640_v53 = vsel %vm1017_vm4, %v1635_v39, %v1639_v49 }
  0x88   : > { %3784 = vmatprep.mubr.msk.bf16.mxu0 %vm4239_vm1, %v4238_v45 }
  0x8c   : > { %3803 = vmatmul.mubr.msk.bf16.gmra.mxu1 %vm749_vm2, %v1175_v58  ;;  %v1782_v58 = vsel %vm1166_vm5, %v1779_v48, %v1781_v56 }
  0x8d   : > { %3806 = vmatprep.mubr.msk.bf16.mxu1 %vm4239_vm1, %v4238_v45 }
  0x8f   : > { %3785 = vmatmul.mubr.msk.bf16.gmra.mxu0 %vm749_vm2, %v1042_v60  ;;  %v1645_v60 = vrot.slane %v1499_v30, 4 }
  0x90   : > { %3812 = vmatprep.mubr.msk.bf16.mxu0 %vm4239_vm1, %v4238_v45 }
  0x91   : > { %v1647_v63 = vor.u32 %v1646_v61, %v1645_v60  ;;  %v2248_v60 = vrot.slane %v2096_v31, 4  ;;  %v2249_v61 = vrot.slane %v2092_v25, 5 }
  0x93   : > { %v1648_v2 = vsel %vm1017_vm4, %v1643_v57, %v1647_v63  ;;  %v1654_v9 = vsel %vm1017_vm4, %v1647_v63, %v1653_v6  ;;  %v2250_v6 = vor.u32 %v2249_v61, %v2248_v60 }
  0x94   : > { %3807 = vmatmul.mubr.msk.bf16.gmra.mxu1 %vm749_vm2, %v1177_v1 }
  0x95   : > { %3834 = vmatprep.mubr.msk.bf16.mxu1 %vm4239_vm1, %v4238_v45 }
  0x97   : > { %3813 = vmatmul.mubr.msk.bf16.vlgmr.msra.gmra.mxu0 %vm749_vm2, %v4567_v59  ;;  %v1644_v59 = vsel %vm1017_vm4, %v1639_v49, %v1643_v57 }
  0x98   : > { %3855 = vmatpush3.bf16.msra.mxu0 %v1671_v5  ;;  %3816 = vmatprep.mubr.msk.bf16.mxu0 %vm4239_vm1, %v4238_v45  ;;  %v1785_v5 = vrot.slane %v4626_v22, 5 }
  0x99   : > { %3898 = vmatprep.subr.bf16.mxu0 %v4238_v45 }
  0x9c   : > { %3835 = vmatmul.mubr.msk.bf16.vlgmr.msra.gmra.mxu1 %vm749_vm2, %v1477_v10  ;;  %v1787_v10 = vrot.slane %v4639_v28, 5  ;;  %v2094_v28 = vrot.slane %v2092_v25, 1 }
  0x9d   : > { %3877 = vmatpush3.bf16.msra.mxu1 %v1805_v13  ;;  %3838 = vmatprep.mubr.msk.bf16.mxu1 %vm4239_vm1, %v4238_v45  ;;  %v3570_v13 = vld [vmem:[%s5245_s3 + $0x18] sm:$0x3] }
  0x9e   : > { %3920 = vmatprep.subr.bf16.mxu1 %v4238_v45  ;;  %v1788_v14 = vsel %vm1166_vm5, %v1785_v5, %v1787_v10  ;;  %v2282_v18 = vsel %vm765_vm0, %v3570_v13, 0  ;;  %v2098_v33 = vor.u32 %v2096_v31, %v2094_v28 }
  0x9f   : > { %3817 = vmatmul.mubr.msk.bf16.gmra.mxu0 %vm749_vm2, %v4576_v62  ;;  %v1783_v62 = vrot.slane %v4610_v16, 5 }
  0xa0   : > { %3820 = vmatprep.mubr.msk.bf16.mxu0 %vm4239_vm1, %v4238_v45 }
  0xa1   : > { %v1784_v1 = vsel %vm1166_vm5, %v1781_v56, %v1783_v62  ;;  %v1786_v7 = vsel %vm1166_vm5, %v1783_v62, %v1785_v5  ;;  %v3600_v56 = vld [vmem:[%s5245_s3 + $0xa] sm:$0x3] }
  0xa2   : > { %v2583_v63 = vsel %vm765_vm0, %v3600_v56, 0 }
  0xa4   : > { %3839 = vmatmul.mubr.msk.bf16.gmra.mxu1 %vm749_vm2, %v1484_v17  ;;  %v2085_v17 = vshll.u32 %v4712_v11, 16 }
  0xa5   : > { %3842 = vmatprep.mubr.msk.bf16.mxu1 %vm4239_vm1, %v4238_v45 }
  0xa6   : > { %v2087_v20 = vrot.slane %v2085_v17, 1  ;;  %v2245_v49 = vrot.slane %v2085_v17, 5 }
  0xa7   : > { %3821 = vmatmul.mubr.msk.bf16.gmra.mxu0 %vm749_vm2, %v4594_v8  ;;  %v4703_v8 = vld [vmem:[%s4440_s9 + $0x50] sm:$0xff]  }
  0xa8   : > { %3824 = vmatprep.mubr.msk.bf16.mxu0 %vm4239_vm1, %v4238_v45  ;;  %v2081_v12 = vshll.u32 %v4703_v8, 16  ;;  %v2079_v15 = vshrl.u32 %v4703_v8, 16  ;;  %v2091_v27 = vor.u32 %v2089_v24, %v2087_v20  ;;  %v2389_v3 = vrot.slane %v4703_v8, 5 }
  0xaa   : > { %v2095_v30 = vsel %vm854_vm3, %v2091_v27, %v2094_v28  ;;  %v2241_v47 = vrot.slane %v2079_v15, 4  ;;  %v2242_v48 = vrot.slane %v2081_v12, 5 }
  0xac   : > { %3843 = vmatmul.mubr.msk.bf16.gmra.mxu1 %vm749_vm2, %v1491_v23 }
  0xad   : > { %3846 = vmatprep.mubr.msk.bf16.mxu1 %vm4239_vm1, %v4238_v45 }
  0xaf   : > { %3825 = vmatmul.mubr.msk.bf16.gmra.mxu0 %vm749_vm2, %v4610_v16  ;;  %v2083_v16 = vrot.slane %v2081_v12, 1 }
  0xb0   : > { %3828 = vmatprep.mubr.msk.bf16.mxu0 %vm4239_vm1, %v4238_v45 }
  0xb1   : > { %v2084_v19 = vor.u32 %v2083_v16, %v2079_v15 }
  0xb3   : > { %v2088_v23 = vsel %vm854_vm3, %v2084_v19, %v2087_v20 }
  0xb4   : > { %3847 = vmatmul.mubr.msk.bf16.gmra.mxu1 %vm749_vm2, %v1498_v29  ;;  %v4746_v29 = vld [vmem:[%s4440_s9 + $0x68] sm:$0xff]  }
  0xb5   : > { %3850 = vmatprep.mubr.msk.bf16.mxu1 %vm4239_vm1, %v4238_v45  ;;  %v2099_v32 = vshll.u32 %v4746_v29, 16  ;;  %v2103_v37 = vshrl.u32 %v4746_v29, 16 }
  0xb7   : > { %3829 = vmatmul.mubr.msk.bf16.gmra.mxu0 %vm749_vm2, %v4626_v22  ;;  %v3576_v22 = vld [vmem:[%s5245_s3 + $0x1c] sm:$0x3]  ;;  %v2101_v34 = vrot.slane %v2099_v32, 1  ;;  %v2252_v16 = vrot.slane %v2103_v37, 4  ;;  %v2253_v17 = vrot.slane %v2099_v32, 5  ;;  %v2256_v32 = vrot.slane %v2110_v43, 4 }
  0xb8   : > { %3856 = vmatprep.mubr.msk.bf16.mxu0 %vm4239_vm1, %v4238_v45  ;;  %v2416_v26 = vsel %vm765_vm0, %v3576_v22, 0 }
  0xb9   : > { %v2102_v36 = vsel %vm854_vm3, %v2098_v33, %v2101_v34  ;;  %v2105_v39 = vor.u32 %v2103_v37, %v2101_v34  ;;  %v2254_v25 = vor.u32 %v2253_v17, %v2252_v16  ;;  %v3143_v17 = vld [vmem:[%s5242_s0 + $0x8] sm:$0xff] }
  0xbb   : > { %v2255_v34 = vsel %vm1017_vm4, %v2250_v6, %v2254_v25 }
  0xbc   : > { %3851 = vmatmul.mubr.msk.bf16.gmra.mxu1 %vm749_vm2, %v1506_v41  ;;  %v4779_v41 = vld [vmem:[%s4438_s8 + $0x10] sm:$0xff]  }
  0xbd   : > { %3878 = vmatprep.mubr.msk.bf16.mxu1 %vm4239_vm1, %v4238_v45  ;;  %v2114_v44 = vshll.u32 %v4779_v41, 16 }
  0xbf   : > { %3857 = vmatmul.mubr.msk.bf16.vlgmr.msra.gmra.mxu0 %vm749_vm2, %v1636_v42  ;;  %v2109_v42 = vsel %vm854_vm3, %v2105_v39, %v2108_v40 }
  0xc0   : > { %3899 = vmatpush3.bf16.msra.mxu0 %v1972_v46  ;;  %3860 = vmatprep.mubr.msk.bf16.mxu0 %vm4239_vm1, %v4238_v45  ;;  %v2244_v46 = vrot.slane %v2089_v24, 4 }
  0xc1   : > { %3942 = vmatprep.subr.bf16.mxu0 %v4238_v45 }
  0xc2   : > { %v2246_v54 = vor.u32 %v2245_v49, %v2244_v46  ;;  %v2260_v46 = vshrl.u32 %v4779_v41, 16 }
  0xc4   : > { %3879 = vmatmul.mubr.msk.bf16.vlgmr.msra.gmra.mxu1 %vm749_vm2, %v1780_v51  ;;  %v2112_v51 = vor.u32 %v2110_v43, %v2108_v40  ;;  %v2251_v15 = vsel %vm1017_vm4, %v2246_v54, %v2250_v6  ;;  %v4240_v6 = vmov 0  }
  0xc5   : > { %3921 = vmatpush3.bf16.msra.mxu1 %v2134_v52  ;;  %3882 = vmatprep.mubr.msk.bf16.mxu1 %vm4239_vm1, %v4238_v45  ;;  %v2116_v52 = vrot.slane %v2114_v44, 1 }
  0xc6   : > { %3964 = vmatprep.subr.bf16.mxu1 %v4238_v45  ;;  %4152 = vset.pattern.permute.xlu0 %v4240_v6 }
  0xc7   : > { %3861 = vmatmul.mubr.msk.bf16.gmra.mxu0 %vm749_vm2, %v1640_v53  ;;  %v2243_v53 = vor.u32 %v2242_v48, %v2241_v47  ;;  %4153 = vset.pattern.permute.xlu1 %v4240_v6 }
  0xc8   : > { %3864 = vmatprep.mubr.msk.bf16.mxu0 %vm4239_vm1, %v4238_v45 }
  0xcc   : > { %3883 = vmatmul.mubr.msk.bf16.gmra.mxu1 %vm749_vm2, %v1782_v58  ;;  %v2117_v58 = vsel %vm854_vm3, %v2112_v51, %v2116_v52  ;;  %v2263_v52 = vrot.slane %v2114_v44, 5 }
  0xcd   : > { %3886 = vmatprep.mubr.msk.bf16.mxu1 %vm4239_vm1, %v4238_v45 }
  0xcf   : > { %3865 = vmatmul.mubr.msk.bf16.gmra.mxu0 %vm749_vm2, %v1644_v59  ;;  %v2247_v59 = vsel %vm1017_vm4, %v2243_v53, %v2246_v54  ;;  %v2262_v54 = vrot.slane %v2260_v46, 4 }
  0xd0   : > { %3868 = vmatprep.mubr.msk.bf16.mxu0 %vm4239_vm1, %v4238_v45 }
  0xd1   : > { %v2264_v60 = vor.u32 %v2263_v52, %v2262_v54 }
  0xd4   : > { %3887 = vmatmul.mubr.msk.bf16.gmra.mxu1 %vm749_vm2, %v1784_v1 }
  0xd5   : > { %3890 = vmatprep.mubr.msk.bf16.mxu1 %vm4239_vm1, %v4238_v45 }
  0xd7   : > { %3869 = vmatmul.mubr.msk.bf16.gmra.mxu0 %vm749_vm2, %v1648_v2 }
  0xd8   : > { %3872 = vmatprep.mubr.msk.bf16.mxu0 %vm4239_vm1, %v4238_v45 }
  0xdc   : > { %3891 = vmatmul.mubr.msk.bf16.gmra.mxu1 %vm749_vm2, %v1786_v7 }
  0xdd   : > { %3894 = vmatprep.mubr.msk.bf16.mxu1 %vm4239_vm1, %v4238_v45 }
  0xdf   : > { %3873 = vmatmul.mubr.msk.bf16.gmra.mxu0 %vm749_vm2, %v1654_v9  ;;  %v3606_v9 = vld [vmem:[%s5245_s3 + $0xe] sm:$0x3] }
  0xe0   : > { %3900 = vmatprep.mubr.msk.bf16.mxu0 %vm4239_vm1, %v4238_v45 }
  0xe4   : > { %3895 = vmatmul.mubr.msk.bf16.gmra.mxu1 %vm749_vm2, %v1788_v14  ;;  %v2745_v14 = vsel %vm765_vm0, %v3606_v9, 0 }
  0xe5   : > { %3922 = vmatprep.mubr.msk.bf16.mxu1 %vm4239_vm1, %v4238_v45 }
  0xe7   : > { %3901 = vmatmul.mubr.msk.bf16.vlgmr.msra.gmra.mxu0 %vm749_vm2, %v4703_v8  ;;  %v2391_v8 = vsel %vm1166_vm5, %v2389_v3, %v2390_v4  ;;  %v4871_v3 = vld [vmem:[%s4440_s9 + $0x78] sm:$0xff]  }
  0xe8   : > { %3943 = vmatpush3.bf16.msra.mxu0 %v2282_v18  ;;  %3904 = vmatprep.mubr.msk.bf16.mxu0 %vm4239_vm1, %v4238_v45 }
  0xe9   : > { %3986 = vmatprep.subr.bf16.mxu0 %v4238_v45 }
  0xec   : > { %3923 = vmatmul.mubr.msk.bf16.vlgmr.msra.gmra.mxu1 %vm749_vm2, %v2088_v23  ;;  %v2392_v23 = vrot.slane %v4730_v21, 5 }
  0xed   : > { %3965 = vmatpush3.bf16.msra.mxu1 %v2416_v26  ;;  %3926 = vmatprep.mubr.msk.bf16.mxu1 %vm4239_vm1, %v4238_v45 }
  0xee   : > { %4008 = vmatprep.subr.bf16.mxu1 %v4238_v45  ;;  %v2393_v31 = vsel %vm1166_vm5, %v2390_v4, %v2392_v23 }
  0xef   : > { %3905 = vmatmul.mubr.msk.bf16.gmra.mxu0 %vm749_vm2, %v4712_v11 }
  0xf0   : > { %3908 = vmatprep.mubr.msk.bf16.mxu0 %vm4239_vm1, %v4238_v45 }
  0xf4   : > { %3927 = vmatmul.mubr.msk.bf16.gmra.mxu1 %vm749_vm2, %v2095_v30 }
  0xf5   : > { %3930 = vmatprep.mubr.msk.bf16.mxu1 %vm4239_vm1, %v4238_v45 }
  0xf7   : > { %3909 = vmatmul.mubr.msk.bf16.gmra.mxu0 %vm749_vm2, %v4730_v21  ;;  %v2257_v21 = vrot.slane %v2106_v38, 5  ;;  %v2394_v38 = vrot.slane %v4746_v29, 5 }
  0xf8   : > { %3912 = vmatprep.mubr.msk.bf16.mxu0 %vm4239_vm1, %v4238_v45 }
  0xf9   : > { %v2258_v43 = vor.u32 %v2257_v21, %v2256_v32  ;;  %v2395_v51 = vsel %vm1166_vm5, %v2392_v23, %v2394_v38  ;;  %v3145_v21 = vld [vmem:[%s5242_s0 + $0x18] sm:$0xff]  ;;  %v3146_v32 = vld [vmem:[%s5242_s0 + $0x20] sm:$0xff] }
  0xfc   : > { %3931 = vmatmul.mubr.msk.bf16.gmra.mxu1 %vm749_vm2, %v2102_v36 }
  0xfd   : > { %3934 = vmatprep.mubr.msk.bf16.mxu1 %vm4239_vm1, %v4238_v45 }
  0xff   : > { %3913 = vmatmul.mubr.msk.bf16.gmra.mxu0 %vm749_vm2, %v4746_v29  ;;  %v2259_v29 = vsel %vm1017_vm4, %v2254_v25, %v2258_v43  ;;  %v2690_v25 = vshrl.u32 %v4871_v3, 16 }
 0x100   : > { %3916 = vmatprep.mubr.msk.bf16.mxu0 %vm4239_vm1, %v4238_v45 }
 0x104   : > { %3935 = vmatmul.mubr.msk.bf16.gmra.mxu1 %vm749_vm2, %v2109_v42 }
 0x105   : > { %3938 = vmatprep.mubr.msk.bf16.mxu1 %vm4239_vm1, %v4238_v45 }
 0x107   : > { %v803_v50 = vpop.f32.mrf.mxu0  ;;  %3917 = vmatmul.mubr.msk.bf16.gmra.mxu0 %vm749_vm2, %v4764_v35 }
 0x108   : > { %3944 = vmatprep.mubr.msk.bf16.mxu0 %vm4239_vm1, %v4238_v45 }
 0x109   : > { %v3726_v55 = vpop.f32.mrf.mxu0 }
 0x10b   : > { %v806_v57 = vpop.f32.mrf.mxu0 }
 0x10c   : > { %v946_v0 = vpop.f32.mrf.mxu1  ;;  %3939 = vmatmul.mubr.msk.bf16.gmra.mxu1 %vm749_vm2, %v2117_v58 }
 0x10d   : > { %v3727_v62 = vpop.f32.mrf.mxu0  ;;  %v4804_v1 = vadd.f32 %v946_v0, %v803_v50  ;;  %3966 = vmatprep.mubr.msk.bf16.mxu1 %vm4239_vm1, %v4238_v45 }
 0x10e   : > { %v3748_v5 = vpop.f32.mrf.mxu1 }
 0x10f   : > { %v811_v2 = vpop.f32.mrf.mxu0  ;;  %3945 = vmatmul.mubr.msk.bf16.vlgmr.msra.gmra.mxu0 %vm749_vm2, %v2247_v59  ;;  %v2396_v59 = vrot.slane %v4764_v35, 5  ;;  %v2265_v5 = vsel %vm1017_vm4, %v2258_v43, %v2264_v60  ;;  %v3142_v35 = vld [vmem:[%s5242_s0] sm:$0xff] }
 0x110   : > { %3987 = vmatpush3.bf16.msra.mxu0 %v2583_v63  ;;  %3948 = vmatprep.mubr.msk.bf16.mxu0 %vm4239_vm1, %v4238_v45  ;;  %v949_v10 = vpop.f32.mrf.mxu1  ;;  %v3150_v60 = vld [vmem:[%s5242_s0 + $0x40] sm:$0xff] }
 0x111   : > { %v3730_v7 = vpop.f32.mrf.mxu0  ;;  %4030 = vmatprep.subr.bf16.mxu0 %v4238_v45  ;;  %v4817_v12 = vadd.f32 %v949_v10, %v806_v57  ;;  %3154 = vperm.xlu0 %4152, %v3142_v35   ;;  %v2398_v10 = vrot.slane %v4779_v41, 5  ;;  %v3144_v41 = vld [vmem:[%s5242_s0 + $0x10] sm:$0xff] }
 0x112   : > { %v3749_v11 = vpop.f32.mrf.mxu1  ;;  %3164 = vperm.xlu1 %4153, %v3144_v41  }
 0x113   : > { %v814_v13 = vpop.f32.mrf.mxu0  ;;  %v4885_v11 = vld [vmem:[%s4440_s9 + $0x80] sm:$0xff]  }
 0x114   : > { %v954_v19 = vpop.f32.mrf.mxu1  ;;  %3967 = vmatmul.mubr.msk.bf16.vlgmr.msra.gmra.mxu1 %vm749_vm2, %v2391_v8  ;;  %v2700_v54 = vshrl.u32 %v4885_v11, 16 }
 0x115   : > { %v3731_v18 = vpop.f32.mrf.mxu0  ;;  %v4825_v20 = vadd.f32 %v954_v19, %v811_v2  ;;  %4009 = vmatpush3.bf16.msra.mxu1 %v2745_v14  ;;  %3970 = vmatprep.mubr.msk.bf16.mxu1 %vm4239_vm1, %v4238_v45  ;;  %v2397_v2 = vsel %vm1166_vm5, %v2394_v38, %v2396_v59  ;;  %v2692_v14 = vshll.u32 %v4871_v3, 16 }
 0x116   : > { %v3752_v24 = vpop.f32.mrf.mxu1  ;;  %4052 = vmatprep.subr.bf16.mxu1 %v4238_v45  ;;  %3159 = vperm.xlu0 %4152, %v3143_v17  }
 0x117   : > { %v819_v22 = vpop.f32.mrf.mxu0  ;;  %3949 = vmatmul.mubr.msk.bf16.gmra.mxu0 %vm749_vm2, %v2251_v15  ;;  %3169 = vperm.xlu1 %4153, %v3145_v21  }
 0x118   : > { %3952 = vmatprep.mubr.msk.bf16.mxu0 %vm4239_vm1, %v4238_v45  ;;  %v957_v27 = vpop.f32.mrf.mxu1 }
 0x119   : > { %v3734_v26 = vpop.f32.mrf.mxu0  ;;  %v4834_v28 = vadd.f32 %v957_v27, %v814_v13  ;;  %v2696_v27 = vshll.u32 %v4885_v11, 16 }
 0x11a   : > { %v3753_v33 = vpop.f32.mrf.mxu1  ;;  %v2694_v26 = vrot.slane %v2692_v14, 1  ;;  %3174 = vperm.xlu0 %4152, %v3146_v32  }
 0x11b   : > { %v822_v30 = vpop.f32.mrf.mxu0  ;;  %v2698_v38 = vrot.slane %v2696_v27, 1 }
 0x11c   : > { %v962_v37 = vpop.f32.mrf.mxu1  ;;  %3971 = vmatmul.mubr.msk.bf16.gmra.mxu1 %vm749_vm2, %v2393_v31 }
 0x11d   : > { %v3735_v36 = vpop.f32.mrf.mxu0  ;;  %v4843_v39 = vadd.f32 %v962_v37, %v819_v22  ;;  %3974 = vmatprep.mubr.msk.bf16.mxu1 %vm4239_vm1, %v4238_v45  ;;  %v2399_v22 = vsel %vm1166_vm5, %v2396_v59, %v2398_v10 }
 0x11e   : > { %v3756_v42 = vpop.f32.mrf.mxu1 }
 0x11f   : > { %v827_v40 = vpop.f32.mrf.mxu0  ;;  %3953 = vmatmul.mubr.msk.bf16.gmra.mxu0 %vm749_vm2, %v2255_v34  ;;  %v4927_v42 = vld [vmem:[%s4440_s9 + $0x88] sm:$0xff]  }
 0x120   : > { %3956 = vmatprep.mubr.msk.bf16.mxu0 %vm4239_vm1, %v4238_v45  ;;  %v965_v48 = vpop.f32.mrf.mxu1 }
 0x121   : > { %v3738_v47 = vpop.f32.mrf.mxu0  ;;  %v4852_v49 = vadd.f32 %v965_v48, %v822_v30  ;;  %v3148_v48 = vld [vmem:[%s5242_s0 + $0x30] sm:$0xff] }
 0x122   : > { %v3757_v53 = vpop.f32.mrf.mxu1  ;;  %v3147_v47 = vld [vmem:[%s5242_s0 + $0x28] sm:$0xff]  ;;  %3184 = vperm.xlu0 %4152, %v3148_v48  }
 0x123   : > { %v830_v50 = vpop.f32.mrf.mxu0  ;;  %3179 = vperm.xlu1 %4153, %v3147_v47  }
 0x124   : > { %v970_v56 = vpop.f32.mrf.mxu1  ;;  %3975 = vmatmul.mubr.msk.bf16.gmra.mxu1 %vm749_vm2, %v2395_v51  ;;  %v3618_v51 = vld [vmem:[%s5245_s3 + $0x1e] sm:$0x3] }
 0x125   : > { %v3739_v55 = vpop.f32.mrf.mxu0  ;;  %v4859_v57 = vadd.f32 %v970_v56, %v827_v40  ;;  %3978 = vmatprep.mubr.msk.bf16.mxu1 %vm4239_vm1, %v4238_v45  ;;  %v2695_v40 = vor.u32 %v2694_v26, %v2690_v25  ;;  %v3027_v59 = vsel %vm765_vm0, %v3618_v51, 0 }
 0x126   : > { %v3760_v44 = vpop.f32.mrf.mxu1  ;;  %v2703_v55 = vshll.u32 %v4927_v42, 16  ;;  %3194 = vperm.xlu0 %4152, %v3150_v60  }
 0x127   : > { %v835_v58 = vpop.f32.mrf.mxu0  ;;  %3957 = vmatmul.mubr.msk.bf16.gmra.mxu0 %vm749_vm2, %v2259_v29  ;;  %v2699_v29 = vsel %vm854_vm3, %v2695_v40, %v2698_v38  ;;  %v3149_v44 = vld [vmem:[%s5242_s0 + $0x38] sm:$0xff] }
 0x128   : > { %3960 = vmatprep.mubr.msk.bf16.mxu0 %vm4239_vm1, %v4238_v45  ;;  %v973_v62 = vpop.f32.mrf.mxu1  ;;  %3189 = vperm.xlu1 %4153, %v3149_v44  }
 0x129   : > { %v3742_v61 = vpop.f32.mrf.mxu0  ;;  %v4867_v63 = vadd.f32 %v973_v62, %v830_v50 }
 0x12a   : > { %v3761_v4 = vpop.f32.mrf.mxu1 }
 0x12b   : > { %v838_v0 = vpop.f32.mrf.mxu0  ;;  %v2705_v4 = vrot.slane %v2703_v55, 1 }
 0x12c   : > { %v978_v9 = vpop.f32.mrf.mxu1  ;;  %3979 = vmatmul.mubr.msk.bf16.gmra.mxu1 %vm749_vm2, %v2397_v2  ;;  %v2702_v2 = vor.u32 %v2700_v54, %v2698_v38 }
 0x12d   : > { %v3743_v7 = vpop.f32.mrf.mxu0  ;;  %v4879_v13 = vadd.f32 %v978_v9, %v835_v58  ;;  %3982 = vmatprep.mubr.msk.bf16.mxu1 %vm4239_vm1, %v4238_v45 }
 0x12e   : > { %v3764_v16 = vpop.f32.mrf.mxu1  ;;  %v3151_v7 = vld [vmem:[%s5242_s0 + $0x48] sm:$0xff] }
 0x12f   : > { %v1095_v8 = vpop.f32.mrf.mxu0  ;;  %3961 = vmatmul.mubr.msk.bf16.gmra.mxu0 %vm749_vm2, %v2265_v5  ;;  %v4964_v5 = vld [vmem:[%s4440_s9 + $0x90] sm:$0xff]   ;;  %3199 = vperm.xlu1 %4153, %v3151_v7   ;;  %v2707_v16 = vshrl.u32 %v4927_v42, 16 }
 0x130   : > { %v1144_v15 = vadd.f32 %v1095_v8, %v4804_v1  ;;  %3988 = vmatprep.mubr.msk.bf16.mxu0 %vm4239_vm1, %v4238_v45  ;;  %v981_v19 = vpop.f32.mrf.mxu1  ;;  %v3612_v1 = vld [vmem:[%s5245_s3 + $0x1a] sm:$0x3]  ;;  %v2710_v41 = vshll.u32 %v4964_v5, 16  ;;  %v2714_v40 = vshrl.u32 %v4964_v5, 16 }
 0x131   : > { %v3770_v18 = vpop.f32.mrf.mxu0  ;;  %v4901_v23 = vadd.f32 %v981_v19, %v838_v0  ;;  %v2893_v34 = vsel %vm765_vm0, %v3612_v1, 0  ;;  %v2709_v26 = vor.u32 %v2707_v16, %v2705_v4 }
 0x132   : > { %v3765_v31 = vpop.f32.mrf.mxu1 }
 0x133   : > { %v1098_v24 = vpop.f32.mrf.mxu0 }
 0x134   : > { %v1145_v30 = vadd.f32 %v1098_v24, %v4817_v12  ;;  %v1230_v36 = vpop.f32.mrf.mxu1  ;;  %3983 = vmatmul.mubr.msk.bf16.gmra.mxu1 %vm749_vm2, %v2399_v22 }
 0x135   : > { %v3771_v33 = vpop.f32.mrf.mxu0  ;;  %v4916_v37 = vadd.f32 %v1230_v36, %v1144_v15  ;;  %4010 = vmatprep.mubr.msk.bf16.mxu1 %vm4239_vm1, %v4238_v45 }
 0x136   : > { %v3792_v46 = vpop.f32.mrf.mxu1 }
 0x137   : > { %v1103_v12 = vpop.f32.mrf.mxu0  ;;  %3989 = vmatmul.mubr.msk.bf16.vlgmr.msra.gmra.mxu0 %vm749_vm2, %v4871_v3 }
 0x138   : > { %v1146_v43 = vadd.f32 %v1103_v12, %v4825_v20  ;;  %4031 = vmatpush3.bf16.msra.mxu0 %v2893_v34  ;;  %3992 = vmatprep.mubr.msk.bf16.mxu0 %vm4239_vm1, %v4238_v45  ;;  %v1233_v20 = vpop.f32.mrf.mxu1 }
 0x139   : > { %v3774_v50 = vpop.f32.mrf.mxu0  ;;  %v4941_v52 = vadd.f32 %v1233_v20, %v1145_v30  ;;  %v4992_v30 = vld [vmem:[%s4440_s9 + $0x98] sm:$0xff]  }
 0x13a   : > { %v3793_v58 = vpop.f32.mrf.mxu1  ;;  %v2717_v38 = vshll.u32 %v4992_v30, 16  ;;  %v5015_v20 = vld [vmem:[%s4438_s8 + $0x18] sm:$0xff]  }
 0x13b   : > { %v1106_v53 = vpop.f32.mrf.mxu0  ;;  %v2855_v58 = vrot.slane %v2700_v54, 4  ;;  %v2856_v54 = vrot.slane %v2696_v27, 5 }
 0x13c   : > { %v1147_v56 = vadd.f32 %v1106_v53, %v4834_v28  ;;  %v1238_v62 = vpop.f32.mrf.mxu1  ;;  %4011 = vmatmul.mubr.msk.bf16.vlgmr.msra.gmra.mxu1 %vm749_vm2, %v2699_v29 }
 0x13d   : > { %v3775_v61 = vpop.f32.mrf.mxu0  ;;  %v4955_v0 = vadd.f32 %v1238_v62, %v1146_v43  ;;  %4053 = vmatpush3.bf16.msra.mxu1 %v3027_v59  ;;  %4014 = vmatprep.mubr.msk.bf16.mxu1 %vm4239_vm1, %v4238_v45  ;;  %v2721_v62 = vshrl.u32 %v4992_v30, 16 }
 0x13e   : > { %v3796_v35 = vpop.f32.mrf.mxu1 }
 0x13f   : > { %v1111_v28 = vpop.f32.mrf.mxu0  ;;  %3993 = vmatmul.mubr.msk.bf16.gmra.mxu0 %vm749_vm2, %v4885_v11 }
 0x140   : > { %v1148_v6 = vadd.f32 %v1111_v28, %v4843_v39  ;;  %3996 = vmatprep.mubr.msk.bf16.mxu0 %vm4239_vm1, %v4238_v45  ;;  %v1241_v10 = vpop.f32.mrf.mxu1  ;;  %v2706_v39 = vsel %vm854_vm3, %v2702_v2, %v2705_v4  ;;  %v2725_v28 = vshll.u32 %v5015_v20, 16  ;;  %v2852_v4 = vrot.slane %v2690_v25, 4 }
 0x141   : > { %v3778_v9 = vpop.f32.mrf.mxu0  ;;  %v4974_v8 = vadd.f32 %v1241_v10, %v1147_v56 }
 0x142   : > { %v3797_v18 = vpop.f32.mrf.mxu1 }
 0x143   : > { %v1114_v15 = vpop.f32.mrf.mxu0 }
 0x144   : > { %v1149_v17 = vadd.f32 %v1114_v15, %v4852_v49  ;;  %v1246_v22 = vpop.f32.mrf.mxu1  ;;  %4015 = vmatmul.mubr.msk.bf16.gmra.mxu1 %vm749_vm2, %v2706_v39  ;;  %v2712_v49 = vrot.slane %v2710_v41, 1  ;;  %v2857_v39 = vor.u32 %v2856_v54, %v2855_v58 }
 0x145   : > { %v3779_v19 = vpop.f32.mrf.mxu0  ;;  %v4981_v1 = vadd.f32 %v1246_v22, %v1148_v6  ;;  %4018 = vmatprep.mubr.msk.bf16.mxu1 %vm4239_vm1, %v4238_v45  ;;  %v2853_v6 = vrot.slane %v2692_v14, 5  ;;  %v2727_v14 = vrot.slane %v2725_v28, 1 }
 0x146   : > { %v3800_v21 = vpop.f32.mrf.mxu1  ;;  %v2713_v12 = vsel %vm854_vm3, %v2709_v26, %v2712_v49  ;;  %v2716_v51 = vor.u32 %v2714_v40, %v2712_v49 }
 0x147   : > { %v1119_v24 = vpop.f32.mrf.mxu0  ;;  %3997 = vmatmul.mubr.msk.bf16.gmra.mxu0 %vm749_vm2, %v4927_v42  ;;  %v2854_v15 = vor.u32 %v2853_v6, %v2852_v4  ;;  %v2860_v21 = vrot.slane %v2703_v55, 5 }
 0x148   : > { %v1150_v31 = vadd.f32 %v1119_v24, %v4859_v57  ;;  %4000 = vmatprep.mubr.msk.bf16.mxu0 %vm4239_vm1, %v4238_v45  ;;  %v1249_v33 = vpop.f32.mrf.mxu1 }
 0x149   : > { %v3782_v32 = vpop.f32.mrf.mxu0  ;;  %v4997_v34 = vadd.f32 %v1249_v33, %v1149_v17 }
 0x14a   : > { %v3801_v46 = vpop.f32.mrf.mxu1 }
 0x14b   : > { %v1122_v36 = vpop.f32.mrf.mxu0 }
 0x14c   : > { %v1151_v43 = vadd.f32 %v1122_v36, %v4867_v63  ;;  %v1254_v47 = vpop.f32.mrf.mxu1  ;;  %4019 = vmatmul.mubr.msk.bf16.gmra.mxu1 %vm749_vm2, %v2713_v12  ;;  %v2719_v63 = vrot.slane %v2717_v38, 1 }
 0x14d   : > { %v3783_v57 = vpop.f32.mrf.mxu0  ;;  %v5004_v48 = vadd.f32 %v1254_v47, %v1150_v31  ;;  %4022 = vmatprep.mubr.msk.bf16.mxu1 %vm4239_vm1, %v4238_v45  ;;  %v2858_v31 = vsel %vm1017_vm4, %v2854_v15, %v2857_v39 }
 0x14e   : > { %v3804_v29 = vpop.f32.mrf.mxu1  ;;  %v2720_v61 = vsel %vm854_vm3, %v2716_v51, %v2719_v63 }
 0x14f   : > { %v1127_v50 = vpop.f32.mrf.mxu0  ;;  %4001 = vmatmul.mubr.msk.bf16.gmra.mxu0 %vm749_vm2, %v4964_v5 }
 0x150   : > { %v1152_v53 = vadd.f32 %v1127_v50, %v4879_v13  ;;  %4004 = vmatprep.mubr.msk.bf16.mxu0 %vm4239_vm1, %v4238_v45  ;;  %v1257_v59 = vpop.f32.mrf.mxu1 }
 0x151   : > { %v3786_v56 = vpop.f32.mrf.mxu0  ;;  %v5022_v44 = vadd.f32 %v1257_v59, %v1151_v43  ;;  %v3001_v43 = vrot.slane %v4885_v11, 5  ;;  %v2863_v11 = vrot.slane %v2714_v40, 4 }
 0x152   : > { %v3805_v2 = vpop.f32.mrf.mxu1 }
 0x153   : > { %v1130_v60 = vpop.f32.mrf.mxu0 }
 0x154   : > { %v1153_v13 = vadd.f32 %v1130_v60, %v4901_v23  ;;  %v1262_v7 = vpop.f32.mrf.mxu1  ;;  %4023 = vmatmul.mubr.msk.bf16.gmra.mxu1 %vm749_vm2, %v2720_v61  ;;  %v2723_v23 = vor.u32 %v2721_v62, %v2719_v63 }
 0x155   : > { %v3787_v35 = vpop.f32.mrf.mxu0  ;;  %v5035_v9 = vadd.f32 %v1262_v7, %v1152_v53  ;;  %4026 = vmatprep.mubr.msk.bf16.mxu1 %vm4239_vm1, %v4238_v45 }
 0x156   : > { %v3808_v27 = vpop.f32.mrf.mxu1  ;;  %v2728_v24 = vsel %vm854_vm3, %v2723_v23, %v2727_v14 }
 0x157   : > { %v1397_v10 = vpop.f32.mrf.mxu0  ;;  %4005 = vmatmul.mubr.msk.bf16.gmra.mxu0 %vm749_vm2, %v4992_v30 }
 0x158   : > { %v1446_v25 = vadd.f32 %v1397_v10, %v4916_v37  ;;  %4032 = vmatprep.mubr.msk.bf16.mxu0 %vm4239_vm1, %v4238_v45  ;;  %v1265_v18 = vpop.f32.mrf.mxu1  ;;  %v2859_v37 = vrot.slane %v2707_v16, 4 }
 0x159   : > { %v3814_v17 = vpop.f32.mrf.mxu0  ;;  %v5048_v19 = vadd.f32 %v1265_v18, %v1153_v13 }
 0x15a   : > { %v3809_v49 = vpop.f32.mrf.mxu1  ;;  %v2861_v55 = vor.u32 %v2860_v21, %v2859_v37  ;;  %v2874_v37 = vrot.slane %v2725_v28, 5 }
 0x15b   : > { %v1400_v22 = vpop.f32.mrf.mxu0 }
 0x15c   : > { %v1447_v26 = vadd.f32 %v1400_v22, %v4941_v52  ;;  %v1559_v33 = vpop.f32.mrf.mxu1  ;;  %4027 = vmatmul.mubr.msk.bf16.gmra.mxu1 %vm749_vm2, %v2728_v24  ;;  %v3000_v52 = vrot.slane %v4871_v3, 5  ;;  %v2862_v3 = vsel %vm1017_vm4, %v2857_v39, %v2861_v55  ;;  %v2871_v39 = vshrl.u32 %v5015_v20, 16 }
 0x15d   : > { %v3815_v32 = vpop.f32.mrf.mxu0  ;;  %v5058_v36 = vadd.f32 %v1559_v33, %v1446_v25  ;;  %4054 = vmatprep.mubr.msk.bf16.mxu1 %vm4239_vm1, %v4238_v45 }
 0x15e   : > { %v3836_v46 = vpop.f32.mrf.mxu1  ;;  %v3002_v63 = vsel %vm1166_vm5, %v3000_v52, %v3001_v43 }
 0x15f   : > { %v1405_v12 = vpop.f32.mrf.mxu0  ;;  %4033 = vmatmul.mubr.msk.bf16.vlgmr.msra.gmra.mxu0 %vm749_vm2, %v2858_v31 }
 0x160   : > { %v1448_v16 = vadd.f32 %v1405_v12, %v4955_v0  ;;  %4036 = vmatprep.mubr.msk.bf16.mxu0 %vm4239_vm1, %v4238_v45  ;;  %v1562_v47 = vpop.f32.mrf.mxu1  ;;  %v2864_v0 = vrot.slane %v2710_v41, 5 }
 0x161   : > { %v3818_v57 = vpop.f32.mrf.mxu0  ;;  %v5068_v50 = vadd.f32 %v1562_v47, %v1447_v26 }
 0x162   : > { %v3837_v29 = vpop.f32.mrf.mxu1  ;;  %v2865_v41 = vor.u32 %v2864_v0, %v2863_v11  ;;  %v3009_v11 = vrot.slane %v5015_v20, 5 }
 0x163   : > { %v1408_v51 = vpop.f32.mrf.mxu0 }
 0x164   : > { %v1449_v53 = vadd.f32 %v1408_v51, %v4974_v8  ;;  %v1567_v58 = vpop.f32.mrf.mxu1  ;;  %4055 = vmatmul.mubr.msk.bf16.vlgmr.msra.gmra.mxu1 %vm749_vm2, %v3002_v63  ;;  %v3003_v8 = vrot.slane %v4927_v42, 5  ;;  %v2866_v10 = vsel %vm1017_vm4, %v2861_v55, %v2865_v41  ;;  %v2867_v42 = vrot.slane %v2721_v62, 4 }
 0x165   : > { %v3819_v56 = vpop.f32.mrf.mxu0  ;;  %v5078_v59 = vadd.f32 %v1567_v58, %v1448_v16  ;;  %4058 = vmatprep.mubr.msk.bf16.mxu1 %vm4239_vm1, %v4238_v45 }
 0x166   : > { %v3840_v40 = vpop.f32.mrf.mxu1  ;;  %v3004_v54 = vsel %vm1166_vm5, %v3001_v43, %v3003_v8 }
 0x167   : > { %v1413_v60 = vpop.f32.mrf.mxu0  ;;  %4037 = vmatmul.mubr.msk.bf16.gmra.mxu0 %vm749_vm2, %v2862_v3 }
 0x168   : > { %v1450_v61 = vadd.f32 %v1413_v60, %v4981_v1  ;;  %4040 = vmatprep.mubr.msk.bf16.mxu0 %vm4239_vm1, %v4238_v45  ;;  %v1570_v2 = vpop.f32.mrf.mxu1  ;;  %v2868_v1 = vrot.slane %v2717_v38, 5 }
 0x169   : > { %v3822_v13 = vpop.f32.mrf.mxu0  ;;  %v5087_v4 = vadd.f32 %v1570_v2, %v1449_v53 }
 0x16a   : > { %v3841_v7 = vpop.f32.mrf.mxu1  ;;  %v2869_v38 = vor.u32 %v2868_v1, %v2867_v42 }
 0x16b   : > { %v1416_v6 = vpop.f32.mrf.mxu0 }
 0x16c   : > { %v1451_v35 = vadd.f32 %v1416_v6, %v4997_v34  ;;  %v1575_v14 = vpop.f32.mrf.mxu1  ;;  %4059 = vmatmul.mubr.msk.bf16.gmra.mxu1 %vm749_vm2, %v3004_v54  ;;  %v3005_v34 = vrot.slane %v4964_v5, 5  ;;  %v2870_v5 = vsel %vm1017_vm4, %v2865_v41, %v2869_v38 }
 0x16d   : > { %v3823_v23 = vpop.f32.mrf.mxu0  ;;  %v5097_v25 = vadd.f32 %v1575_v14, %v1450_v61  ;;  %4062 = vmatprep.mubr.msk.bf16.mxu1 %vm4239_vm1, %v4238_v45 }
 0x16e   : > { %v3844_v62 = vpop.f32.mrf.mxu1  ;;  %v3006_v26 = vsel %vm1166_vm5, %v3003_v8, %v3005_v34 }
 0x16f   : > { %v1421_v27 = vpop.f32.mrf.mxu0  ;;  %4041 = vmatmul.mubr.msk.bf16.gmra.mxu0 %vm749_vm2, %v2866_v10 }
 0x170   : > { %v1452_v15 = vadd.f32 %v1421_v27, %v5004_v48  ;;  %4044 = vmatprep.mubr.msk.bf16.mxu0 %vm4239_vm1, %v4238_v45  ;;  %v1578_v18 = vpop.f32.mrf.mxu1  ;;  %v2873_v48 = vrot.slane %v2871_v39, 4 }
 0x171   : > { %v3826_v17 = vpop.f32.mrf.mxu0  ;;  %v5107_v22 = vadd.f32 %v1578_v18, %v1451_v35 }
 0x172   : > { %v3845_v31 = vpop.f32.mrf.mxu1  ;;  %v2875_v28 = vor.u32 %v2874_v37, %v2873_v48 }
 0x173   : > { %v1424_v24 = vpop.f32.mrf.mxu0 }
 0x174   : > { %v1453_v49 = vadd.f32 %v1424_v24, %v5022_v44  ;;  %v1583_v32 = vpop.f32.mrf.mxu1  ;;  %4063 = vmatmul.mubr.msk.bf16.gmra.mxu1 %vm749_vm2, %v3006_v26  ;;  %v3007_v44 = vrot.slane %v4992_v30, 5  ;;  %v2876_v53 = vsel %vm1017_vm4, %v2869_v38, %v2875_v28 }
 0x175   : > { %v3827_v21 = vpop.f32.mrf.mxu0  ;;  %v5115_v33 = vadd.f32 %v1583_v32, %v1452_v15  ;;  %4066 = vmatprep.mubr.msk.bf16.mxu1 %vm4239_vm1, %v4238_v45 }
 0x176   : > { %v3848_v43 = vpop.f32.mrf.mxu1  ;;  %v3008_v47 = vsel %vm1166_vm5, %v3005_v34, %v3007_v44  ;;  %v3010_v61 = vsel %vm1166_vm5, %v3007_v44, %v3009_v11 }
 0x177   : > { %v1429_v12 = vpop.f32.mrf.mxu0  ;;  %4045 = vmatmul.mubr.msk.bf16.gmra.mxu0 %vm749_vm2, %v2870_v5 }
 0x178   : > { %v1454_v52 = vadd.f32 %v1429_v12, %v5035_v9  ;;  %4048 = vmatprep.mubr.msk.bf16.mxu0 %vm4239_vm1, %v4238_v45  ;;  %v1586_v46 = vpop.f32.mrf.mxu1 }
 0x179   : > { %v3830_v16 = vpop.f32.mrf.mxu0  ;;  %v1615_v55 = vadd.f32 %v1586_v46, %v1453_v49 }
 0x17a   : > { %v3849_v63 = vpop.f32.mrf.mxu1 }
 0x17b   : > { %v1432_v57 = vpop.f32.mrf.mxu0 }
 0x17c   : > { %v1455_v51 = vadd.f32 %v1432_v57, %v5048_v19  ;;  %v1591_v30 = vpop.f32.mrf.mxu1  ;;  %4067 = vmatmul.mubr.msk.bf16.gmra.mxu1 %vm749_vm2, %v3008_v47 }
 0x17d   : > { %v3831_v29 = vpop.f32.mrf.mxu0  ;;  %v1616_v9 = vadd.f32 %v1591_v30, %v1454_v52  ;;  %4070 = vmatprep.mubr.msk.bf16.mxu1 %vm4239_vm1, %v4238_v45 }
 0x17e   : > { %v3852_v56 = vpop.f32.mrf.mxu1 }
 0x17f   : > { %v1707_v3 = vpop.f32.mrf.mxu0  ;;  %4049 = vmatmul.mubr.msk.bf16.gmra.mxu0 %vm749_vm2, %v2876_v53 }
 0x180   : > { %v1756_v0 = vadd.f32 %v1707_v3, %v5058_v36  ;;  %v1594_v58 = vpop.f32.mrf.mxu1 }
 0x181   : > { %v3858_v19 = vpop.f32.mrf.mxu0  ;;  %v1617_v60 = vadd.f32 %v1594_v58, %v1455_v51 }
 0x182   : > { %v3853_v41 = vpop.f32.mrf.mxu1 }
 0x183   : > { %v1710_v8 = vpop.f32.mrf.mxu0 }
 0x184   : > { %v1757_v40 = vadd.f32 %v1710_v8, %v5068_v50  ;;  %v1841_v2 = vpop.f32.mrf.mxu1  ;;  %4071 = vmatmul.mubr.msk.bf16.gmra.mxu1 %vm749_vm2, %v3010_v61 }
 0x185   : > { %v3859_v13 = vpop.f32.mrf.mxu0  ;;  %v1890_v6 = vadd.f32 %v1841_v2, %v1756_v0 }
 0x186   : > { %v3880_v35 = vpop.f32.mrf.mxu1 }
 0x187   : > { %v1715_v54 = vpop.f32.mrf.mxu0 }
 0x188   : > { %v1758_v20 = vadd.f32 %v1715_v54, %v5078_v59  ;;  %v1844_v7 = vpop.f32.mrf.mxu1 }
 0x189   : > { %v3862_v36 = vpop.f32.mrf.mxu0  ;;  %v1891_v10 = vadd.f32 %v1844_v7, %v1757_v40 }
 0x18a   : > { %v3881_v23 = vpop.f32.mrf.mxu1 }
 0x18b   : > { %v1718_v42 = vpop.f32.mrf.mxu0 }
 0x18c   : > { %v1759_v1 = vadd.f32 %v1718_v42, %v5087_v4  ;;  %v1849_v27 = vpop.f32.mrf.mxu1 }
 0x18d   : > { %v3863_v14 = vpop.f32.mrf.mxu0  ;;  %v1892_v50 = vadd.f32 %v1849_v27, %v1758_v20 }
 0x18e   : > { %v3884_v62 = vpop.f32.mrf.mxu1 }
 0x18f   : > { %v1723_v34 = vpop.f32.mrf.mxu0 }
 0x190   : > { %v1760_v15 = vadd.f32 %v1723_v34, %v5097_v25  ;;  %v1852_v39 = vpop.f32.mrf.mxu1 }
 0x191   : > { %v3866_v38 = vpop.f32.mrf.mxu0  ;;  %v1893_v17 = vadd.f32 %v1852_v39, %v1759_v1 }
 0x192   : > { %v3885_v24 = vpop.f32.mrf.mxu1 }
 0x193   : > { %v1726_v18 = vpop.f32.mrf.mxu0 }
 0x194   : > { %v1761_v59 = vadd.f32 %v1726_v18, %v5107_v22  ;;  %v1857_v49 = vpop.f32.mrf.mxu1 }
 0x195   : > { %v3867_v26 = vpop.f32.mrf.mxu0  ;;  %v1894_v31 = vadd.f32 %v1857_v49, %v1760_v15 }
 0x196   : > { %v3888_v48 = vpop.f32.mrf.mxu1 }
 0x197   : > { %v1731_v5 = vpop.f32.mrf.mxu0 }
 0x198   : > { %v1762_v4 = vadd.f32 %v1731_v5, %v5115_v33  ;;  %v1860_v21 = vpop.f32.mrf.mxu1 }
 0x199   : > { %v3870_v37 = vpop.f32.mrf.mxu0  ;;  %v1895_v32 = vadd.f32 %v1860_v21, %v1761_v59 }
 0x19a   : > { %v3889_v44 = vpop.f32.mrf.mxu1 }
 0x19b   : > { %v1734_v12 = vpop.f32.mrf.mxu0 }
 0x19c   : > { %v1763_v25 = vadd.f32 %v1734_v12, %v1615_v55  ;;  %v1865_v43 = vpop.f32.mrf.mxu1 }
 0x19d   : > { %v3871_v52 = vpop.f32.mrf.mxu0  ;;  %v1896_v28 = vadd.f32 %v1865_v43, %v1762_v4 }
 0x19e   : > { %v3892_v22 = vpop.f32.mrf.mxu1 }
 0x19f   : > { %v1739_v16 = vpop.f32.mrf.mxu0 }
 0x1a0   : > { %v1764_v46 = vadd.f32 %v1739_v16, %v1616_v9  ;;  %v1868_v47 = vpop.f32.mrf.mxu1 }
 0x1a1   : > { %v3874_v57 = vpop.f32.mrf.mxu0  ;;  %v1897_v51 = vadd.f32 %v1868_v47, %v1763_v25 }
 0x1a2   : > { %v3893_v29 = vpop.f32.mrf.mxu1 }
 0x1a3   : > { %v1742_v63 = vpop.f32.mrf.mxu0 }
 0x1a4   : > { %v1765_v53 = vadd.f32 %v1742_v63, %v1617_v60  ;;  %v1873_v30 = vpop.f32.mrf.mxu1 }
 0x1a5   : > { %v3875_v33 = vpop.f32.mrf.mxu0  ;;  %v1898_v3 = vadd.f32 %v1873_v30, %v1764_v46 }
 0x1a6   : > { %v3896_v56 = vpop.f32.mrf.mxu1 }
 0x1a7   : > { %v2008_v11 = vpop.f32.mrf.mxu0 }
 0x1a8   : > { %v2057_v0 = vadd.f32 %v2008_v11, %v1890_v6  ;;  %v1876_v19 = vpop.f32.mrf.mxu1 }
 0x1a9   : > { %v3902_v55 = vpop.f32.mrf.mxu0  ;;  %v1899_v58 = vadd.f32 %v1876_v19, %v1765_v53 }
 0x1aa   : > { %v3897_v40 = vpop.f32.mrf.mxu1 }
 0x1ab   : > { %v2011_v8 = vpop.f32.mrf.mxu0 }
 0x1ac   : > { %v2058_v61 = vadd.f32 %v2011_v8, %v1891_v10  ;;  %v2170_v41 = vpop.f32.mrf.mxu1 }
 0x1ad   : > { %v3903_v9 = vpop.f32.mrf.mxu0  ;;  %v2219_v13 = vadd.f32 %v2170_v41, %v2057_v0 }
 0x1ae   : > { %v3924_v20 = vpop.f32.mrf.mxu1 }
 0x1af   : > { %v2016_v2 = vpop.f32.mrf.mxu0 }
 0x1b0   : > { %v2059_v54 = vadd.f32 %v2016_v2, %v1892_v50  ;;  %v2173_v35 = vpop.f32.mrf.mxu1 }
 0x1b1   : > { %v3906_v60 = vpop.f32.mrf.mxu0  ;;  %v2220_v36 = vadd.f32 %v2173_v35, %v2058_v61 }
 0x1b2   : > { %v3925_v1 = vpop.f32.mrf.mxu1 }
 0x1b3   : > { %v2019_v7 = vpop.f32.mrf.mxu0 }
 0x1b4   : > { %v2060_v42 = vadd.f32 %v2019_v7, %v1893_v17  ;;  %v2178_v23 = vpop.f32.mrf.mxu1 }
 0x1b5   : > { %v3907_v6 = vpop.f32.mrf.mxu0  ;;  %v2221_v14 = vadd.f32 %v2178_v23, %v2059_v54 }
 0x1b6   : > { %v3928_v15 = vpop.f32.mrf.mxu1 }
 0x1b7   : > { %v2024_v27 = vpop.f32.mrf.mxu0 }
 0x1b8   : > { %v2061_v34 = vadd.f32 %v2024_v27, %v1894_v31  ;;  %v2181_v62 = vpop.f32.mrf.mxu1 }
 0x1b9   : > { %v3910_v10 = vpop.f32.mrf.mxu0  ;;  %v2222_v38 = vadd.f32 %v2181_v62, %v2060_v42 }
 0x1ba   : > { %v3929_v59 = vpop.f32.mrf.mxu1 }
 0x1bb   : > { %v2027_v39 = vpop.f32.mrf.mxu0 }
 0x1bc   : > { %v2062_v18 = vadd.f32 %v2027_v39, %v1895_v32  ;;  %v2186_v24 = vpop.f32.mrf.mxu1 }
 0x1bd   : > { %v3911_v50 = vpop.f32.mrf.mxu0  ;;  %v2223_v26 = vadd.f32 %v2186_v24, %v2061_v34 }
 0x1be   : > { %v3932_v4 = vpop.f32.mrf.mxu1 }
 0x1bf   : > { %v2032_v49 = vpop.f32.mrf.mxu0 }
 0x1c0   : > { %v2063_v5 = vadd.f32 %v2032_v49, %v1896_v28  ;;  %v2189_v48 = vpop.f32.mrf.mxu1 }
 0x1c1   : > { %v3914_v17 = vpop.f32.mrf.mxu0  ;;  %v2224_v37 = vadd.f32 %v2189_v48, %v2062_v18 }
 0x1c2   : > { %v3933_v31 = vpop.f32.mrf.mxu1 }
 0x1c3   : > { %v2035_v21 = vpop.f32.mrf.mxu0 }
 0x1c4   : > { %v2064_v12 = vadd.f32 %v2035_v21, %v1897_v51  ;;  %v2194_v44 = vpop.f32.mrf.mxu1 }
 0x1c5   : > { %v3915_v25 = vpop.f32.mrf.mxu0  ;;  %v2225_v52 = vadd.f32 %v2194_v44, %v2063_v5 }
 0x1c6   : > { %v3936_v16 = vpop.f32.mrf.mxu1 }
 0x1c7   : > { %v2040_v43 = vpop.f32.mrf.mxu0 }
 0x1c8   : > { %v2065_v32 = vadd.f32 %v2040_v43, %v1898_v3  ;;  %v2197_v22 = vpop.f32.mrf.mxu1 }
 0x1c9   : > { %v3918_v46 = vpop.f32.mrf.mxu0  ;;  %v2226_v57 = vadd.f32 %v2197_v22, %v2064_v12 }
 0x1ca   : > { %v3937_v63 = vpop.f32.mrf.mxu1 }
 0x1cb   : > { %v2043_v47 = vpop.f32.mrf.mxu0 }
 0x1cc   : > { %v2066_v28 = vadd.f32 %v2043_v47, %v1899_v58  ;;  %v2202_v29 = vpop.f32.mrf.mxu1 }
 0x1cd   : > { %v3919_v53 = vpop.f32.mrf.mxu0  ;;  %v2227_v33 = vadd.f32 %v2202_v29, %v2065_v32 }
 0x1ce   : > { %v3940_v11 = vpop.f32.mrf.mxu1 }
 0x1cf   : > { %v2318_v30 = vpop.f32.mrf.mxu0 }
 0x1d0   : > { %v2367_v51 = vadd.f32 %v2318_v30, %v2219_v13  ;;  %v2205_v3 = vpop.f32.mrf.mxu1 }
 0x1d1   : > { %v3946_v0 = vpop.f32.mrf.mxu0  ;;  %v2228_v56 = vadd.f32 %v2205_v3, %v2066_v28 }
 0x1d2   : > { %v3941_v58 = vpop.f32.mrf.mxu1 }
 0x1d3   : > { %v2321_v55 = vpop.f32.mrf.mxu0 }
 0x1d4   : > { %v2368_v19 = vadd.f32 %v2321_v55, %v2220_v36  ;;  %v2452_v61 = vpop.f32.mrf.mxu1 }
 0x1d5   : > { %v3947_v8 = vpop.f32.mrf.mxu0  ;;  %v5157_v40 = vadd.f32 %v2452_v61, %v2367_v51 }
 0x1d6   : > { %v3968_v13 = vpop.f32.mrf.mxu1 }
 0x1d7   : > { %v2326_v9 = vpop.f32.mrf.mxu0 }
 0x1d8   : > { %v2369_v41 = vadd.f32 %v2326_v9, %v2221_v14  ;;  %v2455_v54 = vpop.f32.mrf.mxu1 }
 0x1d9   : > { %v3950_v2 = vpop.f32.mrf.mxu0  ;;  %v5159_v20 = vadd.f32 %v2455_v54, %v2368_v19 }
 0x1da   : > { %v3969_v7 = vpop.f32.mrf.mxu1 }
 0x1db   : > { %v2329_v60 = vpop.f32.mrf.mxu0 }
 0x1dc   : > { %v2370_v35 = vadd.f32 %v2329_v60, %v2222_v38  ;;  %v2460_v45 = vpop.f32.mrf.mxu1 }
 0x1dd   : > { %v3951_v42 = vpop.f32.mrf.mxu0  ;;  %v5161_v1 = vadd.f32 %v2460_v45, %v2369_v41 }
 0x1de   : > { %v3972_v23 = vpop.f32.mrf.mxu1 }
 0x1df   : > { %v2334_v36 = vpop.f32.mrf.mxu0 }
 0x1e0   : > { %v2371_v6 = vadd.f32 %v2334_v36, %v2223_v26  ;;  %v2463_v34 = vpop.f32.mrf.mxu1 }
 0x1e1   : > { %v3954_v27 = vpop.f32.mrf.mxu0  ;;  %v5163_v15 = vadd.f32 %v2463_v34, %v2370_v35 }
 0x1e2   : > { %v3973_v62 = vpop.f32.mrf.mxu1 }
 0x1e3   : > { %v2337_v14 = vpop.f32.mrf.mxu0 }
 0x1e4   : > { %v2372_v10 = vadd.f32 %v2337_v14, %v2224_v37  ;;  %v2468_v18 = vpop.f32.mrf.mxu1 }
 0x1e5   : > { %v3955_v39 = vpop.f32.mrf.mxu0  ;;  %v5165_v59 = vadd.f32 %v2468_v18, %v2371_v6 }
 0x1e6   : > { %v3976_v24 = vpop.f32.mrf.mxu1 }
 0x1e7   : > { %v2342_v38 = vpop.f32.mrf.mxu0 }
 0x1e8   : > { %v2373_v50 = vadd.f32 %v2342_v38, %v2225_v52  ;;  %v2471_v5 = vpop.f32.mrf.mxu1 }
 0x1e9   : > { %v3958_v49 = vpop.f32.mrf.mxu0  ;;  %v5167_v4 = vadd.f32 %v2471_v5, %v2372_v10 }
 0x1ea   : > { %v3977_v48 = vpop.f32.mrf.mxu1 }
 0x1eb   : > { %v2345_v26 = vpop.f32.mrf.mxu0 }
 0x1ec   : > { %v2374_v17 = vadd.f32 %v2345_v26, %v2226_v57  ;;  %v2476_v12 = vpop.f32.mrf.mxu1 }
 0x1ed   : > { %v3959_v21 = vpop.f32.mrf.mxu0  ;;  %v5169_v31 = vadd.f32 %v2476_v12, %v2373_v50 }
 0x1ee   : > { %v3980_v44 = vpop.f32.mrf.mxu1 }
 0x1ef   : > { %v2350_v37 = vpop.f32.mrf.mxu0 }
 0x1f0   : > { %v2375_v25 = vadd.f32 %v2350_v37, %v2227_v33  ;;  %v2479_v32 = vpop.f32.mrf.mxu1 }
 0x1f1   : > { %v3962_v43 = vpop.f32.mrf.mxu0  ;;  %v5171_v16 = vadd.f32 %v2479_v32, %v2374_v17  ;;  %v3155_v32 = vpop.permute.xlu0 %3154 }
 0x1f2   : > { %v3981_v22 = vpop.f32.mrf.mxu1 }
 0x1f3   : > { %v2353_v52 = vpop.f32.mrf.mxu0 }
 0x1f4   : > { %v2376_v46 = vadd.f32 %v2353_v52, %v2228_v56  ;;  %v2484_v28 = vpop.f32.mrf.mxu1 }
 0x1f5   : > { %v3963_v47 = vpop.f32.mrf.mxu0  ;;  %v5173_v63 = vadd.f32 %v2484_v28, %v2375_v25 }
 0x1f6   : > { %v3984_v53 = vpop.f32.mrf.mxu1 }
 0x1f7   : > { %v2619_v57 = vpop.f32.mrf.mxu0 }
 0x1f8   : > { %v2487_v30 = vpop.f32.mrf.mxu1  ;;  %v2668_v21 = vadd.f32 %v2619_v57, %v5157_v40 }
 0x1f9   : > { %v3990_v29 = vpop.f32.mrf.mxu0  ;;  %v5175_v51 = vadd.f32 %v2487_v30, %v2376_v46 }
 0x1fa   : > { %v3985_v33 = vpop.f32.mrf.mxu1 }
 0x1fb   : > { %v2622_v11 = vpop.f32.mrf.mxu0 }
 0x1fc   : > { %v2781_v3 = vpop.f32.mrf.mxu1  ;;  %v2669_v52 = vadd.f32 %v2622_v11, %v5159_v20 }
 0x1fd   : > { %v3991_v0 = vpop.f32.mrf.mxu0  ;;  %v2830_v25 = vadd.f32 %v2781_v3, %v2668_v21 }
 0x1fe   : > { %v4012_v19 = vpop.f32.mrf.mxu1 }
 0x1ff   : > { %v2627_v55 = vpop.f32.mrf.mxu0  ;;  %v3160_v19 = vpop.permute.xlu0 %3159 }
 0x200   : > { %v2784_v8 = vpop.f32.mrf.mxu1  ;;  %v2670_v33 = vadd.f32 %v2627_v55, %v5161_v1 }
 0x201   : > { %v3994_v58 = vpop.f32.mrf.mxu0  ;;  %v2831_v28 = vadd.f32 %v2784_v8, %v2669_v52 }
 0x202   : > { %v4013_v61 = vpop.f32.mrf.mxu1 }
 0x203   : > { %v2630_v56 = vpop.f32.mrf.mxu0 }
 0x204   : > { %v2789_v41 = vpop.f32.mrf.mxu1 }
 0x205   : > { %v3995_v9 = vpop.f32.mrf.mxu0  ;;  %v2832_v58 = vadd.f32 %v2789_v41, %v2670_v33 }
 0x206   : > { %v4016_v2 = vpop.f32.mrf.mxu1 }
 0x207   : > { %v5177_v13 = vpop.f32.mrf.mxu0  ;;  %v2671_v2 = vadd.f32 %v2630_v56, %v5163_v15 }
 0x208   : > { %v2792_v60 = vpop.f32.mrf.mxu1  ;;  %v2672_v41 = vadd.f32 %v5177_v13, %v5165_v59 }
 0x209   : > { %v3998_v54 = vpop.f32.mrf.mxu0  ;;  %v2833_v8 = vadd.f32 %v2792_v60, %v2671_v2 }
 0x20a   : > { %v4017_v7 = vpop.f32.mrf.mxu1 }
 0x20b   : > { %v5179_v35 = vpop.f32.mrf.mxu0 }
 0x20c   : > { %v5181_v45 = vpop.f32.mrf.mxu1 }
 0x20d   : > { %v3999_v42 = vpop.f32.mrf.mxu0 }
 0x20e   : > { %v4020_v6 = vpop.f32.mrf.mxu1  ;;  %v3165_v42 = vpop.permute.xlu1 %3164 }
 0x20f   : > { %v5183_v36 = vpop.f32.mrf.mxu0 }
 0x210   : > { %v5185_v27 = vpop.f32.mrf.mxu1  ;;  %v2674_v33 = vadd.f32 %v5183_v36, %v5169_v31 }
 0x211   : > { %v4002_v23 = vpop.f32.mrf.mxu0 }
 0x212   : > { %v4021_v14 = vpop.f32.mrf.mxu1 }
 0x213   : > { %v5187_v34 = vpop.f32.mrf.mxu0 }
 0x214   : > { %v5189_v62 = vpop.f32.mrf.mxu1 }
 0x215   : > { %v4003_v10 = vpop.f32.mrf.mxu0 }
 0x216   : > { %v4024_v18 = vpop.f32.mrf.mxu1 }
 0x217   : > { %v5191_v39 = vpop.f32.mrf.mxu0 }
 0x218   : > { %v5193_v50 = vpop.f32.mrf.mxu1 }
 0x219   : > { %v4006_v38 = vpop.f32.mrf.mxu0 }
 0x21a   : > { %v4025_v49 = vpop.f32.mrf.mxu1 }
 0x21b   : > { %v5195_v24 = vpop.f32.mrf.mxu0 }
 0x21c   : > { %v5197_v26 = vpop.f32.mrf.mxu1 }
 0x21d   : > { %v4007_v5 = vpop.f32.mrf.mxu0 }
 0x21e   : > { %v4028_v48 = vpop.f32.mrf.mxu1 }
 0x21f   : > { %v2929_v17 = vpop.f32.mrf.mxu0 }
 0x220   : > { %v5200_v37 = vpop.f32.mrf.mxu1  ;;  %v2978_v46 = vadd.f32 %v2929_v17, %v2830_v25  ;;  %v2834_v17 = vadd.f32 %v5181_v45, %v2672_v41  ;;  %v3170_v25 = vpop.permute.xlu1 %3169 }
 0x221   : > { %v4034_v12 = vpop.f32.mrf.mxu0 }
 0x222   : > { %v4029_v43 = vpop.f32.mrf.mxu1 }
 0x223   : > { %v2932_v44 = vpop.f32.mrf.mxu0  ;;  %v2673_v43 = vadd.f32 %v5179_v35, %v5167_v4 }
 0x224   : > { %v3063_v47 = vpop.f32.mrf.mxu1  ;;  %v2979_v0 = vadd.f32 %v2932_v44, %v2831_v28 }
 0x225   : > { %v4035_v22 = vpop.f32.mrf.mxu0  ;;  %v3112_v53 = vadd.f32 %v3063_v47, %v2978_v46 }
 0x226   : > { %v4056_v30 = vpop.f32.mrf.mxu1  ;;  %v2835_v22 = vadd.f32 %v5185_v27, %v2673_v43 }
 0x227   : > { %v2937_v29 = vpop.f32.mrf.mxu0  ;;  %v3202_v3 = vmul.f32 %v3155_v32, %v3112_v53 }
 0x228   : > { %v3066_v57 = vpop.f32.mrf.mxu1  ;;  %v2980_v11 = vadd.f32 %v2937_v29, %v2832_v58  ;;  %v3175_v29 = vpop.permute.xlu0 %3174 }
 0x229   : > { %v4038_v40 = vpop.f32.mrf.mxu0  ;;  %v3113_v61 = vadd.f32 %v3066_v57, %v2979_v0  ;;  %v3231_v23 = vmul.f32 %v3202_v3, %v3202_v3 }
 0x22a   : > { %v4057_v20 = vpop.f32.mrf.mxu1 }
 0x22b   : > { %v2940_v9 = vpop.f32.mrf.mxu0  ;;  %v3203_v54 = vmul.f32 %v3160_v19, %v3113_v61  ;;  %v2836_v19 = vadd.f32 %v5189_v62, %v2674_v33  ;;  %v2675_v20 = vadd.f32 %v5187_v34, %v5171_v16 }
 0x22c   : > { %v3071_v6 = vpop.f32.mrf.mxu1  ;;  %v2981_v38 = vadd.f32 %v2940_v9, %v2833_v8  ;;  %v3180_v9 = vpop.permute.xlu1 %3179 }
 0x22d   : > { %v4039_v7 = vpop.f32.mrf.mxu0  ;;  %v3213_v14 = vadd.f32 %v3203_v54, %v3202_v3  ;;  %v3232_v1 = vmul.f32 %v3203_v54, %v3203_v54  ;;  %v3114_v55 = vadd.f32 %v3071_v6, %v2980_v11  ;;  %v2837_v8 = vadd.f32 %v5193_v50, %v2675_v20  ;;  %v3230_v20 = vld [vmem:[%s5151_s18] sm:$0x1] }
 0x22e   : > { %v4060_v18 = vpop.f32.mrf.mxu1 }
 0x22f   : > { %v2945_v10 = vpop.f32.mrf.mxu0  ;;  %v3241_v49 = vadd.f32 %v3232_v1, %v3231_v23  ;;  %v3204_v5 = vmul.f32 %v3165_v42, %v3114_v55  ;;  %v2676_v55 = vadd.f32 %v5191_v39, %v5173_v63 }
 0x230   : > { %v3074_v56 = vpop.f32.mrf.mxu1  ;;  %v2982_v52 = vadd.f32 %v2945_v10, %v2834_v17 }
 0x231   : > { %v4042_v15 = vpop.f32.mrf.mxu0  ;;  %v3214_v48 = vadd.f32 %v3213_v14, %v3204_v5  ;;  %v3233_v60 = vmul.f32 %v3204_v5, %v3204_v5  ;;  %v3115_v21 = vadd.f32 %v3074_v56, %v2981_v38  ;;  %v3185_v14 = vpop.permute.xlu0 %3184  ;;  %v2838_v38 = vadd.f32 %v5197_v26, %v2676_v55 }
 0x232   : > { %v4061_v44 = vpop.f32.mrf.mxu1  ;;  %v3190_v56 = vpop.permute.xlu1 %3189 }
 0x233   : > { %v2948_v12 = vpop.f32.mrf.mxu0  ;;  %v3242_v32 = vadd.f32 %v3241_v49, %v3233_v60  ;;  %v3205_v46 = vmul.f32 %v3170_v25, %v3115_v21 }
 0x234   : > { %v3079_v13 = vpop.f32.mrf.mxu1  ;;  %v2983_v40 = vadd.f32 %v2948_v12, %v2835_v22 }
 0x235   : > { %v4043_v59 = vpop.f32.mrf.mxu0  ;;  %v3215_v47 = vadd.f32 %v3214_v48, %v3205_v46  ;;  %v3234_v28 = vmul.f32 %v3205_v46, %v3205_v46  ;;  %v3116_v53 = vadd.f32 %v3079_v13, %v2982_v52  ;;  %v2677_v48 = vadd.f32 %v5195_v24, %v5175_v51  ;;  %v3195_v26 = vpop.permute.xlu0 %3194 }
 0x236   : > { %v4064_v30 = vpop.f32.mrf.mxu1  ;;  %v3200_v51 = vpop.permute.xlu1 %3199 }
 0x237   : > { %v2953_v45 = vpop.f32.mrf.mxu0  ;;  %v3243_v0 = vadd.f32 %v3242_v32, %v3234_v28  ;;  %v3206_v57 = vmul.f32 %v3175_v29, %v3116_v53  ;;  %v2839_v25 = vadd.f32 %v5200_v37, %v2677_v48 }
 0x238   : > { %v3082_v35 = vpop.f32.mrf.mxu1  ;;  %v2984_v54 = vadd.f32 %v2953_v45, %v2836_v19 }
 0x239   : > { %v4046_v4 = vpop.f32.mrf.mxu0  ;;  %v3216_v58 = vadd.f32 %v3215_v47, %v3206_v57  ;;  %v3235_v3 = vmul.f32 %v3206_v57, %v3206_v57  ;;  %v3117_v61 = vadd.f32 %v3082_v35, %v2983_v40 }
 0x23a   : > { %v4065_v2 = vpop.f32.mrf.mxu1 }
 0x23b   : > { %v2956_v27 = vpop.f32.mrf.mxu0  ;;  %v3244_v11 = vadd.f32 %v3243_v0, %v3235_v3  ;;  %v3207_v7 = vmul.f32 %v3180_v9, %v3117_v61 }
 0x23c   : > { %v3087_v36 = vpop.f32.mrf.mxu1  ;;  %v2985_v18 = vadd.f32 %v2956_v27, %v2837_v8  ;;  %v3212_v27 = vld [vmem:[%s5146_s29] sm:$0x1] }
 0x23d   : > { %v4047_v31 = vpop.f32.mrf.mxu0  ;;  %v3217_v42 = vadd.f32 %v3216_v58, %v3207_v7  ;;  %v3236_v6 = vmul.f32 %v3207_v7, %v3207_v7  ;;  %v3118_v23 = vadd.f32 %v3087_v36, %v2984_v54 }
 0x23e   : > { %v4068_v1 = vpop.f32.mrf.mxu1 }
 0x23f   : > { %v2961_v62 = vpop.f32.mrf.mxu0  ;;  %v3245_v10 = vadd.f32 %v3244_v11, %v3236_v6  ;;  %v3208_v41 = vmul.f32 %v3185_v14, %v3118_v23 }
 0x240   : > { %v3090_v34 = vpop.f32.mrf.mxu1  ;;  %v2986_v21 = vadd.f32 %v2961_v62, %v2838_v38 }
 0x241   : > { %v4050_v16 = vpop.f32.mrf.mxu0  ;;  %v3218_v49 = vadd.f32 %v3217_v42, %v3208_v41  ;;  %v3237_v5 = vmul.f32 %v3208_v41, %v3208_v41  ;;  %v3119_v15 = vadd.f32 %v3090_v34, %v2985_v18 }
 0x242   : > { %v4069_v17 = vpop.f32.mrf.mxu1 }
 0x243   : > { %v2964_v50 = vpop.f32.mrf.mxu0  ;;  %v3246_v60 = vadd.f32 %v3245_v10, %v3237_v5  ;;  %v3209_v12 = vmul.f32 %v3190_v56, %v3119_v15 }
 0x244   : > { %v3095_v39 = vpop.f32.mrf.mxu1  ;;  %v2987_v59 = vadd.f32 %v2964_v50, %v2839_v25 }
 0x245   : > { %v4051_v63 = vpop.f32.mrf.mxu0  ;;  %v3219_v44 = vadd.f32 %v3218_v49, %v3209_v12  ;;  %v3238_v43 = vmul.f32 %v3209_v12, %v3209_v12  ;;  %v3120_v32 = vadd.f32 %v3095_v39, %v2986_v21 }
 0x246   : > { %v4072_v52 = vpop.f32.mrf.mxu1 }
 0x247   : > { %v3247_v46 = vadd.f32 %v3246_v60, %v3238_v43  ;;  %v3210_v13 = vmul.f32 %v3195_v26, %v3120_v32 }
 0x248   : > { %v3098_v22 = vpop.f32.mrf.mxu1 }
 0x249   : > { %v3220_v47 = vadd.f32 %v3219_v44, %v3210_v13  ;;  %v3239_v28 = vmul.f32 %v3210_v13, %v3210_v13  ;;  %v3121_v53 = vadd.f32 %v3098_v22, %v2987_v59 }
 0x24a   : > { %v4073_v24 = vpop.f32.mrf.mxu1 }
 0x24b   : > { %v3248_v45 = vadd.f32 %v3247_v46, %v3239_v28  ;;  %v3211_v29 = vmul.f32 %v3200_v51, %v3121_v53 }
 0x24d   : > { %v3221_v30 = vadd.f32 %v3220_v47, %v3211_v29  ;;  %v3240_v37 = vmul.f32 %v3211_v29, %v3211_v29 }
 0x24f   : > { %v3222_v33 = vrot.slane %v3221_v30, 4  ;;  %v3249_v0 = vadd.f32 %v3248_v45, %v3240_v37 }
 0x251   : > { %v3223_v40 = vadd.f32 %v3222_v33, %v3221_v30  ;;  %v3250_v57 = vrot.slane %v3249_v0, 4 }
 0x253   : > { %v3224_v4 = vrot.slane %v3223_v40, 2  ;;  %v3251_v35 = vadd.f32 %v3250_v57, %v3249_v0 }
 0x255   : > { %v3225_v19 = vadd.f32 %v3224_v4, %v3223_v40  ;;  %v3252_v58 = vrot.slane %v3251_v35, 2 }
 0x257   : > { %v3226_v3 = vrot.slane %v3225_v19, 1  ;;  %v3253_v61 = vadd.f32 %v3252_v58, %v3251_v35 }
 0x259   : > { %v3227_v9 = vadd.f32 %v3226_v3, %v3225_v19  ;;  %v3254_v2 = vrot.slane %v3253_v61, 1 }
 0x25b   : > { %v3228_v11 = vadd.f32 %v3227_v9, %v3212_v27  ;;  %v3255_v54 = vadd.f32 %v3254_v2, %v3253_v61 }
 0x25d   : > { %3229 = vst [vmem:[%s5146_s29] sm:$0x1] %v3228_v11  ;;  %v3256_v7 = vadd.f32 %v3255_v54, %v3230_v20 }
 0x25f   : > { %3257 = vst [vmem:[%s5151_s18] sm:$0x1] %v3256_v7 }
 0x260 PF: > { %s16_s22 = sadd.s32 1, %s4232_s22   ;;  %s5249_s18 = smov %s4220_s19 }
 0x261   : > { %p13_p11 = scmp.ge.s32.totalorder %s16_s22, 4   ;;  %s5250_s19 = smov %s4310_s27 }
 0x262   : > { %s5251_s20 = smov %s4228_s21  ;;  %s5252_s21 = smov %s5254_s23 }
 0x263   :  { %15 = sbr.rel (!%p13_p11) target bundleno = 3 (0x3), region = 258 }

// kernel: down_forward.3
= control target key start
LH: loop header
LB: loop body
LE: loop exit
PB: predicated region body
PF: predicated region fallthrough
CT: control target
= control target key end

     0   :  { %s4280_s18 = smov 0   ;;  %s4282_s19 = smov 0   ;;  %s5243_s0 = inlined_call_operand.vmem [shape: bf16[2,2,2,96,4], index: 0, kind: input, shape index: {}, may-alias: {0,1}]   ;;  %s5244_s1 = inlined_call_operand.vmem [shape: bf16[2,2,2,96,4], index: 1, kind: input, shape index: {}, may-alias: {0,1}]   ;;  %s5245_s2 = inlined_call_operand.vmem [shape: bf16[16,4,128], index: 2, kind: input, shape index: {}]   ;;  %s5246_s3 = inlined_call_operand.vmem [shape: f32[1,128], index: 3, kind: input, shape index: {}]   ;;  %s5247_s4 = inlined_call_operand.vmem [shape: f32[1,128], index: 4, kind: input, shape index: {}]   ;;  %s5248_s5 = inlined_call_operand.vmem [shape: bf16[2,80,128], index: 5, kind: output, shape index: {}]  }
   0x1   :  { %s4284_s20 = smov 0   ;;  %s4286_s21 = smov 0  }
   0x2   :  { %s4288_s22 = smov 0  }
   0x3 LB: > { %s27_s23 = sadd.s32 1, %s4238_s21  ;;  %p43_p1 = scmp.ne.s32.totalorder %s4230_s19, %s4226_s18  ;;  %s4242_s22 = sphi %s4288_s22, %s15_s22   ;;  %s4238_s21 = sphi %s4286_s21, %s5253_s21   ;;  %s4234_s20 = sphi %s4284_s20, %s5252_s20   ;;  %s4230_s19 = sphi %s4282_s19, %s5251_s19   ;;  %s4226_s18 = sphi %s4280_s18, %s5250_s18  }
   0x4   : > { %p29_p0 = scmp.ge.s32.totalorder %s27_s23, 2  ;;  %p44_p2 = scmp.eq.s32.totalorder %s4242_s22, 0 }
   0x5   : > { %s36_s26 = sadd.s32 1, %s4230_s19  ;;  %p3409_p5 = scmp.ge.s32.totalorder %s4242_s22, 2 }
   0x6   : > { %s5255_s23 = smov (%p29_p0, %s27_s23), 0  ;;  %p4311_p3 = por %p44_p2, %p43_p1 }
   0x7   : > { %s31_s25 = ssub.s32 %s4238_s21, %s5255_s23  ;;  %201 = sbr.rel (%p3409_p5) target bundleno = 57 (0x39), region = 28 }
   0x8   : > { %p34_p4 = scmp.eq.s32.totalorder %s31_s25, 0 }
   0xa   : > { %s4319_s27 = scalar_select %p34_p4, %s4230_s19, %s36_s26  }
   0xc   : > { %204 = sbr.rel (!%p4311_p3) target bundleno = 50 (0x32), region = 32  ;;  %s206_s28 = sand.u32 (%p4311_p3), 1, %s4230_s19  }
   0xd   : > { %s4087_s29 = smul.u32 (%p4311_p3), 192, %s4238_s21  ;;  %s4333_s10 = smov (%p4311_p3), 0  }
   0xe   : > { %s4086_s30 = smul.u32 (%p4311_p3), 160, %s206_s28 }
   0xf   : > { %s4329_s8 = scalar_lea.vmem (%p4311_p3), %s5243_s0, %s4087_s29  }
  0x10   : > { %s4331_s9 = scalar_lea.vmem (%p4311_p3), [#allocation3], %s4086_s30  }
  0x11 LB: >> { %v239_v0 = vld [vmem:[%s4329_s8] sm:$0xf]  ;;  %v241_v1 = vld [vmem:[%s4329_s8 + $0x4] sm:$0xf]  ;;  %v243_v2 = vld [vmem:[%s4329_s8 + $0x8] sm:$0xf]  ;;  %s4246_s10 = sphi %s4333_s10, %s233_s10  }
  0x12   : >> { %240 = vst [vmem:[%s4331_s9] sm:$0xf] %v239_v0  ;;  %242 = vst [vmem:[%s4331_s9 + $0x4] sm:$0xf] %v241_v1  ;;  %v245_v3 = vld [vmem:[%s4329_s8 + $0xc] sm:$0xf]  ;;  %s233_s10 = sadd.s32 1, %s4246_s10  }
  0x13   : >> { %244 = vst [vmem:[%s4331_s9 + $0x8] sm:$0xf] %v243_v2  ;;  %v247_v4 = vld [vmem:[%s4329_s8 + $0x10] sm:$0xf]  ;;  %v249_v5 = vld [vmem:[%s4329_s8 + $0x14] sm:$0xf] }
  0x14   : >> { %246 = vst [vmem:[%s4331_s9 + $0xc] sm:$0xf] %v245_v3  ;;  %248 = vst [vmem:[%s4331_s9 + $0x10] sm:$0xf] %v247_v4  ;;  %v251_v6 = vld [vmem:[%s4329_s8 + $0x18] sm:$0xf] }
  0x15   : >> { %250 = vst [vmem:[%s4331_s9 + $0x14] sm:$0xf] %v249_v5  ;;  %v253_v7 = vld [vmem:[%s4329_s8 + $0x1c] sm:$0xf]  ;;  %v255_v8 = vld [vmem:[%s4329_s8 + $0x20] sm:$0xf] }
  0x16   : >> { %252 = vst [vmem:[%s4331_s9 + $0x18] sm:$0xf] %v251_v6  ;;  %254 = vst [vmem:[%s4331_s9 + $0x1c] sm:$0xf] %v253_v7  ;;  %v257_v9 = vld [vmem:[%s4329_s8 + $0x24] sm:$0xf] }
  0x17   : >> { %256 = vst [vmem:[%s4331_s9 + $0x20] sm:$0xf] %v255_v8  ;;  %v259_v10 = vld [vmem:[%s4329_s8 + $0x30] sm:$0xf]  ;;  %v261_v11 = vld [vmem:[%s4329_s8 + $0x34] sm:$0xf] }
  0x18   : >> { %258 = vst [vmem:[%s4331_s9 + $0x24] sm:$0xf] %v257_v9  ;;  %260 = vst [vmem:[%s4331_s9 + $0x28] sm:$0xf] %v259_v10  ;;  %v263_v12 = vld [vmem:[%s4329_s8 + $0x38] sm:$0xf] }
  0x19   : >> { %262 = vst [vmem:[%s4331_s9 + $0x2c] sm:$0xf] %v261_v11  ;;  %v265_v13 = vld [vmem:[%s4329_s8 + $0x3c] sm:$0xf]  ;;  %v267_v14 = vld [vmem:[%s4329_s8 + $0x40] sm:$0xf] }
  0x1a   : >> { %264 = vst [vmem:[%s4331_s9 + $0x30] sm:$0xf] %v263_v12  ;;  %266 = vst [vmem:[%s4331_s9 + $0x34] sm:$0xf] %v265_v13  ;;  %v269_v15 = vld [vmem:[%s4329_s8 + $0x44] sm:$0xf] }
  0x1b   : >> { %268 = vst [vmem:[%s4331_s9 + $0x38] sm:$0xf] %v267_v14  ;;  %v271_v16 = vld [vmem:[%s4329_s8 + $0x48] sm:$0xf]  ;;  %v273_v17 = vld [vmem:[%s4329_s8 + $0x4c] sm:$0xf] }
  0x1c   : >> { %270 = vst [vmem:[%s4331_s9 + $0x3c] sm:$0xf] %v269_v15  ;;  %272 = vst [vmem:[%s4331_s9 + $0x40] sm:$0xf] %v271_v16  ;;  %v275_v18 = vld [vmem:[%s4329_s8 + $0x50] sm:$0xf] }
  0x1d   : >> { %274 = vst [vmem:[%s4331_s9 + $0x44] sm:$0xf] %v273_v17  ;;  %v277_v19 = vld [vmem:[%s4329_s8 + $0x54] sm:$0xf]  ;;  %v279_v20 = vld [vmem:[%s4329_s8 + $0x60] sm:$0xf] }
  0x1e   : >> { %276 = vst [vmem:[%s4331_s9 + $0x48] sm:$0xf] %v275_v18  ;;  %278 = vst [vmem:[%s4331_s9 + $0x4c] sm:$0xf] %v277_v19  ;;  %v281_v21 = vld [vmem:[%s4329_s8 + $0x64] sm:$0xf] }
  0x1f   : >> { %280 = vst [vmem:[%s4331_s9 + $0x50] sm:$0xf] %v279_v20  ;;  %v283_v22 = vld [vmem:[%s4329_s8 + $0x68] sm:$0xf]  ;;  %v285_v23 = vld [vmem:[%s4329_s8 + $0x6c] sm:$0xf] }
  0x20   : >> { %282 = vst [vmem:[%s4331_s9 + $0x54] sm:$0xf] %v281_v21  ;;  %284 = vst [vmem:[%s4331_s9 + $0x58] sm:$0xf] %v283_v22  ;;  %v287_v24 = vld [vmem:[%s4329_s8 + $0x70] sm:$0xf] }
  0x21   : >> { %286 = vst [vmem:[%s4331_s9 + $0x5c] sm:$0xf] %v285_v23  ;;  %v289_v25 = vld [vmem:[%s4329_s8 + $0x74] sm:$0xf]  ;;  %v291_v26 = vld [vmem:[%s4329_s8 + $0x78] sm:$0xf] }
  0x22   : >> { %288 = vst [vmem:[%s4331_s9 + $0x60] sm:$0xf] %v287_v24  ;;  %290 = vst [vmem:[%s4331_s9 + $0x64] sm:$0xf] %v289_v25  ;;  %v293_v27 = vld [vmem:[%s4329_s8 + $0x7c] sm:$0xf] }
  0x23   : >> { %292 = vst [vmem:[%s4331_s9 + $0x68] sm:$0xf] %v291_v26  ;;  %v295_v28 = vld [vmem:[%s4329_s8 + $0x80] sm:$0xf]  ;;  %v297_v29 = vld [vmem:[%s4329_s8 + $0x84] sm:$0xf] }
  0x24   : >> { %294 = vst [vmem:[%s4331_s9 + $0x6c] sm:$0xf] %v293_v27  ;;  %296 = vst [vmem:[%s4331_s9 + $0x70] sm:$0xf] %v295_v28  ;;  %v299_v30 = vld [vmem:[%s4329_s8 + $0x90] sm:$0xf] }
  0x25   : >> { %298 = vst [vmem:[%s4331_s9 + $0x74] sm:$0xf] %v297_v29  ;;  %v301_v31 = vld [vmem:[%s4329_s8 + $0x94] sm:$0xf]  ;;  %v303_v32 = vld [vmem:[%s4329_s8 + $0x98] sm:$0xf] }
  0x26   : >> { %300 = vst [vmem:[%s4331_s9 + $0x78] sm:$0xf] %v299_v30  ;;  %302 = vst [vmem:[%s4331_s9 + $0x7c] sm:$0xf] %v301_v31  ;;  %v305_v33 = vld [vmem:[%s4329_s8 + $0x9c] sm:$0xf] }
  0x27   : >> { %304 = vst [vmem:[%s4331_s9 + $0x80] sm:$0xf] %v303_v32  ;;  %v307_v34 = vld [vmem:[%s4329_s8 + $0xa0] sm:$0xf]  ;;  %v309_v35 = vld [vmem:[%s4329_s8 + $0xa4] sm:$0xf] }
  0x28   : >> { %306 = vst [vmem:[%s4331_s9 + $0x84] sm:$0xf] %v305_v33  ;;  %308 = vst [vmem:[%s4331_s9 + $0x88] sm:$0xf] %v307_v34  ;;  %v311_v36 = vld [vmem:[%s4329_s8 + $0xa8] sm:$0xf] }
  0x29   : >> { %310 = vst [vmem:[%s4331_s9 + $0x8c] sm:$0xf] %v309_v35  ;;  %v313_v37 = vld [vmem:[%s4329_s8 + $0xac] sm:$0xf]  ;;  %v315_v38 = vld [vmem:[%s4329_s8 + $0xb0] sm:$0xf] }
  0x2a   : >> { %312 = vst [vmem:[%s4331_s9 + $0x90] sm:$0xf] %v311_v36  ;;  %314 = vst [vmem:[%s4331_s9 + $0x94] sm:$0xf] %v313_v37  ;;  %v317_v39 = vld [vmem:[%s4329_s8 + $0xb4] sm:$0xf] }
  0x2b   : >> { %316 = vst [vmem:[%s4331_s9 + $0x98] sm:$0xf] %v315_v38  ;;  %318 = vst [vmem:[%s4331_s9 + $0x9c] sm:$0xf] %v317_v39  ;;  %p232_p6 = scmp.ge.s32.totalorder %s233_s10, 1 }
  0x2d   : > { %235 = sbr.rel (!%p232_p6) target bundleno = 17 (0x11), region = 221 }
  0x32 PF: > { %534 = sbr.rel (!%p4311_p3) target bundleno = 57 (0x39), region = 94  ;;  %s536_s11 = sand.u32 (%p4311_p3), 1, %s4230_s19  }
  0x33   : > { %s3418_s12 = smul.u32 (%p4311_p3), 192, %s4238_s21  ;;  %s3417_s13 = sshll.u32 (%p4311_p3), %s536_s11, 5 }
  0x34   : > { %s538_s17 = scalar_lea.vmem (%p4311_p3), [#allocation4], %s3417_s13 }
  0x35   : > { %s3313_s16 = scalar_lea.vmem (%p4311_p3), %s5244_s1, %s3418_s12 }
  0x36   : > { %v3419_v40 = vld [vmem:[%s3313_s16 + $0x28] sm:$0xff] (%p4311_p3)   ;;  %v3421_v41 = vld [vmem:[%s3313_s16 + $0x58] sm:$0xff] (%p4311_p3)  }
  0x37   : > { %v3423_v42 = vld [vmem:[%s3313_s16 + $0x88] sm:$0xff]   ;;  %563 = vst [vmem:[%s538_s17] sm:$0xff] %v3419_v40   ;;  %567 = vst [vmem:[%s538_s17 + $0x8] sm:$0xff] %v3421_v41   ;;  %v3425_v43 = vld [vmem:[%s3313_s16 + $0xb8] sm:$0xff]  }
  0x38   : > { %571 = vst [vmem:[%s538_s17 + $0x10] sm:$0xff] %v3423_v42   ;;  %575 = vst [vmem:[%s538_s17 + $0x18] sm:$0xff] %v3425_v43  }
  0x39 PF: > { %p3427_p7 = scmp.ge.s32.totalorder %s4242_s22, 1  ;;  %p616_p8 = scmp.lt.s32.totalorder %s4242_s22, 3 }
  0x3b   : > { %p617_p9 = pnand %p3427_p7, %p616_p8 }
  0x3c   : > { %s623_s26 = sand.u32 (!%p617_p9), 1, %s4226_s18   ;;  %p674_p10 = scmp.lt.s32.totalorder (!%p617_p9), %s4234_s20, 1 }
  0x3d   : > { %620 = sbr.rel (%p617_p9) target bundleno = 597 (0x255), region = 135  ;;  %s3428_s6 = sshll.u32 (!%p617_p9), %s623_s26, 5 }
  0x3e   : > { %s4088_s28 = smul.u32 (!%p617_p9), 160, %s623_s26  ;;  %s4447_s8 = scalar_lea.vmem (!%p617_p9), [#allocation4], %s3428_s6 }
  0x40   : > { %s4449_s9 = scalar_lea.vmem (!%p617_p9), [#allocation3], %s4088_s28 }
  0x42   : > { %v726_v44 = vld [vmem:[%s5245_s2] sm:$0x3]  ;;  %vm743_vm0 = vcmask 1041408   ;;  %v4248_v45 = vmov 0.0   ;;  %vm4249_vm1 = vmmov 0   ;;  %vm727_vm2 = vcmask 31744  }
  0x43   : > { %3734 = vmatprep.subr.bf16.mxu0 %v4248_v45  ;;  %v745_v46 = vsel %vm743_vm0, %v726_v44, 0  ;;  %3736 = vmatprep.mubr.msk.bf16.mxu0 %vm4249_vm1, %v4248_v45  ;;  %v3441_v47 = vld [vmem:[%s5245_s2 + $0x4] sm:$0x3]  ;;  %v3447_v49 = vld [vmem:[%s5245_s2 + $0x10] sm:$0x3]  ;;  %v4459_v52 = vld [vmem:[%s4449_s9 + $0x8] sm:$0xff]  }
  0x44   : > { %3735 = vmatpush3.bf16.msra.mxu0 %v745_v46  ;;  %3756 = vmatprep.subr.bf16.mxu1 %v4248_v45  ;;  %v888_v48 = vsel %vm743_vm0, %v3441_v47, 0  ;;  %v4452_v50 = vld [vmem:[%s4449_s9] sm:$0xff]   ;;  %v1037_v51 = vsel %vm743_vm0, %v3447_v49, 0  ;;  %v839_v55 = vshll.u32 %v4459_v52, 16  ;;  %v4469_v56 = vld [vmem:[%s4449_s9 + $0x10] sm:$0xff]   ;;  %v843_v61 = vshrl.u32 %v4459_v52, 16 }
  0x45   : > { %3757 = vmatpush3.bf16.msra.mxu1 %v888_v48  ;;  %3778 = vmatprep.subr.bf16.mxu0 %v4248_v45  ;;  %v833_v53 = vshrl.u32 %v4452_v50, 16  ;;  %v835_v54 = vshll.u32 %v4452_v50, 16  ;;  %v3453_v58 = vld [vmem:[%s5245_s2 + $0x14] sm:$0x3]  ;;  %vm832_vm3 = vsmask.f32 7424 }
  0x46   : > { %3758 = vmatprep.mubr.msk.bf16.mxu1 %vm4249_vm1, %v4248_v45  ;;  %3800 = vmatprep.subr.bf16.mxu1 %v4248_v45  ;;  %v841_v59 = vrot.slane %v839_v55, 1  ;;  %v846_v62 = vshll.u32 %v4469_v56, 16  ;;  %v1172_v63 = vsel %vm743_vm0, %v3453_v58, 0  ;;  %v4483_v3 = vld [vmem:[%s4449_s9 + $0x18] sm:$0xff]   ;;  %v850_v5 = vshrl.u32 %v4469_v56, 16  ;;  %v4499_v9 = vld [vmem:[%s4449_s9 + $0x20] sm:$0xff]  }
  0x47   : > { %3737 = vmatmul.mubr.msk.bf16.vlgmr.msra.gmra.mxu0 %vm727_vm2, %v4452_v50  ;;  %v837_v57 = vrot.slane %v835_v54, 1  ;;  %v853_v6 = vshll.u32 %v4483_v3, 16  ;;  %v857_v11 = vshrl.u32 %v4483_v3, 16  ;;  %v860_v12 = vshll.u32 %v4499_v9, 16  ;;  %v4512_v15 = vld [vmem:[%s4447_s8] sm:$0xff]   ;;  %s5257_s20 = smov (!%p674_p10, %s4234_s20), 1 }
  0x48   : > { %3779 = vmatpush3.bf16.msra.mxu0 %v1037_v51  ;;  %3740 = vmatprep.mubr.msk.bf16.mxu0 %vm4249_vm1, %v4248_v45  ;;  %v845_v1 = vor.u32 %v843_v61, %v841_v59  ;;  %v848_v2 = vrot.slane %v846_v62, 1  ;;  %v996_v16 = vrot.slane %v833_v53, 4  ;;  %v997_v17 = vrot.slane %v835_v54, 5  ;;  %v3477_v27 = vld [vmem:[%s5245_s2 + $0x2] sm:$0x3]  ;;  %s4089_s28 = smul.u32 40, %s5257_s20 }
  0x49   : > { %3822 = vmatprep.subr.bf16.mxu0 %v4248_v45  ;;  %v838_v60 = vor.u32 %v837_v57, %v833_v53  ;;  %v855_v8 = vrot.slane %v853_v6, 1  ;;  %v862_v14 = vrot.slane %v860_v12, 1  ;;  %v864_v19 = vshrl.u32 %v4499_v9, 16  ;;  %v3483_v36 = vld [vmem:[%s5245_s2 + $0x6] sm:$0x3] }
  0x4a   : > { %v849_v4 = vsel %vm832_vm3, %v845_v1, %v848_v2  ;;  %v852_v7 = vor.u32 %v850_v5, %v848_v2  ;;  %v868_v20 = vshll.u32 %v4512_v15, 16  ;;  %v1000_v21 = vrot.slane %v839_v55, 5  ;;  %s5191_s30 = scalar_lea.vmem %s5248_s5, %s4089_s28 }
  0x4b   : > { %v842_v0 = vsel %vm832_vm3, %v838_v60, %v841_v59  ;;  %v859_v13 = vor.u32 %v857_v11, %v855_v8  ;;  %v999_v22 = vrot.slane %v843_v61, 4  ;;  %v866_v23 = vor.u32 %v864_v19, %v862_v14  ;;  %v4576_v59 = vld [vmem:[%s4449_s9 + $0x28] sm:$0xff]  }
  0x4c   : > { %3759 = vmatmul.mubr.msk.bf16.vlgmr.msra.gmra.mxu1 %vm727_vm2, %v842_v0  ;;  %v856_v10 = vsel %vm832_vm3, %v852_v7, %v855_v8  ;;  %v870_v24 = vrot.slane %v868_v20, 1  ;;  %v998_v25 = vor.u32 %v997_v17, %v996_v16  ;;  %vm995_vm4 = vsmask.f32 3328  ;;  %v3489_v0 = vld [vmem:[%s5245_s2 + $0x12] sm:$0x3]  ;;  %v4603_v8 = vld [vmem:[%s4449_s9 + $0x38] sm:$0xff]  }
  0x4d   : > { %3801 = vmatpush3.bf16.msra.mxu1 %v1172_v63  ;;  %3762 = vmatprep.mubr.msk.bf16.mxu1 %vm4249_vm1, %v4248_v45  ;;  %v863_v18 = vsel %vm832_vm3, %v859_v13, %v862_v14  ;;  %v1001_v26 = vor.u32 %v1000_v21, %v999_v22  ;;  %v1003_v30 = vrot.slane %v850_v5, 4  ;;  %v1004_v31 = vrot.slane %v846_v62, 5  ;;  %v4585_v62 = vld [vmem:[%s4449_s9 + $0x30] sm:$0xff]   ;;  %v4619_v16 = vld [vmem:[%s4449_s9 + $0x40] sm:$0xff]   ;;  %v4635_v22 = vld [vmem:[%s4449_s9 + $0x48] sm:$0xff]  }
  0x4e   : > { %3844 = vmatprep.subr.bf16.mxu1 %v4248_v45  ;;  %v871_v28 = vsel %vm832_vm3, %v866_v23, %v870_v24  ;;  %v1339_v32 = vsel %vm743_vm0, %v3477_v27, 0  ;;  %v1145_v33 = vrot.slane %v4452_v50, 5  ;;  %v1146_v34 = vrot.slane %v4459_v52, 5 }
  0x4f   : > { %3741 = vmatmul.mubr.msk.bf16.gmra.mxu0 %vm727_vm2, %v4459_v52  ;;  %v1002_v29 = vsel %vm995_vm4, %v998_v25, %v1001_v26  ;;  %vm1144_vm5 = vcmask 1042432   ;;  %v1005_v35 = vor.u32 %v1004_v31, %v1003_v30  ;;  %v1501_v38 = vsel %vm743_vm0, %v3483_v36, 0 }
  0x50   : > { %3744 = vmatprep.mubr.msk.bf16.mxu0 %vm4249_vm1, %v4248_v45  ;;  %v1147_v37 = vsel %vm1144_vm5, %v1145_v33, %v1146_v34  ;;  %v1007_v40 = vrot.slane %v857_v11, 4  ;;  %v1008_v41 = vrot.slane %v853_v6, 5  ;;  %v1148_v42 = vrot.slane %v4469_v56, 5 }
  0x51   : > { %v1006_v39 = vsel %vm995_vm4, %v1001_v26, %v1005_v35  ;;  %v1011_v47 = vrot.slane %v864_v19, 4  ;;  %v1012_v48 = vrot.slane %v860_v12, 5  ;;  %v1150_v49 = vrot.slane %v4483_v3, 5 }
  0x52   : > { %v1009_v43 = vor.u32 %v1008_v41, %v1007_v40  ;;  %v1149_v44 = vsel %vm1144_vm5, %v1146_v34, %v1148_v42  ;;  %v1015_v51 = vshrl.u32 %v4512_v15, 16  ;;  %v1018_v55 = vrot.slane %v868_v20, 5  ;;  %v3519_v40 = vld [vmem:[%s5245_s2 + $0x8] sm:$0x3] }
  0x53   : > { %v1013_v50 = vor.u32 %v1012_v48, %v1011_v47  ;;  %v1151_v52 = vsel %vm1144_vm5, %v1148_v42, %v1150_v49  ;;  %v1154_v61 = vrot.slane %v4512_v15, 5  ;;  %v1448_v63 = vshll.u32 %v4576_v59, 16 }
  0x54   : > { %3763 = vmatmul.mubr.msk.bf16.gmra.mxu1 %vm727_vm2, %v849_v4  ;;  %v1010_v46 = vsel %vm995_vm4, %v1005_v35, %v1009_v43  ;;  %v1017_v54 = vrot.slane %v1015_v51, 4  ;;  %v1446_v2 = vshrl.u32 %v4576_v59, 16  ;;  %v1452_v4 = vshll.u32 %v4585_v62, 16 }
  0x55   : > { %3766 = vmatprep.mubr.msk.bf16.mxu1 %vm4249_vm1, %v4248_v45  ;;  %v1014_v53 = vsel %vm995_vm4, %v1009_v43, %v1013_v50  ;;  %v1649_v5 = vsel %vm743_vm0, %v3489_v0, 0  ;;  %v1456_v11 = vshrl.u32 %v4585_v62, 16  ;;  %v1459_v12 = vshll.u32 %v4603_v8, 16 }
  0x56   : > { %v1019_v57 = vor.u32 %v1018_v55, %v1017_v54  ;;  %v1454_v7 = vrot.slane %v1452_v4, 1  ;;  %v1466_v19 = vshll.u32 %v4619_v16, 16  ;;  %v1470_v24 = vshrl.u32 %v4619_v16, 16 }
  0x57   : > { %3745 = vmatmul.mubr.msk.bf16.gmra.mxu0 %vm727_vm2, %v4469_v56  ;;  %v1152_v56 = vrot.slane %v4499_v9, 5  ;;  %v1461_v15 = vrot.slane %v1459_v12, 1  ;;  %v1473_v25 = vshll.u32 %v4635_v22, 16  ;;  %v1477_v30 = vshrl.u32 %v4635_v22, 16 }
  0x58   : > { %3748 = vmatprep.mubr.msk.bf16.mxu0 %vm4249_vm1, %v4248_v45  ;;  %v1020_v60 = vsel %vm995_vm4, %v1013_v50, %v1019_v57  ;;  %v1458_v14 = vor.u32 %v1456_v11, %v1454_v7  ;;  %v1468_v21 = vrot.slane %v1466_v19, 1  ;;  %v1608_v33 = vrot.slane %v1446_v2, 4  ;;  %v3525_v50 = vld [vmem:[%s5245_s2 + $0xc] sm:$0x3] }
  0x59   : > { %v1153_v58 = vsel %vm1144_vm5, %v1150_v49, %v1152_v56  ;;  %v1155_v1 = vsel %vm1144_vm5, %v1152_v56, %v1154_v61  ;;  %v1475_v27 = vrot.slane %v1473_v25, 1  ;;  %v1609_v34 = vrot.slane %v1448_v63, 5 }
  0x5a   : > { %v1462_v17 = vsel %vm832_vm3, %v1458_v14, %v1461_v15  ;;  %v1472_v26 = vor.u32 %v1470_v24, %v1468_v21  ;;  %v1612_v35 = vrot.slane %v1452_v4, 5  ;;  %v1756_v47 = vrot.slane %v4576_v59, 5 }
  0x5b   : > { %v1479_v36 = vor.u32 %v1477_v30, %v1475_v27  ;;  %v1757_v48 = vrot.slane %v4585_v62, 5  ;;  %v1619_v54 = vrot.slane %v1470_v24, 4  ;;  %v1620_v55 = vrot.slane %v1466_v19, 5 }
  0x5c   : > { %3767 = vmatmul.mubr.msk.bf16.gmra.mxu1 %vm727_vm2, %v856_v10  ;;  %v1759_v56 = vrot.slane %v4603_v8, 5  ;;  %v1624_v61 = vrot.slane %v1473_v25, 5 }
  0x5d   : > { %3770 = vmatprep.mubr.msk.bf16.mxu1 %vm4249_vm1, %v4248_v45  ;;  %v1758_v51 = vsel %vm1144_vm5, %v1756_v47, %v1757_v48  ;;  %v1621_v57 = vor.u32 %v1620_v55, %v1619_v54 }
  0x5f   : > { %3749 = vmatmul.mubr.msk.bf16.gmra.mxu0 %vm727_vm2, %v4483_v3  ;;  %v1450_v3 = vrot.slane %v1448_v63, 1 }
  0x60   : > { %3752 = vmatprep.mubr.msk.bf16.mxu0 %vm4249_vm1, %v4248_v45 }
  0x61   : > { %v1451_v6 = vor.u32 %v1450_v3, %v1446_v2 }
  0x63   : > { %v1455_v10 = vsel %vm832_vm3, %v1451_v6, %v1454_v7 }
  0x64   : > { %3771 = vmatmul.mubr.msk.bf16.gmra.mxu1 %vm727_vm2, %v863_v18  ;;  %v1463_v18 = vshrl.u32 %v4603_v8, 16 }
  0x65   : > { %3774 = vmatprep.mubr.msk.bf16.mxu1 %vm4249_vm1, %v4248_v45 }
  0x66   : > { %v1465_v20 = vor.u32 %v1463_v18, %v1461_v15  ;;  %v1615_v43 = vrot.slane %v1463_v18, 4 }
  0x67   : > { %3753 = vmatmul.mubr.msk.bf16.gmra.mxu0 %vm727_vm2, %v4499_v9  ;;  %v3495_v9 = vld [vmem:[%s5245_s2 + $0x16] sm:$0x3] }
  0x68   : > { %3780 = vmatprep.mubr.msk.bf16.mxu0 %vm4249_vm1, %v4248_v45  ;;  %v1783_v13 = vsel %vm743_vm0, %v3495_v9, 0  ;;  %v1469_v23 = vsel %vm832_vm3, %v1465_v20, %v1468_v21  ;;  %v4739_v21 = vld [vmem:[%s4449_s9 + $0x60] sm:$0xff]  }
  0x69   : > { %v2070_v25 = vshll.u32 %v4739_v21, 16 }
  0x6c   : > { %3775 = vmatmul.mubr.msk.bf16.gmra.mxu1 %vm727_vm2, %v871_v28  ;;  %v4648_v28 = vld [vmem:[%s4447_s8 + $0x8] sm:$0xff]  }
  0x6d   : > { %3802 = vmatprep.mubr.msk.bf16.mxu1 %vm4249_vm1, %v4248_v45  ;;  %v1481_v31 = vshll.u32 %v4648_v28, 16  ;;  %v1627_v0 = vshrl.u32 %v4648_v28, 16 }
  0x6f   : > { %3781 = vmatmul.mubr.msk.bf16.vlgmr.msra.gmra.mxu0 %vm727_vm2, %v1002_v29  ;;  %v1476_v29 = vsel %vm832_vm3, %v1472_v26, %v1475_v27  ;;  %v1629_v3 = vrot.slane %v1627_v0, 4  ;;  %v1630_v4 = vrot.slane %v1481_v31, 5 }
  0x70   : > { %3823 = vmatpush3.bf16.msra.mxu0 %v1339_v32  ;;  %3784 = vmatprep.mubr.msk.bf16.mxu0 %vm4249_vm1, %v4248_v45  ;;  %v1611_v32 = vrot.slane %v1456_v11, 4  ;;  %v4721_v11 = vld [vmem:[%s4449_s9 + $0x58] sm:$0xff]  }
  0x71   : > { %3866 = vmatprep.subr.bf16.mxu0 %v4248_v45  ;;  %v1631_v6 = vor.u32 %v1630_v4, %v1629_v3  ;;  %v2067_v24 = vshrl.u32 %v4721_v11, 16  ;;  %v2368_v4 = vrot.slane %v4721_v11, 5 }
  0x74   : > { %3803 = vmatmul.mubr.msk.bf16.vlgmr.msra.gmra.mxu1 %vm727_vm2, %v1147_v37  ;;  %v1483_v37 = vrot.slane %v1481_v31, 1  ;;  %v2074_v31 = vshrl.u32 %v4739_v21, 16 }
  0x75   : > { %3845 = vmatpush3.bf16.msra.mxu1 %v1501_v38  ;;  %3806 = vmatprep.mubr.msk.bf16.mxu1 %vm4249_vm1, %v4248_v45  ;;  %v1610_v38 = vor.u32 %v1609_v34, %v1608_v33 }
  0x76   : > { %3888 = vmatprep.subr.bf16.mxu1 %v4248_v45  ;;  %v1484_v41 = vsel %vm832_vm3, %v1479_v36, %v1483_v37 }
  0x77   : > { %3785 = vmatmul.mubr.msk.bf16.gmra.mxu0 %vm727_vm2, %v1006_v39  ;;  %v1613_v39 = vor.u32 %v1612_v35, %v1611_v32  ;;  %v4773_v35 = vld [vmem:[%s4449_s9 + $0x70] sm:$0xff]  }
  0x78   : > { %3788 = vmatprep.mubr.msk.bf16.mxu0 %vm4249_vm1, %v4248_v45 }
  0x79   : > { %v1614_v42 = vsel %vm995_vm4, %v1610_v38, %v1613_v39  ;;  %v2084_v38 = vshll.u32 %v4773_v35, 16 }
  0x7c   : > { %3807 = vmatmul.mubr.msk.bf16.gmra.mxu1 %vm727_vm2, %v1149_v44  ;;  %v1616_v44 = vrot.slane %v1459_v12, 5 }
  0x7d   : > { %3810 = vmatprep.mubr.msk.bf16.mxu1 %vm4249_vm1, %v4248_v45 }
  0x7e   : > { %v1617_v49 = vor.u32 %v1616_v44, %v1615_v43  ;;  %v2088_v43 = vshrl.u32 %v4773_v35, 16 }
  0x7f   : > { %3789 = vmatmul.mubr.msk.bf16.gmra.mxu0 %vm727_vm2, %v1010_v46  ;;  %v1950_v46 = vsel %vm743_vm0, %v3519_v40, 0  ;;  %v2086_v40 = vrot.slane %v2084_v38, 1 }
  0x80   : > { %3792 = vmatprep.mubr.msk.bf16.mxu0 %vm4249_vm1, %v4248_v45 }
  0x84   : > { %3811 = vmatmul.mubr.msk.bf16.gmra.mxu1 %vm727_vm2, %v1151_v52  ;;  %v2112_v52 = vsel %vm743_vm0, %v3525_v50, 0 }
  0x85   : > { %3814 = vmatprep.mubr.msk.bf16.mxu1 %vm4249_vm1, %v4248_v45 }
  0x87   : > { %3793 = vmatmul.mubr.msk.bf16.gmra.mxu0 %vm727_vm2, %v1014_v53  ;;  %v1618_v53 = vsel %vm995_vm4, %v1613_v39, %v1617_v49 }
  0x88   : > { %3796 = vmatprep.mubr.msk.bf16.mxu0 %vm4249_vm1, %v4248_v45 }
  0x8c   : > { %3815 = vmatmul.mubr.msk.bf16.gmra.mxu1 %vm727_vm2, %v1153_v58  ;;  %v1760_v58 = vsel %vm1144_vm5, %v1757_v48, %v1759_v56 }
  0x8d   : > { %3818 = vmatprep.mubr.msk.bf16.mxu1 %vm4249_vm1, %v4248_v45 }
  0x8f   : > { %3797 = vmatmul.mubr.msk.bf16.gmra.mxu0 %vm727_vm2, %v1020_v60  ;;  %v1623_v60 = vrot.slane %v1477_v30, 4 }
  0x90   : > { %3824 = vmatprep.mubr.msk.bf16.mxu0 %vm4249_vm1, %v4248_v45 }
  0x91   : > { %v1625_v63 = vor.u32 %v1624_v61, %v1623_v60  ;;  %v2226_v60 = vrot.slane %v2074_v31, 4  ;;  %v2227_v61 = vrot.slane %v2070_v25, 5 }
  0x93   : > { %v1626_v2 = vsel %vm995_vm4, %v1621_v57, %v1625_v63  ;;  %v1632_v9 = vsel %vm995_vm4, %v1625_v63, %v1631_v6  ;;  %v2228_v6 = vor.u32 %v2227_v61, %v2226_v60 }
  0x94   : > { %3819 = vmatmul.mubr.msk.bf16.gmra.mxu1 %vm727_vm2, %v1155_v1 }
  0x95   : > { %3846 = vmatprep.mubr.msk.bf16.mxu1 %vm4249_vm1, %v4248_v45 }
  0x97   : > { %3825 = vmatmul.mubr.msk.bf16.vlgmr.msra.gmra.mxu0 %vm727_vm2, %v4576_v59  ;;  %v1622_v59 = vsel %vm995_vm4, %v1617_v49, %v1621_v57 }
  0x98   : > { %3867 = vmatpush3.bf16.msra.mxu0 %v1649_v5  ;;  %3828 = vmatprep.mubr.msk.bf16.mxu0 %vm4249_vm1, %v4248_v45  ;;  %v1763_v5 = vrot.slane %v4635_v22, 5 }
  0x99   : > { %3910 = vmatprep.subr.bf16.mxu0 %v4248_v45 }
  0x9c   : > { %3847 = vmatmul.mubr.msk.bf16.vlgmr.msra.gmra.mxu1 %vm727_vm2, %v1455_v10  ;;  %v1765_v10 = vrot.slane %v4648_v28, 5  ;;  %v2072_v28 = vrot.slane %v2070_v25, 1 }
  0x9d   : > { %3889 = vmatpush3.bf16.msra.mxu1 %v1783_v13  ;;  %3850 = vmatprep.mubr.msk.bf16.mxu1 %vm4249_vm1, %v4248_v45  ;;  %v3531_v13 = vld [vmem:[%s5245_s2 + $0x18] sm:$0x3] }
  0x9e   : > { %3932 = vmatprep.subr.bf16.mxu1 %v4248_v45  ;;  %v1766_v14 = vsel %vm1144_vm5, %v1763_v5, %v1765_v10  ;;  %v2260_v18 = vsel %vm743_vm0, %v3531_v13, 0  ;;  %v2076_v33 = vor.u32 %v2074_v31, %v2072_v28 }
  0x9f   : > { %3829 = vmatmul.mubr.msk.bf16.gmra.mxu0 %vm727_vm2, %v4585_v62  ;;  %v1761_v62 = vrot.slane %v4619_v16, 5 }
  0xa0   : > { %3832 = vmatprep.mubr.msk.bf16.mxu0 %vm4249_vm1, %v4248_v45 }
  0xa1   : > { %v1762_v1 = vsel %vm1144_vm5, %v1759_v56, %v1761_v62  ;;  %v1764_v7 = vsel %vm1144_vm5, %v1761_v62, %v1763_v5  ;;  %v3561_v56 = vld [vmem:[%s5245_s2 + $0xa] sm:$0x3] }
  0xa2   : > { %v2561_v63 = vsel %vm743_vm0, %v3561_v56, 0 }
  0xa4   : > { %3851 = vmatmul.mubr.msk.bf16.gmra.mxu1 %vm727_vm2, %v1462_v17  ;;  %v2063_v17 = vshll.u32 %v4721_v11, 16 }
  0xa5   : > { %3854 = vmatprep.mubr.msk.bf16.mxu1 %vm4249_vm1, %v4248_v45 }
  0xa6   : > { %v2065_v20 = vrot.slane %v2063_v17, 1  ;;  %v2223_v49 = vrot.slane %v2063_v17, 5 }
  0xa7   : > { %3833 = vmatmul.mubr.msk.bf16.gmra.mxu0 %vm727_vm2, %v4603_v8  ;;  %v4712_v8 = vld [vmem:[%s4449_s9 + $0x50] sm:$0xff]  }
  0xa8   : > { %3836 = vmatprep.mubr.msk.bf16.mxu0 %vm4249_vm1, %v4248_v45  ;;  %v2059_v12 = vshll.u32 %v4712_v8, 16  ;;  %v2057_v15 = vshrl.u32 %v4712_v8, 16  ;;  %v2069_v27 = vor.u32 %v2067_v24, %v2065_v20  ;;  %v2367_v3 = vrot.slane %v4712_v8, 5 }
  0xaa   : > { %v2073_v30 = vsel %vm832_vm3, %v2069_v27, %v2072_v28  ;;  %v2219_v47 = vrot.slane %v2057_v15, 4  ;;  %v2220_v48 = vrot.slane %v2059_v12, 5 }
  0xac   : > { %3855 = vmatmul.mubr.msk.bf16.gmra.mxu1 %vm727_vm2, %v1469_v23 }
  0xad   : > { %3858 = vmatprep.mubr.msk.bf16.mxu1 %vm4249_vm1, %v4248_v45 }
  0xaf   : > { %3837 = vmatmul.mubr.msk.bf16.gmra.mxu0 %vm727_vm2, %v4619_v16  ;;  %v2061_v16 = vrot.slane %v2059_v12, 1 }
  0xb0   : > { %3840 = vmatprep.mubr.msk.bf16.mxu0 %vm4249_vm1, %v4248_v45 }
  0xb1   : > { %v2062_v19 = vor.u32 %v2061_v16, %v2057_v15 }
  0xb3   : > { %v2066_v23 = vsel %vm832_vm3, %v2062_v19, %v2065_v20 }
  0xb4   : > { %3859 = vmatmul.mubr.msk.bf16.gmra.mxu1 %vm727_vm2, %v1476_v29  ;;  %v4755_v29 = vld [vmem:[%s4449_s9 + $0x68] sm:$0xff]  }
  0xb5   : > { %3862 = vmatprep.mubr.msk.bf16.mxu1 %vm4249_vm1, %v4248_v45  ;;  %v2077_v32 = vshll.u32 %v4755_v29, 16  ;;  %v2081_v37 = vshrl.u32 %v4755_v29, 16 }
  0xb7   : > { %3841 = vmatmul.mubr.msk.bf16.gmra.mxu0 %vm727_vm2, %v4635_v22  ;;  %v3537_v22 = vld [vmem:[%s5245_s2 + $0x1c] sm:$0x3]  ;;  %v2079_v34 = vrot.slane %v2077_v32, 1  ;;  %v2230_v16 = vrot.slane %v2081_v37, 4  ;;  %v2231_v17 = vrot.slane %v2077_v32, 5  ;;  %v2234_v32 = vrot.slane %v2088_v43, 4 }
  0xb8   : > { %3868 = vmatprep.mubr.msk.bf16.mxu0 %vm4249_vm1, %v4248_v45  ;;  %v2394_v26 = vsel %vm743_vm0, %v3537_v22, 0 }
  0xb9   : > { %v2080_v36 = vsel %vm832_vm3, %v2076_v33, %v2079_v34  ;;  %v2083_v39 = vor.u32 %v2081_v37, %v2079_v34  ;;  %v2232_v25 = vor.u32 %v2231_v17, %v2230_v16  ;;  %v3573_v17 = vld [vmem:[%s5245_s2 + $0x1a] sm:$0x3] }
  0xbb   : > { %v2233_v34 = vsel %vm995_vm4, %v2228_v6, %v2232_v25 }
  0xbc   : > { %3863 = vmatmul.mubr.msk.bf16.gmra.mxu1 %vm727_vm2, %v1484_v41  ;;  %v4788_v41 = vld [vmem:[%s4447_s8 + $0x10] sm:$0xff]  }
  0xbd   : > { %3890 = vmatprep.mubr.msk.bf16.mxu1 %vm4249_vm1, %v4248_v45  ;;  %v2092_v44 = vshll.u32 %v4788_v41, 16 }
  0xbf   : > { %3869 = vmatmul.mubr.msk.bf16.vlgmr.msra.gmra.mxu0 %vm727_vm2, %v1614_v42  ;;  %v2087_v42 = vsel %vm832_vm3, %v2083_v39, %v2086_v40 }
  0xc0   : > { %3911 = vmatpush3.bf16.msra.mxu0 %v1950_v46  ;;  %3872 = vmatprep.mubr.msk.bf16.mxu0 %vm4249_vm1, %v4248_v45  ;;  %v2222_v46 = vrot.slane %v2067_v24, 4 }
  0xc1   : > { %3954 = vmatprep.subr.bf16.mxu0 %v4248_v45 }
  0xc2   : > { %v2224_v54 = vor.u32 %v2223_v49, %v2222_v46  ;;  %v2238_v46 = vshrl.u32 %v4788_v41, 16 }
  0xc4   : > { %3891 = vmatmul.mubr.msk.bf16.vlgmr.msra.gmra.mxu1 %vm727_vm2, %v1758_v51  ;;  %v2090_v51 = vor.u32 %v2088_v43, %v2086_v40  ;;  %v2229_v15 = vsel %vm995_vm4, %v2224_v54, %v2228_v6 }
  0xc5   : > { %3933 = vmatpush3.bf16.msra.mxu1 %v2112_v52  ;;  %3894 = vmatprep.mubr.msk.bf16.mxu1 %vm4249_vm1, %v4248_v45  ;;  %v2094_v52 = vrot.slane %v2092_v44, 1 }
  0xc6   : > { %3976 = vmatprep.subr.bf16.mxu1 %v4248_v45 }
  0xc7   : > { %3873 = vmatmul.mubr.msk.bf16.gmra.mxu0 %vm727_vm2, %v1618_v53  ;;  %v2221_v53 = vor.u32 %v2220_v48, %v2219_v47 }
  0xc8   : > { %3876 = vmatprep.mubr.msk.bf16.mxu0 %vm4249_vm1, %v4248_v45 }
  0xcc   : > { %3895 = vmatmul.mubr.msk.bf16.gmra.mxu1 %vm727_vm2, %v1760_v58  ;;  %v2095_v58 = vsel %vm832_vm3, %v2090_v51, %v2094_v52  ;;  %v2241_v52 = vrot.slane %v2092_v44, 5 }
  0xcd   : > { %3898 = vmatprep.mubr.msk.bf16.mxu1 %vm4249_vm1, %v4248_v45 }
  0xcf   : > { %3877 = vmatmul.mubr.msk.bf16.gmra.mxu0 %vm727_vm2, %v1622_v59  ;;  %v2225_v59 = vsel %vm995_vm4, %v2221_v53, %v2224_v54  ;;  %v2240_v54 = vrot.slane %v2238_v46, 4 }
  0xd0   : > { %3880 = vmatprep.mubr.msk.bf16.mxu0 %vm4249_vm1, %v4248_v45 }
  0xd1   : > { %v2242_v60 = vor.u32 %v2241_v52, %v2240_v54 }
  0xd4   : > { %3899 = vmatmul.mubr.msk.bf16.gmra.mxu1 %vm727_vm2, %v1762_v1 }
  0xd5   : > { %3902 = vmatprep.mubr.msk.bf16.mxu1 %vm4249_vm1, %v4248_v45 }
  0xd7   : > { %3881 = vmatmul.mubr.msk.bf16.gmra.mxu0 %vm727_vm2, %v1626_v2 }
  0xd8   : > { %3884 = vmatprep.mubr.msk.bf16.mxu0 %vm4249_vm1, %v4248_v45 }
  0xdc   : > { %3903 = vmatmul.mubr.msk.bf16.gmra.mxu1 %vm727_vm2, %v1764_v7 }
  0xdd   : > { %3906 = vmatprep.mubr.msk.bf16.mxu1 %vm4249_vm1, %v4248_v45 }
  0xdf   : > { %3885 = vmatmul.mubr.msk.bf16.gmra.mxu0 %vm727_vm2, %v1632_v9  ;;  %v3567_v9 = vld [vmem:[%s5245_s2 + $0xe] sm:$0x3] }
  0xe0   : > { %3912 = vmatprep.mubr.msk.bf16.mxu0 %vm4249_vm1, %v4248_v45 }
  0xe4   : > { %3907 = vmatmul.mubr.msk.bf16.gmra.mxu1 %vm727_vm2, %v1766_v14  ;;  %v2723_v14 = vsel %vm743_vm0, %v3567_v9, 0 }
  0xe5   : > { %3934 = vmatprep.mubr.msk.bf16.mxu1 %vm4249_vm1, %v4248_v45 }
  0xe7   : > { %3913 = vmatmul.mubr.msk.bf16.vlgmr.msra.gmra.mxu0 %vm727_vm2, %v4712_v8  ;;  %v2369_v8 = vsel %vm1144_vm5, %v2367_v3, %v2368_v4  ;;  %v4880_v3 = vld [vmem:[%s4449_s9 + $0x78] sm:$0xff]  }
  0xe8   : > { %3955 = vmatpush3.bf16.msra.mxu0 %v2260_v18  ;;  %3916 = vmatprep.mubr.msk.bf16.mxu0 %vm4249_vm1, %v4248_v45 }
  0xe9   : > { %3998 = vmatprep.subr.bf16.mxu0 %v4248_v45 }
  0xec   : > { %3935 = vmatmul.mubr.msk.bf16.vlgmr.msra.gmra.mxu1 %vm727_vm2, %v2066_v23  ;;  %v2370_v23 = vrot.slane %v4739_v21, 5 }
  0xed   : > { %3977 = vmatpush3.bf16.msra.mxu1 %v2394_v26  ;;  %3938 = vmatprep.mubr.msk.bf16.mxu1 %vm4249_vm1, %v4248_v45 }
  0xee   : > { %4020 = vmatprep.subr.bf16.mxu1 %v4248_v45  ;;  %v2371_v31 = vsel %vm1144_vm5, %v2368_v4, %v2370_v23 }
  0xef   : > { %3917 = vmatmul.mubr.msk.bf16.gmra.mxu0 %vm727_vm2, %v4721_v11 }
  0xf0   : > { %3920 = vmatprep.mubr.msk.bf16.mxu0 %vm4249_vm1, %v4248_v45 }
  0xf4   : > { %3939 = vmatmul.mubr.msk.bf16.gmra.mxu1 %vm727_vm2, %v2073_v30 }
  0xf5   : > { %3942 = vmatprep.mubr.msk.bf16.mxu1 %vm4249_vm1, %v4248_v45 }
  0xf7   : > { %3921 = vmatmul.mubr.msk.bf16.gmra.mxu0 %vm727_vm2, %v4739_v21  ;;  %v2235_v21 = vrot.slane %v2084_v38, 5  ;;  %v2372_v38 = vrot.slane %v4755_v29, 5 }
  0xf8   : > { %3924 = vmatprep.mubr.msk.bf16.mxu0 %vm4249_vm1, %v4248_v45 }
  0xf9   : > { %v2236_v43 = vor.u32 %v2235_v21, %v2234_v32  ;;  %v2373_v51 = vsel %vm1144_vm5, %v2370_v23, %v2372_v38 }
  0xfc   : > { %3943 = vmatmul.mubr.msk.bf16.gmra.mxu1 %vm727_vm2, %v2080_v36 }
  0xfd   : > { %3946 = vmatprep.mubr.msk.bf16.mxu1 %vm4249_vm1, %v4248_v45 }
  0xff   : > { %3925 = vmatmul.mubr.msk.bf16.gmra.mxu0 %vm727_vm2, %v4755_v29  ;;  %v2237_v29 = vsel %vm995_vm4, %v2232_v25, %v2236_v43 }
 0x100   : > { %3928 = vmatprep.mubr.msk.bf16.mxu0 %vm4249_vm1, %v4248_v45 }
 0x104   : > { %3947 = vmatmul.mubr.msk.bf16.gmra.mxu1 %vm727_vm2, %v2087_v42 }
 0x105   : > { %3950 = vmatprep.mubr.msk.bf16.mxu1 %vm4249_vm1, %v4248_v45 }
 0x107   : > { %v781_v50 = vpop.f32.mrf.mxu0  ;;  %3929 = vmatmul.mubr.msk.bf16.gmra.mxu0 %vm727_vm2, %v4773_v35 }
 0x108   : > { %3956 = vmatprep.mubr.msk.bf16.mxu0 %vm4249_vm1, %v4248_v45 }
 0x109   : > { %v3738_v55 = vpop.f32.mrf.mxu0 }
 0x10b   : > { %v784_v57 = vpop.f32.mrf.mxu0 }
 0x10c   : > { %v924_v0 = vpop.f32.mrf.mxu1  ;;  %3951 = vmatmul.mubr.msk.bf16.gmra.mxu1 %vm727_vm2, %v2095_v58 }
 0x10d   : > { %v3739_v62 = vpop.f32.mrf.mxu0  ;;  %v4813_v1 = vadd.f32 %v924_v0, %v781_v50  ;;  %3978 = vmatprep.mubr.msk.bf16.mxu1 %vm4249_vm1, %v4248_v45 }
 0x10e   : > { %v3760_v5 = vpop.f32.mrf.mxu1 }
 0x10f   : > { %v789_v2 = vpop.f32.mrf.mxu0  ;;  %3957 = vmatmul.mubr.msk.bf16.vlgmr.msra.gmra.mxu0 %vm727_vm2, %v2225_v59  ;;  %v2374_v59 = vrot.slane %v4773_v35, 5  ;;  %v2243_v5 = vsel %vm995_vm4, %v2236_v43, %v2242_v60 }
 0x110   : > { %3999 = vmatpush3.bf16.msra.mxu0 %v2561_v63  ;;  %3960 = vmatprep.mubr.msk.bf16.mxu0 %vm4249_vm1, %v4248_v45  ;;  %v927_v10 = vpop.f32.mrf.mxu1 }
 0x111   : > { %v3742_v7 = vpop.f32.mrf.mxu0  ;;  %4042 = vmatprep.subr.bf16.mxu0 %v4248_v45  ;;  %v4826_v12 = vadd.f32 %v927_v10, %v784_v57 }
 0x112   : > { %v3761_v11 = vpop.f32.mrf.mxu1  ;;  %v2376_v7 = vrot.slane %v4788_v41, 5 }
 0x113   : > { %v792_v13 = vpop.f32.mrf.mxu0 }
 0x114   : > { %v932_v19 = vpop.f32.mrf.mxu1  ;;  %3979 = vmatmul.mubr.msk.bf16.vlgmr.msra.gmra.mxu1 %vm727_vm2, %v2369_v8  ;;  %v2670_v8 = vshll.u32 %v4880_v3, 16  ;;  %v2377_v16 = vsel %vm1144_vm5, %v2374_v59, %v2376_v7 }
 0x115   : > { %v3743_v18 = vpop.f32.mrf.mxu0  ;;  %v4834_v20 = vadd.f32 %v932_v19, %v789_v2  ;;  %4021 = vmatpush3.bf16.msra.mxu1 %v2723_v14  ;;  %3982 = vmatprep.mubr.msk.bf16.mxu1 %vm4249_vm1, %v4248_v45  ;;  %v2375_v2 = vsel %vm1144_vm5, %v2372_v38, %v2374_v59 }
 0x116   : > { %v3764_v24 = vpop.f32.mrf.mxu1  ;;  %4064 = vmatprep.subr.bf16.mxu1 %v4248_v45 }
 0x117   : > { %v797_v22 = vpop.f32.mrf.mxu0  ;;  %3961 = vmatmul.mubr.msk.bf16.gmra.mxu0 %vm727_vm2, %v2229_v15 }
 0x118   : > { %3964 = vmatprep.mubr.msk.bf16.mxu0 %vm4249_vm1, %v4248_v45  ;;  %v935_v27 = vpop.f32.mrf.mxu1 }
 0x119   : > { %v3746_v26 = vpop.f32.mrf.mxu0  ;;  %v4843_v28 = vadd.f32 %v935_v27, %v792_v13  ;;  %v4891_v13 = vld [vmem:[%s4449_s9 + $0x80] sm:$0xff]   ;;  %v2871_v27 = vsel %vm743_vm0, %v3573_v17, 0 }
 0x11a   : > { %v3765_v33 = vpop.f32.mrf.mxu1  ;;  %v2674_v23 = vshll.u32 %v4891_v13, 16 }
 0x11b   : > { %v800_v30 = vpop.f32.mrf.mxu0  ;;  %v4921_v33 = vld [vmem:[%s4449_s9 + $0x88] sm:$0xff]  }
 0x11c   : > { %v940_v37 = vpop.f32.mrf.mxu1  ;;  %3983 = vmatmul.mubr.msk.bf16.gmra.mxu1 %vm727_vm2, %v2371_v31 }
 0x11d   : > { %v3747_v36 = vpop.f32.mrf.mxu0  ;;  %v4852_v39 = vadd.f32 %v940_v37, %v797_v22  ;;  %3986 = vmatprep.mubr.msk.bf16.mxu1 %vm4249_vm1, %v4248_v45  ;;  %v2668_v22 = vshrl.u32 %v4880_v3, 16 }
 0x11e   : > { %v3768_v42 = vpop.f32.mrf.mxu1 }
 0x11f   : > { %v805_v40 = vpop.f32.mrf.mxu0  ;;  %3965 = vmatmul.mubr.msk.bf16.gmra.mxu0 %vm727_vm2, %v2233_v34 }
 0x120   : > { %3968 = vmatprep.mubr.msk.bf16.mxu0 %vm4249_vm1, %v4248_v45  ;;  %v943_v48 = vpop.f32.mrf.mxu1 }
 0x121   : > { %v3750_v47 = vpop.f32.mrf.mxu0  ;;  %v4861_v49 = vadd.f32 %v943_v48, %v800_v30 }
 0x122   : > { %v3769_v53 = vpop.f32.mrf.mxu1  ;;  %v2678_v47 = vshrl.u32 %v4891_v13, 16 }
 0x123   : > { %v808_v50 = vpop.f32.mrf.mxu0 }
 0x124   : > { %v948_v56 = vpop.f32.mrf.mxu1  ;;  %3987 = vmatmul.mubr.msk.bf16.gmra.mxu1 %vm727_vm2, %v2373_v51 }
 0x125   : > { %v3751_v55 = vpop.f32.mrf.mxu0  ;;  %v4868_v57 = vadd.f32 %v948_v56, %v805_v40  ;;  %3990 = vmatprep.mubr.msk.bf16.mxu1 %vm4249_vm1, %v4248_v45  ;;  %v3579_v40 = vld [vmem:[%s5245_s2 + $0x1e] sm:$0x3]  ;;  %v4946_v56 = vld [vmem:[%s4449_s9 + $0x90] sm:$0xff]  }
 0x126   : > { %v3772_v44 = vpop.f32.mrf.mxu1  ;;  %v3005_v51 = vsel %vm743_vm0, %v3579_v40, 0 }
 0x127   : > { %v813_v58 = vpop.f32.mrf.mxu0  ;;  %3969 = vmatmul.mubr.msk.bf16.gmra.mxu0 %vm727_vm2, %v2237_v29 }
 0x128   : > { %3972 = vmatprep.mubr.msk.bf16.mxu0 %vm4249_vm1, %v4248_v45  ;;  %v951_v62 = vpop.f32.mrf.mxu1 }
 0x129   : > { %v3754_v61 = vpop.f32.mrf.mxu0  ;;  %v4876_v63 = vadd.f32 %v951_v62, %v808_v50 }
 0x12a   : > { %v3773_v4 = vpop.f32.mrf.mxu1 }
 0x12b   : > { %v816_v0 = vpop.f32.mrf.mxu0  ;;  %v2688_v4 = vshll.u32 %v4946_v56, 16 }
 0x12c   : > { %v956_v35 = vpop.f32.mrf.mxu1  ;;  %3991 = vmatmul.mubr.msk.bf16.gmra.mxu1 %vm727_vm2, %v2375_v2  ;;  %v2685_v2 = vshrl.u32 %v4921_v33, 16 }
 0x12d   : > { %v3755_v6 = vpop.f32.mrf.mxu0  ;;  %v4885_v9 = vadd.f32 %v956_v35, %v813_v58  ;;  %3994 = vmatprep.mubr.msk.bf16.mxu1 %vm4249_vm1, %v4248_v45 }
 0x12e   : > { %v3776_v14 = vpop.f32.mrf.mxu1 }
 0x12f   : > { %v1073_v10 = vpop.f32.mrf.mxu0  ;;  %3973 = vmatmul.mubr.msk.bf16.gmra.mxu0 %vm727_vm2, %v2243_v5  ;;  %v4971_v14 = vld [vmem:[%s4449_s9 + $0x98] sm:$0xff]  }
 0x130   : > { %v1122_v11 = vadd.f32 %v1073_v10, %v4813_v1  ;;  %4000 = vmatprep.mubr.msk.bf16.mxu0 %vm4249_vm1, %v4248_v45  ;;  %v959_v41 = vpop.f32.mrf.mxu1  ;;  %v2672_v1 = vrot.slane %v2670_v8, 1 }
 0x131   : > { %v3782_v15 = vpop.f32.mrf.mxu0  ;;  %v4901_v18 = vadd.f32 %v959_v41, %v816_v0 }
 0x132   : > { %v3777_v25 = vpop.f32.mrf.mxu1  ;;  %v2673_v32 = vor.u32 %v2672_v1, %v2668_v22 }
 0x133   : > { %v1076_v19 = vpop.f32.mrf.mxu0  ;;  %v2692_v25 = vshrl.u32 %v4946_v56, 16 }
 0x134   : > { %v1123_v24 = vadd.f32 %v1076_v19, %v4826_v12  ;;  %v1208_v30 = vpop.f32.mrf.mxu1  ;;  %3995 = vmatmul.mubr.msk.bf16.gmra.mxu1 %vm727_vm2, %v2377_v16  ;;  %v2676_v12 = vrot.slane %v2674_v23, 1 }
 0x135   : > { %v3783_v26 = vpop.f32.mrf.mxu0  ;;  %v4910_v31 = vadd.f32 %v1208_v30, %v1122_v11  ;;  %4022 = vmatprep.mubr.msk.bf16.mxu1 %vm4249_vm1, %v4248_v45 }
 0x136   : > { %v3804_v36 = vpop.f32.mrf.mxu1  ;;  %v2677_v46 = vsel %vm832_vm3, %v2673_v32, %v2676_v12  ;;  %v2680_v55 = vor.u32 %v2678_v47, %v2676_v12  ;;  %v2695_v26 = vshll.u32 %v4971_v14, 16 }
 0x137   : > { %v1081_v21 = vpop.f32.mrf.mxu0  ;;  %4001 = vmatmul.mubr.msk.bf16.vlgmr.msra.gmra.mxu0 %vm727_vm2, %v4880_v3  ;;  %v4994_v36 = vld [vmem:[%s4447_s8 + $0x18] sm:$0xff]  }
 0x138   : > { %v1124_v34 = vadd.f32 %v1081_v21, %v4834_v20  ;;  %4043 = vmatpush3.bf16.msra.mxu0 %v2871_v27  ;;  %4004 = vmatprep.mubr.msk.bf16.mxu0 %vm4249_vm1, %v4248_v45  ;;  %v1211_v38 = vpop.f32.mrf.mxu1  ;;  %v2681_v20 = vshll.u32 %v4921_v33, 16 }
 0x139   : > { %v3786_v37 = vpop.f32.mrf.mxu0  ;;  %v4929_v42 = vadd.f32 %v1211_v38, %v1123_v24 }
 0x13a   : > { %v3805_v50 = vpop.f32.mrf.mxu1 }
 0x13b   : > { %v1084_v43 = vpop.f32.mrf.mxu0 }
 0x13c   : > { %v1125_v48 = vadd.f32 %v1084_v43, %v4843_v28  ;;  %v1216_v53 = vpop.f32.mrf.mxu1  ;;  %4023 = vmatmul.mubr.msk.bf16.vlgmr.msra.gmra.mxu1 %vm727_vm2, %v2677_v46  ;;  %v2683_v28 = vrot.slane %v2681_v20, 1  ;;  %v2833_v43 = vrot.slane %v2678_v47, 4  ;;  %v2834_v47 = vrot.slane %v2674_v23, 5 }
 0x13d   : > { %v3787_v52 = vpop.f32.mrf.mxu0  ;;  %v4937_v29 = vadd.f32 %v1216_v53, %v1124_v34  ;;  %4065 = vmatpush3.bf16.msra.mxu1 %v3005_v51  ;;  %4026 = vmatprep.mubr.msk.bf16.mxu1 %vm4249_vm1, %v4248_v45  ;;  %v2703_v53 = vshll.u32 %v4994_v36, 16 }
 0x13e   : > { %v3808_v59 = vpop.f32.mrf.mxu1  ;;  %v2684_v0 = vsel %vm832_vm3, %v2680_v55, %v2683_v28  ;;  %v2687_v11 = vor.u32 %v2685_v2, %v2683_v28  ;;  %v2699_v52 = vshrl.u32 %v4971_v14, 16  ;;  %v2830_v55 = vrot.slane %v2668_v22, 4 }
 0x13f   : > { %v1089_v54 = vpop.f32.mrf.mxu0  ;;  %4005 = vmatmul.mubr.msk.bf16.gmra.mxu0 %vm727_vm2, %v4891_v13  ;;  %v2831_v28 = vrot.slane %v2670_v8, 5  ;;  %v2705_v8 = vrot.slane %v2703_v53, 1 }
 0x140   : > { %v1126_v58 = vadd.f32 %v1089_v54, %v4852_v39  ;;  %4008 = vmatprep.mubr.msk.bf16.mxu0 %vm4249_vm1, %v4248_v45  ;;  %v1219_v60 = vpop.f32.mrf.mxu1 }
 0x141   : > { %v3790_v44 = vpop.f32.mrf.mxu0  ;;  %v4953_v61 = vadd.f32 %v1219_v60, %v1125_v48 }
 0x142   : > { %v3809_v5 = vpop.f32.mrf.mxu1 }
 0x143   : > { %v1092_v62 = vpop.f32.mrf.mxu0 }
 0x144   : > { %v1127_v39 = vadd.f32 %v1092_v62, %v4861_v49  ;;  %v1224_v35 = vpop.f32.mrf.mxu1  ;;  %4027 = vmatmul.mubr.msk.bf16.gmra.mxu1 %vm727_vm2, %v2684_v0  ;;  %v2690_v49 = vrot.slane %v2688_v4, 1  ;;  %v2832_v62 = vor.u32 %v2831_v28, %v2830_v55  ;;  %v2835_v0 = vor.u32 %v2834_v47, %v2833_v43 }
 0x145   : > { %v3791_v6 = vpop.f32.mrf.mxu0  ;;  %v4960_v7 = vadd.f32 %v1224_v35, %v1126_v58  ;;  %4030 = vmatprep.mubr.msk.bf16.mxu1 %vm4249_vm1, %v4248_v45 }
 0x146   : > { %v3812_v41 = vpop.f32.mrf.mxu1  ;;  %v2691_v24 = vsel %vm832_vm3, %v2687_v11, %v2690_v49  ;;  %v2694_v34 = vor.u32 %v2692_v25, %v2690_v49 }
 0x147   : > { %v1097_v10 = vpop.f32.mrf.mxu0  ;;  %4009 = vmatmul.mubr.msk.bf16.gmra.mxu0 %vm727_vm2, %v4921_v33  ;;  %v2838_v41 = vrot.slane %v2681_v20, 5 }
 0x148   : > { %v1128_v15 = vadd.f32 %v1097_v10, %v4868_v57  ;;  %4012 = vmatprep.mubr.msk.bf16.mxu0 %vm4249_vm1, %v4248_v45  ;;  %v1227_v17 = vpop.f32.mrf.mxu1 }
 0x149   : > { %v3794_v16 = vpop.f32.mrf.mxu0  ;;  %v4976_v19 = vadd.f32 %v1227_v17, %v1127_v39 }
 0x14a   : > { %v3813_v30 = vpop.f32.mrf.mxu1 }
 0x14b   : > { %v1100_v1 = vpop.f32.mrf.mxu0 }
 0x14c   : > { %v1129_v27 = vadd.f32 %v1100_v1, %v4876_v63  ;;  %v1232_v21 = vpop.f32.mrf.mxu1  ;;  %4031 = vmatmul.mubr.msk.bf16.gmra.mxu1 %vm727_vm2, %v2691_v24  ;;  %v2697_v63 = vrot.slane %v2695_v26, 1 }
 0x14d   : > { %v3795_v57 = vpop.f32.mrf.mxu0  ;;  %v4983_v32 = vadd.f32 %v1232_v21, %v1128_v15  ;;  %4034 = vmatprep.mubr.msk.bf16.mxu1 %vm4249_vm1, %v4248_v45  ;;  %v2836_v15 = vsel %vm995_vm4, %v2832_v62, %v2835_v0 }
 0x14e   : > { %v3816_v40 = vpop.f32.mrf.mxu1  ;;  %v2698_v51 = vsel %vm832_vm3, %v2694_v34, %v2697_v63 }
 0x14f   : > { %v1105_v12 = vpop.f32.mrf.mxu0  ;;  %4013 = vmatmul.mubr.msk.bf16.gmra.mxu0 %vm727_vm2, %v4946_v56 }
 0x150   : > { %v1130_v37 = vadd.f32 %v1105_v12, %v4885_v9  ;;  %4016 = vmatprep.mubr.msk.bf16.mxu0 %vm4249_vm1, %v4248_v45  ;;  %v1235_v46 = vpop.f32.mrf.mxu1 }
 0x151   : > { %v3798_v38 = vpop.f32.mrf.mxu0  ;;  %v5001_v48 = vadd.f32 %v1235_v46, %v1129_v27  ;;  %v2979_v27 = vrot.slane %v4891_v13, 5  ;;  %v2841_v13 = vrot.slane %v2692_v25, 4 }
 0x152   : > { %v3817_v54 = vpop.f32.mrf.mxu1 }
 0x153   : > { %v1108_v50 = vpop.f32.mrf.mxu0 }
 0x154   : > { %v1131_v9 = vadd.f32 %v1108_v50, %v4901_v18  ;;  %v1240_v59 = vpop.f32.mrf.mxu1  ;;  %4035 = vmatmul.mubr.msk.bf16.gmra.mxu1 %vm727_vm2, %v2698_v51  ;;  %v2701_v18 = vor.u32 %v2699_v52, %v2697_v63 }
 0x155   : > { %v3799_v58 = vpop.f32.mrf.mxu0  ;;  %v5014_v44 = vadd.f32 %v1240_v59, %v1130_v37  ;;  %4038 = vmatprep.mubr.msk.bf16.mxu1 %vm4249_vm1, %v4248_v45 }
 0x156   : > { %v3820_v23 = vpop.f32.mrf.mxu1  ;;  %v2706_v10 = vsel %vm832_vm3, %v2701_v18, %v2705_v8 }
 0x157   : > { %v1375_v60 = vpop.f32.mrf.mxu0  ;;  %4017 = vmatmul.mubr.msk.bf16.gmra.mxu0 %vm727_vm2, %v4971_v14 }
 0x158   : > { %v1424_v22 = vadd.f32 %v1375_v60, %v4910_v31  ;;  %4044 = vmatprep.mubr.msk.bf16.mxu0 %vm4249_vm1, %v4248_v45  ;;  %v1243_v5 = vpop.f32.mrf.mxu1  ;;  %v2837_v31 = vrot.slane %v2685_v2, 4 }
 0x159   : > { %v3826_v39 = vpop.f32.mrf.mxu0  ;;  %v5027_v6 = vadd.f32 %v1243_v5, %v1131_v9 }
 0x15a   : > { %v3821_v49 = vpop.f32.mrf.mxu1  ;;  %v2839_v20 = vor.u32 %v2838_v41, %v2837_v31  ;;  %v2852_v31 = vrot.slane %v2703_v53, 5 }
 0x15b   : > { %v1378_v35 = vpop.f32.mrf.mxu0 }
 0x15c   : > { %v1425_v11 = vadd.f32 %v1378_v35, %v4929_v42  ;;  %v1537_v17 = vpop.f32.mrf.mxu1  ;;  %4039 = vmatmul.mubr.msk.bf16.gmra.mxu1 %vm727_vm2, %v2706_v10  ;;  %v2978_v42 = vrot.slane %v4880_v3, 5  ;;  %v2840_v3 = vsel %vm995_vm4, %v2835_v0, %v2839_v20  ;;  %v2849_v0 = vshrl.u32 %v4994_v36, 16 }
 0x15d   : > { %v3827_v16 = vpop.f32.mrf.mxu0  ;;  %v5037_v1 = vadd.f32 %v1537_v17, %v1424_v22  ;;  %4066 = vmatprep.mubr.msk.bf16.mxu1 %vm4249_vm1, %v4248_v45 }
 0x15e   : > { %v3848_v30 = vpop.f32.mrf.mxu1  ;;  %v2980_v63 = vsel %vm1144_vm5, %v2978_v42, %v2979_v27 }
 0x15f   : > { %v1383_v24 = vpop.f32.mrf.mxu0  ;;  %4045 = vmatmul.mubr.msk.bf16.vlgmr.msra.gmra.mxu0 %vm727_vm2, %v2836_v15 }
 0x160   : > { %v1426_v2 = vadd.f32 %v1383_v24, %v4937_v29  ;;  %4048 = vmatprep.mubr.msk.bf16.mxu0 %vm4249_vm1, %v4248_v45  ;;  %v1540_v21 = vpop.f32.mrf.mxu1  ;;  %v2842_v29 = vrot.slane %v2688_v4, 5 }
 0x161   : > { %v3830_v57 = vpop.f32.mrf.mxu0  ;;  %v5047_v12 = vadd.f32 %v1540_v21, %v1425_v11 }
 0x162   : > { %v3849_v40 = vpop.f32.mrf.mxu1  ;;  %v2843_v4 = vor.u32 %v2842_v29, %v2841_v13  ;;  %v2987_v13 = vrot.slane %v4994_v36, 5 }
 0x163   : > { %v1386_v34 = vpop.f32.mrf.mxu0 }
 0x164   : > { %v1427_v37 = vadd.f32 %v1386_v34, %v4953_v61  ;;  %v1545_v43 = vpop.f32.mrf.mxu1  ;;  %4067 = vmatmul.mubr.msk.bf16.vlgmr.msra.gmra.mxu1 %vm727_vm2, %v2980_v63  ;;  %v2981_v61 = vrot.slane %v4921_v33, 5  ;;  %v2844_v60 = vsel %vm995_vm4, %v2839_v20, %v2843_v4  ;;  %v2845_v33 = vrot.slane %v2699_v52, 4 }
 0x165   : > { %v3831_v38 = vpop.f32.mrf.mxu0  ;;  %v5057_v46 = vadd.f32 %v1545_v43, %v1426_v2  ;;  %4070 = vmatprep.mubr.msk.bf16.mxu1 %vm4249_vm1, %v4248_v45 }
 0x166   : > { %v3852_v25 = vpop.f32.mrf.mxu1  ;;  %v2982_v47 = vsel %vm1144_vm5, %v2979_v27, %v2981_v61 }
 0x167   : > { %v1391_v50 = vpop.f32.mrf.mxu0  ;;  %4049 = vmatmul.mubr.msk.bf16.gmra.mxu0 %vm727_vm2, %v2840_v3 }
 0x168   : > { %v1428_v51 = vadd.f32 %v1391_v50, %v4960_v7  ;;  %4052 = vmatprep.mubr.msk.bf16.mxu0 %vm4249_vm1, %v4248_v45  ;;  %v1548_v54 = vpop.f32.mrf.mxu1  ;;  %v2846_v7 = vrot.slane %v2695_v26, 5 }
 0x169   : > { %v3834_v9 = vpop.f32.mrf.mxu0  ;;  %v5066_v55 = vadd.f32 %v1548_v54, %v1427_v37 }
 0x16a   : > { %v3853_v59 = vpop.f32.mrf.mxu1  ;;  %v2847_v26 = vor.u32 %v2846_v7, %v2845_v33 }
 0x16b   : > { %v1394_v28 = vpop.f32.mrf.mxu0 }
 0x16c   : > { %v1429_v58 = vadd.f32 %v1394_v28, %v4976_v19  ;;  %v1553_v8 = vpop.f32.mrf.mxu1  ;;  %4071 = vmatmul.mubr.msk.bf16.gmra.mxu1 %vm727_vm2, %v2982_v47  ;;  %v2983_v19 = vrot.slane %v4946_v56, 5  ;;  %v2848_v56 = vsel %vm995_vm4, %v2843_v4, %v2847_v26 }
 0x16d   : > { %v3835_v18 = vpop.f32.mrf.mxu0  ;;  %v5076_v22 = vadd.f32 %v1553_v8, %v1428_v51  ;;  %4074 = vmatprep.mubr.msk.bf16.mxu1 %vm4249_vm1, %v4248_v45 }
 0x16e   : > { %v3856_v52 = vpop.f32.mrf.mxu1  ;;  %v2984_v11 = vsel %vm1144_vm5, %v2981_v61, %v2983_v19 }
 0x16f   : > { %v1399_v23 = vpop.f32.mrf.mxu0  ;;  %4053 = vmatmul.mubr.msk.bf16.gmra.mxu0 %vm727_vm2, %v2844_v60 }
 0x170   : > { %v1430_v62 = vadd.f32 %v1399_v23, %v4983_v32  ;;  %4056 = vmatprep.mubr.msk.bf16.mxu0 %vm4249_vm1, %v4248_v45  ;;  %v1556_v5 = vpop.f32.mrf.mxu1  ;;  %v2851_v32 = vrot.slane %v2849_v0, 4 }
 0x171   : > { %v3838_v39 = vpop.f32.mrf.mxu0  ;;  %v5086_v35 = vadd.f32 %v1556_v5, %v1429_v58 }
 0x172   : > { %v3857_v15 = vpop.f32.mrf.mxu1  ;;  %v2853_v53 = vor.u32 %v2852_v31, %v2851_v32 }
 0x173   : > { %v1402_v10 = vpop.f32.mrf.mxu0 }
 0x174   : > { %v1431_v49 = vadd.f32 %v1402_v10, %v5001_v48  ;;  %v1561_v16 = vpop.f32.mrf.mxu1  ;;  %4075 = vmatmul.mubr.msk.bf16.gmra.mxu1 %vm727_vm2, %v2984_v11  ;;  %v2985_v48 = vrot.slane %v4971_v14, 5  ;;  %v2854_v37 = vsel %vm995_vm4, %v2847_v26, %v2853_v53 }
 0x175   : > { %v3839_v41 = vpop.f32.mrf.mxu0  ;;  %v5094_v17 = vadd.f32 %v1561_v16, %v1430_v62  ;;  %4078 = vmatprep.mubr.msk.bf16.mxu1 %vm4249_vm1, %v4248_v45 }
 0x176   : > { %v3860_v27 = vpop.f32.mrf.mxu1  ;;  %v2986_v21 = vsel %vm1144_vm5, %v2983_v19, %v2985_v48  ;;  %v2988_v51 = vsel %vm1144_vm5, %v2985_v48, %v2987_v13 }
 0x177   : > { %v1407_v24 = vpop.f32.mrf.mxu0  ;;  %4057 = vmatmul.mubr.msk.bf16.gmra.mxu0 %vm727_vm2, %v2848_v56 }
 0x178   : > { %v1432_v42 = vadd.f32 %v1407_v24, %v5014_v44  ;;  %4060 = vmatprep.mubr.msk.bf16.mxu0 %vm4249_vm1, %v4248_v45  ;;  %v1564_v30 = vpop.f32.mrf.mxu1 }
 0x179   : > { %v3842_v2 = vpop.f32.mrf.mxu0  ;;  %v1593_v20 = vadd.f32 %v1564_v30, %v1431_v49 }
 0x17a   : > { %v3861_v63 = vpop.f32.mrf.mxu1 }
 0x17b   : > { %v1410_v57 = vpop.f32.mrf.mxu0 }
 0x17c   : > { %v1433_v34 = vadd.f32 %v1410_v57, %v5027_v6  ;;  %v1569_v14 = vpop.f32.mrf.mxu1  ;;  %4079 = vmatmul.mubr.msk.bf16.gmra.mxu1 %vm727_vm2, %v2986_v21 }
 0x17d   : > { %v3843_v40 = vpop.f32.mrf.mxu0  ;;  %v1594_v44 = vadd.f32 %v1569_v14, %v1432_v42  ;;  %4082 = vmatprep.mubr.msk.bf16.mxu1 %vm4249_vm1, %v4248_v45 }
 0x17e   : > { %v3864_v38 = vpop.f32.mrf.mxu1 }
 0x17f   : > { %v1685_v3 = vpop.f32.mrf.mxu0  ;;  %4061 = vmatmul.mubr.msk.bf16.gmra.mxu0 %vm727_vm2, %v2854_v37 }
 0x180   : > { %v1734_v29 = vadd.f32 %v1685_v3, %v5037_v1  ;;  %v1572_v43 = vpop.f32.mrf.mxu1 }
 0x181   : > { %v3870_v6 = vpop.f32.mrf.mxu0  ;;  %v1595_v50 = vadd.f32 %v1572_v43, %v1433_v34 }
 0x182   : > { %v3865_v4 = vpop.f32.mrf.mxu1 }
 0x183   : > { %v1688_v61 = vpop.f32.mrf.mxu0 }
 0x184   : > { %v1735_v25 = vadd.f32 %v1688_v61, %v5047_v12  ;;  %v1819_v54 = vpop.f32.mrf.mxu1  ;;  %4083 = vmatmul.mubr.msk.bf16.gmra.mxu1 %vm727_vm2, %v2988_v51 }
 0x185   : > { %v3871_v9 = vpop.f32.mrf.mxu0  ;;  %v1868_v28 = vadd.f32 %v1819_v54, %v1734_v29 }
 0x186   : > { %v3892_v47 = vpop.f32.mrf.mxu1 }
 0x187   : > { %v1693_v45 = vpop.f32.mrf.mxu0 }
 0x188   : > { %v1736_v36 = vadd.f32 %v1693_v45, %v5057_v46  ;;  %v1822_v58 = vpop.f32.mrf.mxu1 }
 0x189   : > { %v3874_v1 = vpop.f32.mrf.mxu0  ;;  %v1869_v59 = vadd.f32 %v1822_v58, %v1735_v25 }
 0x18a   : > { %v3893_v7 = vpop.f32.mrf.mxu1 }
 0x18b   : > { %v1696_v60 = vpop.f32.mrf.mxu0 }
 0x18c   : > { %v1737_v33 = vadd.f32 %v1696_v60, %v5066_v55  ;;  %v1827_v8 = vpop.f32.mrf.mxu1 }
 0x18d   : > { %v3875_v18 = vpop.f32.mrf.mxu0  ;;  %v1870_v12 = vadd.f32 %v1827_v8, %v1736_v36 }
 0x18e   : > { %v3896_v62 = vpop.f32.mrf.mxu1 }
 0x18f   : > { %v1701_v23 = vpop.f32.mrf.mxu0 }
 0x190   : > { %v1738_v19 = vadd.f32 %v1701_v23, %v5076_v22  ;;  %v1830_v26 = vpop.f32.mrf.mxu1 }
 0x191   : > { %v3878_v52 = vpop.f32.mrf.mxu0  ;;  %v1871_v0 = vadd.f32 %v1830_v26, %v1737_v33 }
 0x192   : > { %v3897_v5 = vpop.f32.mrf.mxu1 }
 0x193   : > { %v1704_v39 = vpop.f32.mrf.mxu0 }
 0x194   : > { %v1739_v46 = vadd.f32 %v1704_v39, %v5086_v35  ;;  %v1835_v11 = vpop.f32.mrf.mxu1 }
 0x195   : > { %v3879_v10 = vpop.f32.mrf.mxu0  ;;  %v1872_v49 = vadd.f32 %v1835_v11, %v1738_v19 }
 0x196   : > { %v3900_v56 = vpop.f32.mrf.mxu1 }
 0x197   : > { %v1709_v15 = vpop.f32.mrf.mxu0 }
 0x198   : > { %v1740_v55 = vadd.f32 %v1709_v15, %v5094_v17  ;;  %v1838_v31 = vpop.f32.mrf.mxu1 }
 0x199   : > { %v3882_v32 = vpop.f32.mrf.mxu0  ;;  %v1873_v41 = vadd.f32 %v1838_v31, %v1739_v46 }
 0x19a   : > { %v3901_v24 = vpop.f32.mrf.mxu1 }
 0x19b   : > { %v1712_v16 = vpop.f32.mrf.mxu0 }
 0x19c   : > { %v1741_v22 = vadd.f32 %v1712_v16, %v1593_v20  ;;  %v1843_v42 = vpop.f32.mrf.mxu1 }
 0x19d   : > { %v3883_v48 = vpop.f32.mrf.mxu0  ;;  %v1874_v27 = vadd.f32 %v1843_v42, %v1740_v55 }
 0x19e   : > { %v3904_v35 = vpop.f32.mrf.mxu1 }
 0x19f   : > { %v1717_v53 = vpop.f32.mrf.mxu0 }
 0x1a0   : > { %v1742_v2 = vadd.f32 %v1717_v53, %v1594_v44  ;;  %v1846_v57 = vpop.f32.mrf.mxu1 }
 0x1a1   : > { %v3886_v30 = vpop.f32.mrf.mxu0  ;;  %v1875_v21 = vadd.f32 %v1846_v57, %v1741_v22 }
 0x1a2   : > { %v3905_v37 = vpop.f32.mrf.mxu1 }
 0x1a3   : > { %v1720_v34 = vpop.f32.mrf.mxu0 }
 0x1a4   : > { %v1743_v63 = vadd.f32 %v1720_v34, %v1595_v50  ;;  %v1851_v40 = vpop.f32.mrf.mxu1 }
 0x1a5   : > { %v3887_v17 = vpop.f32.mrf.mxu0  ;;  %v1876_v14 = vadd.f32 %v1851_v40, %v1742_v2 }
 0x1a6   : > { %v3908_v29 = vpop.f32.mrf.mxu1 }
 0x1a7   : > { %v1986_v3 = vpop.f32.mrf.mxu0 }
 0x1a8   : > { %v2035_v13 = vadd.f32 %v1986_v3, %v1868_v28  ;;  %v1854_v38 = vpop.f32.mrf.mxu1 }
 0x1a9   : > { %v3914_v20 = vpop.f32.mrf.mxu0  ;;  %v1877_v6 = vadd.f32 %v1854_v38, %v1743_v63 }
 0x1aa   : > { %v3909_v51 = vpop.f32.mrf.mxu1 }
 0x1ab   : > { %v1989_v43 = vpop.f32.mrf.mxu0 }
 0x1ac   : > { %v2036_v61 = vadd.f32 %v1989_v43, %v1869_v59  ;;  %v2148_v25 = vpop.f32.mrf.mxu1 }
 0x1ad   : > { %v3915_v44 = vpop.f32.mrf.mxu0  ;;  %v2197_v4 = vadd.f32 %v2148_v25, %v2035_v13 }
 0x1ae   : > { %v3936_v45 = vpop.f32.mrf.mxu1 }
 0x1af   : > { %v1994_v9 = vpop.f32.mrf.mxu0 }
 0x1b0   : > { %v2037_v54 = vadd.f32 %v1994_v9, %v1870_v12  ;;  %v2151_v36 = vpop.f32.mrf.mxu1 }
 0x1b1   : > { %v3918_v50 = vpop.f32.mrf.mxu0  ;;  %v2198_v47 = vadd.f32 %v2151_v36, %v2036_v61 }
 0x1b2   : > { %v3937_v60 = vpop.f32.mrf.mxu1 }
 0x1b3   : > { %v1997_v1 = vpop.f32.mrf.mxu0 }
 0x1b4   : > { %v2038_v58 = vadd.f32 %v1997_v1, %v1871_v0  ;;  %v2156_v33 = vpop.f32.mrf.mxu1 }
 0x1b5   : > { %v3919_v28 = vpop.f32.mrf.mxu0  ;;  %v2199_v7 = vadd.f32 %v2156_v33, %v2037_v54 }
 0x1b6   : > { %v3940_v23 = vpop.f32.mrf.mxu1 }
 0x1b7   : > { %v2002_v18 = vpop.f32.mrf.mxu0 }
 0x1b8   : > { %v2039_v8 = vadd.f32 %v2002_v18, %v1872_v49  ;;  %v2159_v19 = vpop.f32.mrf.mxu1 }
 0x1b9   : > { %v3922_v59 = vpop.f32.mrf.mxu0  ;;  %v2200_v62 = vadd.f32 %v2159_v19, %v2038_v58 }
 0x1ba   : > { %v3941_v39 = vpop.f32.mrf.mxu1 }
 0x1bb   : > { %v2005_v52 = vpop.f32.mrf.mxu0 }
 0x1bc   : > { %v2040_v26 = vadd.f32 %v2005_v52, %v1873_v41  ;;  %v2164_v46 = vpop.f32.mrf.mxu1 }
 0x1bd   : > { %v3923_v12 = vpop.f32.mrf.mxu0  ;;  %v2201_v5 = vadd.f32 %v2164_v46, %v2039_v8 }
 0x1be   : > { %v3944_v15 = vpop.f32.mrf.mxu1 }
 0x1bf   : > { %v2010_v10 = vpop.f32.mrf.mxu0 }
 0x1c0   : > { %v2041_v11 = vadd.f32 %v2010_v10, %v1874_v27  ;;  %v2167_v55 = vpop.f32.mrf.mxu1 }
 0x1c1   : > { %v3926_v0 = vpop.f32.mrf.mxu0  ;;  %v2202_v56 = vadd.f32 %v2167_v55, %v2040_v26 }
 0x1c2   : > { %v3945_v16 = vpop.f32.mrf.mxu1 }
 0x1c3   : > { %v2013_v32 = vpop.f32.mrf.mxu0 }
 0x1c4   : > { %v2042_v31 = vadd.f32 %v2013_v32, %v1875_v21  ;;  %v2172_v22 = vpop.f32.mrf.mxu1 }
 0x1c5   : > { %v3927_v49 = vpop.f32.mrf.mxu0  ;;  %v2203_v24 = vadd.f32 %v2172_v22, %v2041_v11 }
 0x1c6   : > { %v3948_v53 = vpop.f32.mrf.mxu1 }
 0x1c7   : > { %v2018_v48 = vpop.f32.mrf.mxu0 }
 0x1c8   : > { %v2043_v42 = vadd.f32 %v2018_v48, %v1876_v14  ;;  %v2175_v2 = vpop.f32.mrf.mxu1 }
 0x1c9   : > { %v3930_v41 = vpop.f32.mrf.mxu0  ;;  %v2204_v35 = vadd.f32 %v2175_v2, %v2042_v31 }
 0x1ca   : > { %v3949_v34 = vpop.f32.mrf.mxu1 }
 0x1cb   : > { %v2021_v30 = vpop.f32.mrf.mxu0 }
 0x1cc   : > { %v2044_v57 = vadd.f32 %v2021_v30, %v1877_v6  ;;  %v2180_v63 = vpop.f32.mrf.mxu1 }
 0x1cd   : > { %v3931_v27 = vpop.f32.mrf.mxu0  ;;  %v2205_v37 = vadd.f32 %v2180_v63, %v2043_v42 }
 0x1ce   : > { %v3952_v3 = vpop.f32.mrf.mxu1 }
 0x1cf   : > { %v2296_v17 = vpop.f32.mrf.mxu0 }
 0x1d0   : > { %v2345_v40 = vadd.f32 %v2296_v17, %v2197_v4  ;;  %v2183_v13 = vpop.f32.mrf.mxu1 }
 0x1d1   : > { %v3958_v21 = vpop.f32.mrf.mxu0  ;;  %v2206_v29 = vadd.f32 %v2183_v13, %v2044_v57 }
 0x1d2   : > { %v3953_v43 = vpop.f32.mrf.mxu1 }
 0x1d3   : > { %v2299_v20 = vpop.f32.mrf.mxu0 }
 0x1d4   : > { %v2346_v38 = vadd.f32 %v2299_v20, %v2198_v47  ;;  %v2430_v61 = vpop.f32.mrf.mxu1 }
 0x1d5   : > { %v3959_v14 = vpop.f32.mrf.mxu0  ;;  %v5120_v51 = vadd.f32 %v2430_v61, %v2345_v40 }
 0x1d6   : > { %v3980_v6 = vpop.f32.mrf.mxu1 }
 0x1d7   : > { %v2304_v44 = vpop.f32.mrf.mxu0 }
 0x1d8   : > { %v2347_v25 = vadd.f32 %v2304_v44, %v2199_v7  ;;  %v2433_v54 = vpop.f32.mrf.mxu1 }
 0x1d9   : > { %v3962_v9 = vpop.f32.mrf.mxu0  ;;  %v5122_v45 = vadd.f32 %v2433_v54, %v2346_v38 }
 0x1da   : > { %v3981_v36 = vpop.f32.mrf.mxu1 }
 0x1db   : > { %v2307_v50 = vpop.f32.mrf.mxu0 }
 0x1dc   : > { %v2348_v4 = vadd.f32 %v2307_v50, %v2200_v62  ;;  %v2438_v58 = vpop.f32.mrf.mxu1 }
 0x1dd   : > { %v3963_v1 = vpop.f32.mrf.mxu0  ;;  %v5124_v60 = vadd.f32 %v2438_v58, %v2347_v25 }
 0x1de   : > { %v3984_v33 = vpop.f32.mrf.mxu1 }
 0x1df   : > { %v2312_v47 = vpop.f32.mrf.mxu0 }
 0x1e0   : > { %v2349_v28 = vadd.f32 %v2312_v47, %v2201_v5  ;;  %v2441_v8 = vpop.f32.mrf.mxu1 }
 0x1e1   : > { %v3966_v18 = vpop.f32.mrf.mxu0  ;;  %v5126_v23 = vadd.f32 %v2441_v8, %v2348_v4 }
 0x1e2   : > { %v3985_v19 = vpop.f32.mrf.mxu1 }
 0x1e3   : > { %v2315_v7 = vpop.f32.mrf.mxu0 }
 0x1e4   : > { %v2350_v59 = vadd.f32 %v2315_v7, %v2202_v56  ;;  %v2446_v26 = vpop.f32.mrf.mxu1 }
 0x1e5   : > { %v3967_v52 = vpop.f32.mrf.mxu0  ;;  %v5128_v39 = vadd.f32 %v2446_v26, %v2349_v28 }
 0x1e6   : > { %v3988_v46 = vpop.f32.mrf.mxu1 }
 0x1e7   : > { %v2320_v62 = vpop.f32.mrf.mxu0 }
 0x1e8   : > { %v2351_v12 = vadd.f32 %v2320_v62, %v2203_v24  ;;  %v2449_v11 = vpop.f32.mrf.mxu1 }
 0x1e9   : > { %v3970_v10 = vpop.f32.mrf.mxu0  ;;  %v5130_v15 = vadd.f32 %v2449_v11, %v2350_v59 }
 0x1ea   : > { %v3989_v55 = vpop.f32.mrf.mxu1 }
 0x1eb   : > { %v2323_v5 = vpop.f32.mrf.mxu0 }
 0x1ec   : > { %v2352_v0 = vadd.f32 %v2323_v5, %v2204_v35  ;;  %v2454_v31 = vpop.f32.mrf.mxu1 }
 0x1ed   : > { %v3971_v32 = vpop.f32.mrf.mxu0  ;;  %v5132_v16 = vadd.f32 %v2454_v31, %v2351_v12 }
 0x1ee   : > { %v3992_v22 = vpop.f32.mrf.mxu1 }
 0x1ef   : > { %v2328_v56 = vpop.f32.mrf.mxu0 }
 0x1f0   : > { %v2353_v49 = vadd.f32 %v2328_v56, %v2205_v37  ;;  %v2457_v42 = vpop.f32.mrf.mxu1 }
 0x1f1   : > { %v3974_v48 = vpop.f32.mrf.mxu0  ;;  %v5134_v53 = vadd.f32 %v2457_v42, %v2352_v0 }
 0x1f2   : > { %v3993_v2 = vpop.f32.mrf.mxu1 }
 0x1f3   : > { %v2331_v24 = vpop.f32.mrf.mxu0 }
 0x1f4   : > { %v2354_v41 = vadd.f32 %v2331_v24, %v2206_v29  ;;  %v2462_v57 = vpop.f32.mrf.mxu1 }
 0x1f5   : > { %v3975_v30 = vpop.f32.mrf.mxu0  ;;  %v5136_v34 = vadd.f32 %v2462_v57, %v2353_v49 }
 0x1f6   : > { %v3996_v27 = vpop.f32.mrf.mxu1  ;;  %v5169_v30 = vld [vmem:[%s5246_s3] ss:$0 sm:$0xff] }
 0x1f7   : > { %v2597_v35 = vpop.f32.mrf.mxu0 }
 0x1f8   : > { %v2465_v17 = vpop.f32.mrf.mxu1  ;;  %v2646_v32 = vadd.f32 %v2597_v35, %v5120_v51  ;;  %v5175_v35 = vld [vmem:[%s5247_s4] ss:$0 sm:$0xff] }
 0x1f9   : > { %v4002_v63 = vpop.f32.mrf.mxu0  ;;  %v5138_v40 = vadd.f32 %v2465_v17, %v2354_v41 }
 0x1fa   : > { %v3997_v37 = vpop.f32.mrf.mxu1 }
 0x1fb   : > { %v2600_v3 = vpop.f32.mrf.mxu0 }
 0x1fc   : > { %v2759_v13 = vpop.f32.mrf.mxu1  ;;  %v2647_v42 = vadd.f32 %v2600_v3, %v5122_v45 }
 0x1fd   : > { %v4003_v21 = vpop.f32.mrf.mxu0  ;;  %v2808_v49 = vadd.f32 %v2759_v13, %v2646_v32 }
 0x1fe   : > { %v4024_v38 = vpop.f32.mrf.mxu1 }
 0x1ff   : > { %v2605_v20 = vpop.f32.mrf.mxu0 }
 0x200   : > { %v2762_v14 = vpop.f32.mrf.mxu1  ;;  %v2648_v45 = vadd.f32 %v2605_v20, %v5124_v60 }
 0x201   : > { %v4006_v43 = vpop.f32.mrf.mxu0  ;;  %v2809_v57 = vadd.f32 %v2762_v14, %v2647_v42 }
 0x202   : > { %v4025_v61 = vpop.f32.mrf.mxu1 }
 0x203   : > { %v2608_v29 = vpop.f32.mrf.mxu0 }
 0x204   : > { %v2767_v25 = vpop.f32.mrf.mxu1 }
 0x205   : > { %v4007_v44 = vpop.f32.mrf.mxu0  ;;  %v2810_v13 = vadd.f32 %v2767_v25, %v2648_v45 }
 0x206   : > { %v4028_v9 = vpop.f32.mrf.mxu1  ;;  %v2649_v44 = vadd.f32 %v2608_v29, %v5126_v23 }
 0x207   : > { %v5140_v6 = vpop.f32.mrf.mxu0 }
 0x208   : > { %v2770_v50 = vpop.f32.mrf.mxu1 }
 0x209   : > { %v4010_v54 = vpop.f32.mrf.mxu0  ;;  %v2811_v60 = vadd.f32 %v2770_v50, %v2649_v44 }
 0x20a   : > { %v4029_v36 = vpop.f32.mrf.mxu1 }
 0x20b   : > { %v5142_v4 = vpop.f32.mrf.mxu0 }
 0x20c   : > { %v5144_v58 = vpop.f32.mrf.mxu1 }
 0x20d   : > { %v4011_v1 = vpop.f32.mrf.mxu0 }
 0x20e   : > { %v4032_v28 = vpop.f32.mrf.mxu1 }
 0x20f   : > { %v5146_v47 = vpop.f32.mrf.mxu0 }
 0x210   : > { %v5148_v18 = vpop.f32.mrf.mxu1 }
 0x211   : > { %v4014_v33 = vpop.f32.mrf.mxu0 }
 0x212   : > { %v4033_v7 = vpop.f32.mrf.mxu1 }
 0x213   : > { %v5150_v8 = vpop.f32.mrf.mxu0  ;;  %v2650_v7 = vadd.f32 %v5140_v6, %v5128_v39 }
 0x214   : > { %v5152_v19 = vpop.f32.mrf.mxu1 }
 0x215   : > { %v4015_v59 = vpop.f32.mrf.mxu0 }
 0x216   : > { %v4036_v26 = vpop.f32.mrf.mxu1 }
 0x217   : > { %v5154_v52 = vpop.f32.mrf.mxu0 }
 0x218   : > { %v5156_v12 = vpop.f32.mrf.mxu1 }
 0x219   : > { %v4018_v62 = vpop.f32.mrf.mxu0 }
 0x21a   : > { %v4037_v10 = vpop.f32.mrf.mxu1 }
 0x21b   : > { %v5158_v46 = vpop.f32.mrf.mxu0  ;;  %v2812_v10 = vadd.f32 %v5144_v58, %v2650_v7 }
 0x21c   : > { %v5160_v5 = vpop.f32.mrf.mxu1 }
 0x21d   : > { %v4019_v11 = vpop.f32.mrf.mxu0 }
 0x21e   : > { %v4040_v55 = vpop.f32.mrf.mxu1 }
 0x21f   : > { %v2907_v0 = vpop.f32.mrf.mxu0 }
 0x220   : > { %v5163_v56 = vpop.f32.mrf.mxu1  ;;  %v2956_v24 = vadd.f32 %v2907_v0, %v2808_v49  ;;  %v2651_v49 = vadd.f32 %v5142_v4, %v5130_v15 }
 0x221   : > { %v4046_v31 = vpop.f32.mrf.mxu0 }
 0x222   : > { %v4041_v48 = vpop.f32.mrf.mxu1 }
 0x223   : > { %v2910_v22 = vpop.f32.mrf.mxu0 }
 0x224   : > { %v3041_v2 = vpop.f32.mrf.mxu1  ;;  %v2957_v17 = vadd.f32 %v2910_v22, %v2809_v57 }
 0x225   : > { %v4047_v41 = vpop.f32.mrf.mxu0  ;;  %v3090_v27 = vadd.f32 %v3041_v2, %v2956_v24  ;;  %v2813_v24 = vadd.f32 %v5148_v18, %v2651_v49 }
 0x226   : > { %v4068_v63 = vpop.f32.mrf.mxu1 }
 0x227   : > { %v2915_v51 = vpop.f32.mrf.mxu0  ;;  %v3127_v3 = vmul.f32 %v5169_v30, %v3090_v27 }
 0x228   : > { %v3044_v21 = vpop.f32.mrf.mxu1  ;;  %v2958_v9 = vadd.f32 %v2915_v51, %v2810_v13  ;;  %v2652_v51 = vadd.f32 %v5146_v47, %v5132_v16  ;;  %v2653_v47 = vadd.f32 %v5150_v8, %v5134_v53 }
 0x229   : > { %v4050_v37 = vpop.f32.mrf.mxu0  ;;  %v3144_v38 = vadd.f32 %v5175_v35, %v3127_v3  ;;  %v3091_v43 = vadd.f32 %v3044_v21, %v2957_v17 }
 0x22a   : > { %v4069_v61 = vpop.f32.mrf.mxu1  ;;  %v2814_v3 = vadd.f32 %v5152_v19, %v2652_v51  ;;  %v2815_v19 = vadd.f32 %v5156_v12, %v2653_v47 }
 0x22b   : > { %v2918_v14 = vpop.f32.mrf.mxu0  ;;  %v3128_v54 = vmul.f32 %v5169_v30, %v3091_v43  ;;  %v3164_v20 = vmul.f32 0.1, %v3144_v38  ;;  %vm3154_vm6 = vcmp.ge.f32.partialorder %v3144_v38, 0.0 }
 0x22c   : > { %v3049_v1 = vpop.f32.mrf.mxu1  ;;  %v2959_v23 = vadd.f32 %v2918_v14, %v2811_v60 }
 0x22d   : > { %v4051_v36 = vpop.f32.mrf.mxu0  ;;  %v3145_v28 = vadd.f32 %v5175_v35, %v3128_v54  ;;  %v3092_v33 = vadd.f32 %v3049_v1, %v2958_v9  ;;  %v3174_v11 = vsel %vm3154_vm6, %v3144_v38, %v3164_v20 }
 0x22e   : > { %v4072_v59 = vpop.f32.mrf.mxu1 }
 0x22f   : > { %v2923_v25 = vpop.f32.mrf.mxu0  ;;  %vm3155_vm7 = vcmp.ge.f32.partialorder %v3145_v28, 0.0  ;;  %v3165_v26 = vmul.f32 0.1, %v3145_v28  ;;  %v3129_v29 = vmul.f32 %v5169_v30, %v3092_v33 }
 0x230   : > { %v3052_v50 = vpop.f32.mrf.mxu1  ;;  %v2960_v22 = vadd.f32 %v2923_v25, %v2812_v10 }
 0x231   : > { %v4054_v62 = vpop.f32.mrf.mxu0  ;;  %v3175_v0 = vsel %vm3155_vm7, %v3145_v28, %v3165_v26  ;;  %v3146_v39 = vadd.f32 %v5175_v35, %v3129_v29  ;;  %v3093_v6 = vadd.f32 %v3052_v50, %v2959_v23  ;;  %v2654_v28 = vadd.f32 %v5154_v52, %v5136_v34 }
 0x232   : > { %v3612_v32 = vpack.c.bf16 %v3175_v0, %v3174_v11  ;;  %v4073_v31 = vpop.f32.mrf.mxu1  ;;  %v2655_v52 = vadd.f32 %v5158_v46, %v5138_v40 }
 0x233   : > { %v2926_v55 = vpop.f32.mrf.mxu0  ;;  %v3130_v58 = vmul.f32 %v5169_v30, %v3093_v6  ;;  %v3166_v41 = vmul.f32 0.1, %v3146_v39  ;;  %vm3156_vm8 = vcmp.ge.f32.partialorder %v3146_v39, 0.0  ;;  %v2816_v59 = vadd.f32 %v5160_v5, %v2654_v28 }
 0x234   : > { %3613 = vst [vmem:[%s5191_s30] sm:$0xff] %v3612_v32   ;;  %v3057_v42 = vpop.f32.mrf.mxu1  ;;  %v2961_v4 = vadd.f32 %v2926_v55, %v2813_v24  ;;  %v2817_v5 = vadd.f32 %v5163_v56, %v2655_v52 }
 0x235   : > { %v4055_v48 = vpop.f32.mrf.mxu0  ;;  %v3147_v2 = vadd.f32 %v5175_v35, %v3130_v58  ;;  %v3094_v57 = vadd.f32 %v3057_v42, %v2960_v22  ;;  %v3176_v37 = vsel %vm3156_vm8, %v3146_v39, %v3166_v41 }
 0x236   : > { %v4076_v63 = vpop.f32.mrf.mxu1 }
 0x237   : > { %v2931_v27 = vpop.f32.mrf.mxu0  ;;  %vm3157_vm9 = vcmp.ge.f32.partialorder %v3147_v2, 0.0  ;;  %v3167_v15 = vmul.f32 0.1, %v3147_v2  ;;  %v3131_v45 = vmul.f32 %v5169_v30, %v3094_v57 }
 0x238   : > { %v3060_v18 = vpop.f32.mrf.mxu1  ;;  %v2962_v61 = vadd.f32 %v2931_v27, %v2814_v3 }
 0x239   : > { %v4058_v17 = vpop.f32.mrf.mxu0  ;;  %v3177_v21 = vsel %vm3157_vm9, %v3147_v2, %v3167_v15  ;;  %v3148_v13 = vadd.f32 %v5175_v35, %v3131_v45  ;;  %v3095_v38 = vadd.f32 %v3060_v18, %v2961_v4 }
 0x23a   : > { %v3617_v14 = vpack.c.bf16 %v3177_v21, %v3176_v37  ;;  %v4077_v16 = vpop.f32.mrf.mxu1 }
 0x23b   : > { %v2934_v43 = vpop.f32.mrf.mxu0  ;;  %v3132_v44 = vmul.f32 %v5169_v30, %v3095_v38  ;;  %v3168_v36 = vmul.f32 0.1, %v3148_v13  ;;  %vm3158_vm10 = vcmp.ge.f32.partialorder %v3148_v13, 0.0 }
 0x23c   : > { %3634 = vst [vmem:[%s5191_s30 + $0x8] sm:$0xff] %v3617_v14   ;;  %v3065_v54 = vpop.f32.mrf.mxu1  ;;  %v2963_v8 = vadd.f32 %v2934_v43, %v2815_v19 }
 0x23d   : > { %v4059_v9 = vpop.f32.mrf.mxu0  ;;  %v3149_v1 = vadd.f32 %v5175_v35, %v3132_v44  ;;  %v3096_v60 = vadd.f32 %v3065_v54, %v2962_v61  ;;  %v3178_v26 = vsel %vm3158_vm10, %v3148_v13, %v3168_v36 }
 0x23e   : > { %v4080_v33 = vpop.f32.mrf.mxu1 }
 0x23f   : > { %v2939_v20 = vpop.f32.mrf.mxu0  ;;  %vm3159_vm11 = vcmp.ge.f32.partialorder %v3149_v1, 0.0  ;;  %v3169_v53 = vmul.f32 0.1, %v3149_v1  ;;  %v3133_v25 = vmul.f32 %v5169_v30, %v3096_v60 }
 0x240   : > { %v3068_v12 = vpop.f32.mrf.mxu1  ;;  %v2964_v11 = vadd.f32 %v2939_v20, %v2816_v59 }
 0x241   : > { %v4062_v7 = vpop.f32.mrf.mxu0  ;;  %v3179_v23 = vsel %vm3159_vm11, %v3149_v1, %v3169_v53  ;;  %v3150_v29 = vadd.f32 %v5175_v35, %v3133_v25  ;;  %v3097_v62 = vadd.f32 %v3068_v12, %v2963_v8 }
 0x242   : > { %v3622_v50 = vpack.c.bf16 %v3179_v23, %v3178_v26  ;;  %v4081_v34 = vpop.f32.mrf.mxu1 }
 0x243   : > { %v2942_v10 = vpop.f32.mrf.mxu0  ;;  %v3134_v0 = vmul.f32 %v5169_v30, %v3097_v62  ;;  %v3170_v55 = vmul.f32 0.1, %v3150_v29  ;;  %vm3160_vm12 = vcmp.ge.f32.partialorder %v3150_v29, 0.0 }
 0x244   : > { %3635 = vst [vmem:[%s5191_s30 + $0x10] sm:$0xff] %v3622_v50   ;;  %v3073_v6 = vpop.f32.mrf.mxu1  ;;  %v2965_v58 = vadd.f32 %v2942_v10, %v2817_v5 }
 0x245   : > { %v4063_v39 = vpop.f32.mrf.mxu0  ;;  %v3151_v32 = vadd.f32 %v5175_v35, %v3134_v0  ;;  %v3098_v31 = vadd.f32 %v3073_v6, %v2964_v11  ;;  %v3180_v48 = vsel %vm3160_vm12, %v3150_v29, %v3170_v55 }
 0x246   : > { %v4084_v49 = vpop.f32.mrf.mxu1 }
 0x247   : > { %vm3161_vm13 = vcmp.ge.f32.partialorder %v3151_v32, 0.0  ;;  %v3171_v22 = vmul.f32 0.1, %v3151_v32  ;;  %v3135_v40 = vmul.f32 %v5169_v30, %v3098_v31 }
 0x248   : > { %v3076_v46 = vpop.f32.mrf.mxu1 }
 0x249   : > { %v3181_v42 = vsel %vm3161_vm13, %v3151_v32, %v3171_v22  ;;  %v3152_v24 = vadd.f32 %v5175_v35, %v3135_v40  ;;  %v3099_v41 = vadd.f32 %v3076_v46, %v2965_v58 }
 0x24a   : > { %v3627_v56 = vpack.c.bf16 %v3181_v42, %v3180_v48  ;;  %v4085_v2 = vpop.f32.mrf.mxu1 }
 0x24b   : > { %v3136_v57 = vmul.f32 %v5169_v30, %v3099_v41  ;;  %v3172_v27 = vmul.f32 0.1, %v3152_v24  ;;  %vm3162_vm14 = vcmp.ge.f32.partialorder %v3152_v24, 0.0 }
 0x24c   : > { %3636 = vst [vmem:[%s5191_s30 + $0x18] sm:$0xff] %v3627_v56  }
 0x24d   : > { %v3153_v51 = vadd.f32 %v5175_v35, %v3136_v57  ;;  %v3182_v15 = vsel %vm3162_vm14, %v3152_v24, %v3172_v27 }
 0x24f   : > { %vm3163_vm15 = vcmp.ge.f32.partialorder %v3153_v51, 0.0  ;;  %v3173_v63 = vmul.f32 0.1, %v3153_v51 }
 0x251   : > { %v3183_v4 = vsel %vm3163_vm15, %v3153_v51, %v3173_v63 }
 0x252   : > { %v3632_v45 = vpack.c.bf16 %v3183_v4, %v3182_v15 }
 0x254   : > { %3637 = vst [vmem:[%s5191_s30 + $0x20] sm:$0xff] %v3632_v45  }
 0x255 PF: > { %s15_s22 = sadd.s32 1, %s4242_s22   ;;  %s5250_s18 = smov %s4230_s19 }
 0x256   : > { %p12_p11 = scmp.ge.s32.totalorder %s15_s22, 4   ;;  %s5251_s19 = smov %s4319_s27 }
 0x257   : > { %s5252_s20 = smov %s4238_s21  ;;  %s5253_s21 = smov %s5255_s23 }
 0x258   :  { %14 = sbr.rel (!%p12_p11) target bundleno = 3 (0x3), region = 243 }

</bundles_post_ra>
